<compile_context>
chip_gen: v7x
topology: tpu7x:2x2x1
jax: 0.10.0
libtpu: 0.0.40
codegen_flags: <defaults>
</compile_context>

<pallas_src>
import functools

import jax
import jax.numpy as jnp
from jax import lax
from jax.experimental import pallas as pl
from jax.experimental.pallas import tpu as pltpu


# x @ w.T without materializing the transpose: contract dim 1 of x with dim 1 of w.
_DOT_T = (((1,), (1,)), ((), ()))


def _softmax_lastdim(s):
    m = jnp.max(s, axis=-1, keepdims=True)
    e = jnp.exp(s - m)
    # Exact reciprocal: these probabilities are also returned as the attention maps.
    return e * pl.reciprocal(jnp.sum(e, axis=-1, keepdims=True), approx=False)


def _layer_norm(y, gamma, beta, eps=1e-6):
    mu = jnp.mean(y, axis=-1, keepdims=True)
    var = jnp.mean(jnp.square(y - mu), axis=-1, keepdims=True)
    return (y - mu) * lax.rsqrt(var + eps) * gamma + beta


def _mha_kernel(qr_ref, qi_ref, kr_ref, ki_ref, vr_ref, vi_ref, dwm_ref,
                wq_ref, wk_ref, wv_ref, wo_ref, ln_ref,
                *rest, n_head, d_k, d_v, return_attn):
    # rest = (or_ref, oi_ref[, ar_ref, ai_ref], scratch_r, scratch_i)
    or_ref, oi_ref = rest[0], rest[1]
    if return_attn:
        ar_ref, ai_ref = rest[2], rest[3]
    osr_ref, osi_ref = rest[-2], rest[-1]

    f32 = jnp.float32
    dt = or_ref.dtype
    Bb, Lq, Dm = qr_ref.shape
    Lk = kr_ref.shape[1]
    Mq, Mk = Bb * Lq, Bb * Lk
    BH = Bb * n_head

    # Inputs stay in their storage dtype for all MXU work; residual/LN math is f32.
    x_qr = qr_ref[...]                                   # (Bb, Lq, Dm)
    x_qi = qi_ref[...]
    x_qr2 = x_qr.reshape(Mq, Dm)
    x_qi2 = x_qi.reshape(Mq, Dm)
    x_kr2 = kr_ref[...].reshape(Mk, Dm)
    x_ki2 = ki_ref[...].reshape(Mk, Dm)
    x_vr2 = vr_ref[...].reshape(Mk, Dm)
    x_vi2 = vi_ref[...].reshape(Mk, Dm)

    def proj(x2, w):  # (M, Din) @ (Dout, Din)^T -> (M, Dout), f32 accumulation
        return lax.dot_general(x2, w, _DOT_T, preferred_element_type=f32).astype(dt)

    # Six projections with M = Bb*L rows (good MXU fill). 1/temperature is folded into wq on host.
    qr_p = proj(x_qr2, wq_ref[0]).reshape(Bb, Lq, n_head * d_k)
    qi_p = proj(x_qi2, wq_ref[1]).reshape(Bb, Lq, n_head * d_k)
    kr_p = proj(x_kr2, wk_ref[0]).reshape(Bb, Lk, n_head * d_k)
    ki_p = proj(x_ki2, wk_ref[1]).reshape(Bb, Lk, n_head * d_k)
    vr_p = proj(x_vr2, wv_ref[0]).reshape(Bb, Lk, n_head * d_v)
    vi_p = proj(x_vi2, wv_ref[1]).reshape(Bb, Lk, n_head * d_v)
    nki_p = -ki_p                                        # hoisted: used by every head
    nvi_p = -vi_p

    # Head-stacked, complex-fused operands built ONCE (no per-head compute loop):
    #   q_cat  = [q_r | q_i]          (Bb, H, Lq, 2dk)
    #   kr_cat = [k_r | -k_i]         (Bb, H, Lk, 2dk)
    #   ki_cat = [k_i |  k_r]         (Bb, H, Lk, 2dk)
    #   vr_cat = [[v_r], [-v_i]]      (Bb, H, 2Lk, dv)
    #   vi_cat = [[v_i], [ v_r]]      (Bb, H, 2Lk, dv)
    def head_stack(parts_fn):
        return jnp.concatenate([parts_fn(h)[:, None] for h in range(n_head)], axis=1)

    def sl(t, h, d):
        return t[:, :, h * d:(h + 1) * d]

    q_cat = head_stack(lambda h: jnp.concatenate([sl(qr_p, h, d_k), sl(qi_p, h, d_k)], axis=-1))
    kr_cat = head_stack(lambda h: jnp.concatenate([sl(kr_p, h, d_k), sl(nki_p, h, d_k)], axis=-1))
    ki_cat = head_stack(lambda h: jnp.concatenate([sl(ki_p, h, d_k), sl(kr_p, h, d_k)], axis=-1))
    vr_cat = head_stack(lambda h: jnp.concatenate([sl(vr_p, h, d_v), sl(nvi_p, h, d_v)], axis=1))
    vi_cat = head_stack(lambda h: jnp.concatenate([sl(vi_p, h, d_v), sl(vr_p, h, d_v)], axis=1))

    q_b = q_cat.reshape(BH, Lq, 2 * d_k)
    kr_b = kr_cat.reshape(BH, Lk, 2 * d_k)
    ki_b = ki_cat.reshape(BH, Lk, 2 * d_k)
    vr_b = vr_cat.reshape(BH, 2 * Lk, d_v)
    vi_b = vi_cat.reshape(BH, 2 * Lk, d_v)

    # Complex QK^T fused: 2 batched matmuls (contraction 2*d_k) over the (Bb*H) batch,
    # instead of 4*H tiny per-head matmuls.
    sr = jnp.einsum('bqd,bkd->bqk', q_b, kr_b, preferred_element_type=f32)
    si = jnp.einsum('bqd,bkd->bqk', q_b, ki_b, preferred_element_type=f32)

    dwm = dwm_ref[...].astype(f32)[:, None]              # (Bb, 1, Lq, Lk) -> broadcast over heads
    a_r = _softmax_lastdim(sr).reshape(Bb, n_head, Lq, Lk) * dwm
    a_i = _softmax_lastdim(si).reshape(Bb, n_head, Lq, Lk) * dwm
    if return_attn:
        ar_ref[...] = a_r.astype(ar_ref.dtype)
        ai_ref[...] = a_i.astype(ai_ref.dtype)

    # Complex AV fused: 2 batched matmuls with contraction 2*Lk.
    a_cat = jnp.concatenate(
        [a_r.reshape(BH, Lq, Lk), a_i.reshape(BH, Lq, Lk)], axis=-1).astype(dt)
    o_r = jnp.einsum('bqk,bkd->bqd', a_cat, vr_b, preferred_element_type=f32)
    o_i = jnp.einsum('bqk,bkd->bqd', a_cat, vi_b, preferred_element_type=f32)
    o_r4 = o_r.reshape(Bb, n_head, Lq, d_v).astype(dt)
    o_i4 = o_i.reshape(Bb, n_head, Lq, d_v).astype(dt)

    # Merge heads into a lane-dense (Bb, Lq, H*dv) VMEM scratch at static offsets
    # (replaces an H-way lane concat on the critical path).
    for h in range(n_head):
        osr_ref[:, :, h * d_v:(h + 1) * d_v] = o_r4[:, h]
        osi_ref[:, :, h * d_v:(h + 1) * d_v] = o_i4[:, h]
    out_r_m = osr_ref[...].reshape(Mq, n_head * d_v)
    out_i_m = osi_ref[...].reshape(Mq, n_head * d_v)

    # Output projection (M = Bb*Lq) + residual + LayerNorm (f32 math, eps=1e-6 as in the module).
    ln = ln_ref[...].astype(f32)                         # (4, Dm): gamma_r, beta_r, gamma_i, beta_i
    y_r = lax.dot_general(out_r_m, wo_ref[0], _DOT_T,
                          preferred_element_type=f32) + x_qr2.astype(f32)
    y_i = lax.dot_general(out_i_m, wo_ref[1], _DOT_T,
                          preferred_element_type=f32) + x_qi2.astype(f32)
    or_ref[...] = _layer_norm(y_r, ln[0:1], ln[1:2]).reshape(Bb, Lq, Dm).astype(dt)
    oi_ref[...] = _layer_norm(y_i, ln[2:3], ln[3:4]).reshape(Bb, Lq, Dm).astype(dt)


def _vmem_limit_bytes():
    try:
        cap = int(pltpu.get_tpu_info().vmem_capacity_bytes)
    except Exception:
        return None  # can't query the chip: keep the compiler's default scoped limit
    # ~48 MiB on 64 MiB parts (v7x), up to ~96-100 MiB on 128 MiB parts (v5e/v6e).
    return min(int(cap * 3 // 4), 100 * 1024 * 1024)


def _pick_block_b(B, Lq, target_rows=512):
    """Largest divisor of B such that block_b * Lq stays within a reasonable row budget."""
    bb = 1
    for cand in range(1, B + 1):
        if B % cand == 0 and cand * Lq <= max(target_rows, Lq):
            bb = cand
    return bb


def multi_head_attention(params, q_r, q_i, k_r, k_i, v_r, v_i, dwm,
                         n_head, d_k, d_v, *, return_attn=True, block_b=None):
    B, Lq, Dm = q_r.shape
    Lk = k_r.shape[1]
    dt = q_r.dtype

    bb = _pick_block_b(B, Lq) if block_b is None else block_b
    assert B % bb == 0, "block_b must divide the batch size"

    # Pack weights into a few resident blocks; fold 1/temperature into the Q projections.
    inv_t = 1.0 / (float(d_k) ** 0.5)
    wq = jnp.stack([params["w_qrs"] * inv_t, params["w_qis"] * inv_t])  # (2, H*dk, Dm)
    wk = jnp.stack([params["w_krs"], params["w_kis"]])                  # (2, H*dk, Dm)
    wv = jnp.stack([params["w_vrs"], params["w_vis"]])                  # (2, H*dv, Dm)
    wo = jnp.stack([params["frc"], params["fic"]])                      # (2, Dm, H*dv)
    ln = jnp.stack([params["ln_r_gamma"], params["ln_r_beta"],
                    params["ln_i_gamma"], params["ln_i_beta"]])         # (4, Dm)

    kernel = functools.partial(_mha_kernel, n_head=n_head, d_k=d_k, d_v=d_v,
                               return_attn=return_attn)

    x_spec = pl.BlockSpec((bb, Lq, Dm), lambda b: (b, 0, 0))
    kv_spec = pl.BlockSpec((bb, Lk, Dm), lambda b: (b, 0, 0))
    dwm_spec = pl.BlockSpec((bb, Lq, Lk), lambda b: (b, 0, 0))
    attn_spec = pl.BlockSpec((bb, n_head, Lq, Lk), lambda b: (b, 0, 0, 0))

    out_shape = [jax.ShapeDtypeStruct((B, Lq, Dm), dt),
                 jax.ShapeDtypeStruct((B, Lq, Dm), dt)]
    out_specs = [x_spec, x_spec]
    if return_attn:
        out_shape += [jax.ShapeDtypeStruct((B, n_head, Lq, Lk), dt)] * 2
        out_specs += [attn_spec, attn_spec]

    def _call(single_buffer_weights):
        if single_buffer_weights:
            def wspec(shp):
                return pl.BlockSpec(shp, lambda b: (0,) * len(shp),
                                    pipeline_mode=pl.Buffered(1))
        else:
            def wspec(shp):
                return pl.BlockSpec(shp, lambda b: (0,) * len(shp))

        in_specs = [
            x_spec, x_spec,                                   # q_r, q_i
            kv_spec, kv_spec,                                 # k_r, k_i
            kv_spec, kv_spec,                                 # v_r, v_i (len_v == len_k)
            dwm_spec,                                         # dwm
            wspec((2, n_head * d_k, Dm)),                     # wq (resident)
            wspec((2, n_head * d_k, Dm)),                     # wk
            wspec((2, n_head * d_v, Dm)),                     # wv
            wspec((2, Dm, n_head * d_v)),                     # wo
            wspec((4, Dm)),                                   # layernorm params
        ]
        return pl.pallas_call(
            kernel,
            out_shape=tuple(out_shape),
            grid=(B // bb,),
            in_specs=in_specs,
            out_specs=tuple(out_specs),
            scratch_shapes=[pltpu.VMEM((bb, Lq, n_head * d_v), dt),
                            pltpu.VMEM((bb, Lq, n_head * d_v), dt)],
            compiler_params=pltpu.CompilerParams(
                dimension_semantics=("parallel",),
                vmem_limit_bytes=_vmem_limit_bytes(),
            ),
        )(q_r, q_i, k_r, k_i, v_r, v_i, dwm, wq, wk, wv, wo, ln)

    try:
        return jax.block_until_ready(_call(True))
    except Exception:
        # Fallback if this JAX version rejects single-buffered (Buffered(1)) weight blocks.
        return _call(False)


# ----------------------------------------------------------------------------
# Pure-JAX reference (same assumed semantics) for a self-check.
# ----------------------------------------------------------------------------
def _reference(params, q_r, q_i, k_r, k_i, v_r, v_i, dwm, n_head, d_k, d_v):
    B, Lq, Dm = q_r.shape

    def proj(x, w, dh):
        y = jnp.einsum('blm,nm->bln', x, w)
        return y.reshape(B, -1, n_head, dh).transpose(0, 2, 1, 3)   # (B, H, L, dh)

    qr = proj(q_r, params["w_qrs"], d_k); qi = proj(q_i, params["w_qis"], d_k)
    kr = proj(k_r, params["w_krs"], d_k); ki = proj(k_i, params["w_kis"], d_k)
    vr = proj(v_r, params["w_vrs"], d_v); vi = proj(v_i, params["w_vis"], d_v)
    t = float(d_k) ** 0.5
    sr = (jnp.einsum('bhqd,bhkd->bhqk', qr, kr) - jnp.einsum('bhqd,bhkd->bhqk', qi, ki)) / t
    si = (jnp.einsum('bhqd,bhkd->bhqk', qr, ki) + jnp.einsum('bhqd,bhkd->bhqk', qi, kr)) / t
    ar = jax.nn.softmax(sr, axis=-1) * dwm[:, None]
    ai = jax.nn.softmax(si, axis=-1) * dwm[:, None]
    o_r = jnp.einsum('bhqk,bhkd->bhqd', ar, vr) - jnp.einsum('bhqk,bhkd->bhqd', ai, vi)
    o_i = jnp.einsum('bhqk,bhkd->bhqd', ar, vi) + jnp.einsum('bhqk,bhkd->bhqd', ai, vr)
    o_r = o_r.transpose(0, 2, 1, 3).reshape(B, Lq, n_head * d_v)
    o_i = o_i.transpose(0, 2, 1, 3).reshape(B, Lq, n_head * d_v)
    y_r = jnp.einsum('bln,dn->bld', o_r, params["frc"]) + q_r
    y_i = jnp.einsum('bln,dn->bld', o_i, params["fic"]) + q_i

    def lnorm(y, g, b):
        mu = y.mean(-1, keepdims=True)
        var = jnp.square(y - mu).mean(-1, keepdims=True)
        return (y - mu) / jnp.sqrt(var + 1e-6) * g + b

    return (lnorm(y_r, params["ln_r_gamma"], params["ln_r_beta"]),
            lnorm(y_i, params["ln_i_gamma"], params["ln_i_beta"]), ar, ai)


def init_params(key, n_head, d_model, d_k, d_v, dtype=jnp.float32):
    ks = jax.random.split(key, 8)
    scale = 0.05
    return {
        "w_qrs": jax.random.normal(ks[0], (n_head * d_k, d_model), dtype) * scale,
        "w_qis": jax.random.normal(ks[1], (n_head * d_k, d_model), dtype) * scale,
        "w_krs": jax.random.normal(ks[2], (n_head * d_k, d_model), dtype) * scale,
        "w_kis": jax.random.normal(ks[3], (n_head * d_k, d_model), dtype) * scale,
        "w_vrs": jax.random.normal(ks[4], (n_head * d_v, d_model), dtype) * scale,
        "w_vis": jax.random.normal(ks[5], (n_head * d_v, d_model), dtype) * scale,
        "frc":   jax.random.normal(ks[6], (d_model, n_head * d_v), dtype) * scale,
        "fic":   jax.random.normal(ks[7], (d_model, n_head * d_v), dtype) * scale,
        "ln_r_gamma": jnp.ones((d_model,), dtype),
        "ln_r_beta": jnp.zeros((d_model,), dtype),
        "ln_i_gamma": jnp.ones((d_model,), dtype),
        "ln_i_beta": jnp.zeros((d_model,), dtype),
    }


if __name__ == "__main__":
    n_head, d_model, d_k, d_v = 4, 32, 8, 8
    B, L = 2, 8

    key = jax.random.PRNGKey(0)
    k_par, k_in = jax.random.split(key)
    params = init_params(k_par, n_head, d_model, d_k, d_v)

    ks = jax.random.split(k_in, 7)
    q_r = jax.random.normal(ks[0], (B, L, d_model), jnp.float32)
    q_i = jax.random.normal(ks[1], (B, L, d_model), jnp.float32)
    k_r = jax.random.normal(ks[2], (B, L, d_model), jnp.float32)
    k_i = jax.random.normal(ks[3], (B, L, d_model), jnp.float32)
    v_r = jax.random.normal(ks[4], (B, L, d_model), jnp.float32)
    v_i = jax.random.normal(ks[5], (B, L, d_model), jnp.float32)
    dwm = jax.random.uniform(ks[6], (B, L, L), jnp.float32)

    out = multi_head_attention(params, q_r, q_i, k_r, k_i, v_r, v_i, dwm,
                               n_head, d_k, d_v)
    out = jax.block_until_ready(out)
    qr_o, qi_o, attn_r, attn_i = out

    assert qr_o.shape == (B, L, d_model)
    assert qi_o.shape == (B, L, d_model)
    assert attn_r.shape == (B, n_head, L, L)
    assert attn_i.shape == (B, n_head, L, L)

    # Self-check against a pure-JAX reference.
    ref = _reference(params, q_r, q_i, k_r, k_i, v_r, v_i, dwm, n_head, d_k, d_v)
    for got, want in zip(out, ref):
        assert jnp.max(jnp.abs(got - want)) < 1e-2

    print("KERNEL_OK")
</pallas_src>

<mosaic_0001>
module attributes {stable_mosaic.version = 11 : i64} {
  func.func @_mha_kernel(%arg0: i32, %arg1: memref<2x8x32xf32, #tpu.memory_space<vmem>>, %arg2: memref<2x8x32xf32, #tpu.memory_space<vmem>>, %arg3: memref<2x8x32xf32, #tpu.memory_space<vmem>>, %arg4: memref<2x8x32xf32, #tpu.memory_space<vmem>>, %arg5: memref<2x8x32xf32, #tpu.memory_space<vmem>>, %arg6: memref<2x8x32xf32, #tpu.memory_space<vmem>>, %arg7: memref<2x8x8xf32, #tpu.memory_space<vmem>>, %arg8: memref<2x32x32xf32, #tpu.memory_space<vmem>>, %arg9: memref<2x32x32xf32, #tpu.memory_space<vmem>>, %arg10: memref<2x32x32xf32, #tpu.memory_space<vmem>>, %arg11: memref<2x32x32xf32, #tpu.memory_space<vmem>>, %arg12: memref<4x32xf32, #tpu.memory_space<vmem>>, %arg13: memref<2x8x32xf32, #tpu.memory_space<vmem>>, %arg14: memref<2x8x32xf32, #tpu.memory_space<vmem>>, %arg15: memref<2x4x8x8xf32, #tpu.memory_space<vmem>>, %arg16: memref<2x4x8x8xf32, #tpu.memory_space<vmem>>, %arg17: memref<2x8x32xf32, #tpu.memory_space<vmem>>, %arg18: memref<2x8x32xf32, #tpu.memory_space<vmem>>) attributes {dimension_semantics = [#tpu.dimension_semantics<parallel>], iteration_bounds = array<i64: 1>, scalar_prefetch = 0 : i64, scratch_operands = 2 : i64, tpu.core_type = #tpu.core_type<tc>, window_params = [{transform_indices = @transform_0, window_bounds = array<i64: 2, 8, 32>}, {transform_indices = @transform_1, window_bounds = array<i64: 2, 8, 32>}, {transform_indices = @transform_2, window_bounds = array<i64: 2, 8, 32>}, {transform_indices = @transform_3, window_bounds = array<i64: 2, 8, 32>}, {transform_indices = @transform_4, window_bounds = array<i64: 2, 8, 32>}, {transform_indices = @transform_5, window_bounds = array<i64: 2, 8, 32>}, {transform_indices = @transform_6, window_bounds = array<i64: 2, 8, 8>}, {pipeline_mode = #tpu.pipeline_mode<synchronous>, transform_indices = @transform_7, window_bounds = array<i64: 2, 32, 32>}, {pipeline_mode = #tpu.pipeline_mode<synchronous>, transform_indices = @transform_8, window_bounds = array<i64: 2, 32, 32>}, {pipeline_mode = #tpu.pipeline_mode<synchronous>, transform_indices = @transform_9, window_bounds = array<i64: 2, 32, 32>}, {pipeline_mode = #tpu.pipeline_mode<synchronous>, transform_indices = @transform_10, window_bounds = array<i64: 2, 32, 32>}, {pipeline_mode = #tpu.pipeline_mode<synchronous>, transform_indices = @transform_11, window_bounds = array<i64: 4, 32>}, {transform_indices = @transform_12, window_bounds = array<i64: 2, 8, 32>}, {transform_indices = @transform_13, window_bounds = array<i64: 2, 8, 32>}, {transform_indices = @transform_14, window_bounds = array<i64: 2, 4, 8, 8>}, {transform_indices = @transform_15, window_bounds = array<i64: 2, 4, 8, 8>}]} {
    %c0 = arith.constant 0 : index
    %c0_0 = arith.constant 0 : index
    %c0_1 = arith.constant 0 : index
    %0 = vector.load %arg1[%c0, %c0_0, %c0_1] : memref<2x8x32xf32, #tpu.memory_space<vmem>>, vector<2x8x32xf32>
    %c0_2 = arith.constant 0 : index
    %c0_3 = arith.constant 0 : index
    %c0_4 = arith.constant 0 : index
    %1 = vector.load %arg2[%c0_2, %c0_3, %c0_4] : memref<2x8x32xf32, #tpu.memory_space<vmem>>, vector<2x8x32xf32>
    %2 = vector.shape_cast %0 : vector<2x8x32xf32> to vector<16x32xf32>
    %3 = vector.shape_cast %1 : vector<2x8x32xf32> to vector<16x32xf32>
    %c0_5 = arith.constant 0 : index
    %c0_6 = arith.constant 0 : index
    %c0_7 = arith.constant 0 : index
    %4 = vector.load %arg3[%c0_5, %c0_6, %c0_7] : memref<2x8x32xf32, #tpu.memory_space<vmem>>, vector<2x8x32xf32>
    %5 = vector.shape_cast %4 : vector<2x8x32xf32> to vector<16x32xf32>
    %c0_8 = arith.constant 0 : index
    %c0_9 = arith.constant 0 : index
    %c0_10 = arith.constant 0 : index
    %6 = vector.load %arg4[%c0_8, %c0_9, %c0_10] : memref<2x8x32xf32, #tpu.memory_space<vmem>>, vector<2x8x32xf32>
    %7 = vector.shape_cast %6 : vector<2x8x32xf32> to vector<16x32xf32>
    %c0_11 = arith.constant 0 : index
    %c0_12 = arith.constant 0 : index
    %c0_13 = arith.constant 0 : index
    %8 = vector.load %arg5[%c0_11, %c0_12, %c0_13] : memref<2x8x32xf32, #tpu.memory_space<vmem>>, vector<2x8x32xf32>
    %9 = vector.shape_cast %8 : vector<2x8x32xf32> to vector<16x32xf32>
    %c0_14 = arith.constant 0 : index
    %c0_15 = arith.constant 0 : index
    %c0_16 = arith.constant 0 : index
    %10 = vector.load %arg6[%c0_14, %c0_15, %c0_16] : memref<2x8x32xf32, #tpu.memory_space<vmem>>, vector<2x8x32xf32>
    %11 = vector.shape_cast %10 : vector<2x8x32xf32> to vector<16x32xf32>
    %c0_17 = arith.constant 0 : index
    %c0_18 = arith.constant 0 : index
    %c0_19 = arith.constant 0 : index
    %12 = vector.load %arg8[%c0_17, %c0_18, %c0_19] : memref<2x32x32xf32, #tpu.memory_space<vmem>>, vector<1x32x32xf32>
    %13 = vector.shape_cast %12 : vector<1x32x32xf32> to vector<32x32xf32>
    %cst = arith.constant dense<0.000000e+00> : vector<16x32xf32>
    %14 = tpu.matmul %2, %13, %cst {dimension_numbers = #tpu.dot_dimension_numbers<[1], [1], [0], [0], [0, 0, 1, 0], [], []>} : vector<16x32xf32>, vector<32x32xf32>, vector<16x32xf32> -> vector<16x32xf32>
    %15 = vector.shape_cast %14 : vector<16x32xf32> to vector<2x8x32xf32>
    %c1 = arith.constant 1 : index
    %c0_20 = arith.constant 0 : index
    %c0_21 = arith.constant 0 : index
    %16 = vector.load %arg8[%c1, %c0_20, %c0_21] : memref<2x32x32xf32, #tpu.memory_space<vmem>>, vector<1x32x32xf32>
    %17 = vector.shape_cast %16 : vector<1x32x32xf32> to vector<32x32xf32>
    %cst_22 = arith.constant dense<0.000000e+00> : vector<16x32xf32>
    %18 = tpu.matmul %3, %17, %cst_22 {dimension_numbers = #tpu.dot_dimension_numbers<[1], [1], [0], [0], [0, 0, 1, 0], [], []>} : vector<16x32xf32>, vector<32x32xf32>, vector<16x32xf32> -> vector<16x32xf32>
    %19 = vector.shape_cast %18 : vector<16x32xf32> to vector<2x8x32xf32>
    %c0_23 = arith.constant 0 : index
    %c0_24 = arith.constant 0 : index
    %c0_25 = arith.constant 0 : index
    %20 = vector.load %arg9[%c0_23, %c0_24, %c0_25] : memref<2x32x32xf32, #tpu.memory_space<vmem>>, vector<1x32x32xf32>
    %21 = vector.shape_cast %20 : vector<1x32x32xf32> to vector<32x32xf32>
    %cst_26 = arith.constant dense<0.000000e+00> : vector<16x32xf32>
    %22 = tpu.matmul %5, %21, %cst_26 {dimension_numbers = #tpu.dot_dimension_numbers<[1], [1], [0], [0], [0, 0, 1, 0], [], []>} : vector<16x32xf32>, vector<32x32xf32>, vector<16x32xf32> -> vector<16x32xf32>
    %23 = vector.shape_cast %22 : vector<16x32xf32> to vector<2x8x32xf32>
    %c1_27 = arith.constant 1 : index
    %c0_28 = arith.constant 0 : index
    %c0_29 = arith.constant 0 : index
    %24 = vector.load %arg9[%c1_27, %c0_28, %c0_29] : memref<2x32x32xf32, #tpu.memory_space<vmem>>, vector<1x32x32xf32>
    %25 = vector.shape_cast %24 : vector<1x32x32xf32> to vector<32x32xf32>
    %cst_30 = arith.constant dense<0.000000e+00> : vector<16x32xf32>
    %26 = tpu.matmul %7, %25, %cst_30 {dimension_numbers = #tpu.dot_dimension_numbers<[1], [1], [0], [0], [0, 0, 1, 0], [], []>} : vector<16x32xf32>, vector<32x32xf32>, vector<16x32xf32> -> vector<16x32xf32>
    %27 = vector.shape_cast %26 : vector<16x32xf32> to vector<2x8x32xf32>
    %c0_31 = arith.constant 0 : index
    %c0_32 = arith.constant 0 : index
    %c0_33 = arith.constant 0 : index
    %28 = vector.load %arg10[%c0_31, %c0_32, %c0_33] : memref<2x32x32xf32, #tpu.memory_space<vmem>>, vector<1x32x32xf32>
    %29 = vector.shape_cast %28 : vector<1x32x32xf32> to vector<32x32xf32>
    %cst_34 = arith.constant dense<0.000000e+00> : vector<16x32xf32>
    %30 = tpu.matmul %9, %29, %cst_34 {dimension_numbers = #tpu.dot_dimension_numbers<[1], [1], [0], [0], [0, 0, 1, 0], [], []>} : vector<16x32xf32>, vector<32x32xf32>, vector<16x32xf32> -> vector<16x32xf32>
    %31 = vector.shape_cast %30 : vector<16x32xf32> to vector<2x8x32xf32>
    %c1_35 = arith.constant 1 : index
    %c0_36 = arith.constant 0 : index
    %c0_37 = arith.constant 0 : index
    %32 = vector.load %arg10[%c1_35, %c0_36, %c0_37] : memref<2x32x32xf32, #tpu.memory_space<vmem>>, vector<1x32x32xf32>
    %33 = vector.shape_cast %32 : vector<1x32x32xf32> to vector<32x32xf32>
    %cst_38 = arith.constant dense<0.000000e+00> : vector<16x32xf32>
    %34 = tpu.matmul %11, %33, %cst_38 {dimension_numbers = #tpu.dot_dimension_numbers<[1], [1], [0], [0], [0, 0, 1, 0], [], []>} : vector<16x32xf32>, vector<32x32xf32>, vector<16x32xf32> -> vector<16x32xf32>
    %35 = vector.shape_cast %34 : vector<16x32xf32> to vector<2x8x32xf32>
    %cst_39 = arith.constant 0.000000e+00 : f32
    %36 = vector.broadcast %cst_39 : f32 to vector<2x8x32xf32>
    %37 = arith.subf %36, %27 : vector<2x8x32xf32>
    %cst_40 = arith.constant 0.000000e+00 : f32
    %38 = vector.broadcast %cst_40 : f32 to vector<2x8x32xf32>
    %39 = arith.subf %38, %35 : vector<2x8x32xf32>
    %40 = vector.extract_strided_slice %15 {offsets = [0, 0, 0], sizes = [2, 8, 8], strides = [1, 1, 1]} : vector<2x8x32xf32> to vector<2x8x8xf32>
    %41 = vector.extract_strided_slice %19 {offsets = [0, 0, 0], sizes = [2, 8, 8], strides = [1, 1, 1]} : vector<2x8x32xf32> to vector<2x8x8xf32>
    %42 = tpu.concatenate %40, %41 in 2 : vector<2x8x8xf32>, vector<2x8x8xf32> -> vector<2x8x16xf32>
    %43 = vector.shape_cast %42 : vector<2x8x16xf32> to vector<2x1x8x16xf32>
    %44 = vector.extract_strided_slice %15 {offsets = [0, 0, 8], sizes = [2, 8, 8], strides = [1, 1, 1]} : vector<2x8x32xf32> to vector<2x8x8xf32>
    %45 = vector.extract_strided_slice %19 {offsets = [0, 0, 8], sizes = [2, 8, 8], strides = [1, 1, 1]} : vector<2x8x32xf32> to vector<2x8x8xf32>
    %46 = tpu.concatenate %44, %45 in 2 : vector<2x8x8xf32>, vector<2x8x8xf32> -> vector<2x8x16xf32>
    %47 = vector.shape_cast %46 : vector<2x8x16xf32> to vector<2x1x8x16xf32>
    %48 = vector.extract_strided_slice %15 {offsets = [0, 0, 16], sizes = [2, 8, 8], strides = [1, 1, 1]} : vector<2x8x32xf32> to vector<2x8x8xf32>
    %49 = vector.extract_strided_slice %19 {offsets = [0, 0, 16], sizes = [2, 8, 8], strides = [1, 1, 1]} : vector<2x8x32xf32> to vector<2x8x8xf32>
    %50 = tpu.concatenate %48, %49 in 2 : vector<2x8x8xf32>, vector<2x8x8xf32> -> vector<2x8x16xf32>
    %51 = vector.shape_cast %50 : vector<2x8x16xf32> to vector<2x1x8x16xf32>
    %52 = vector.extract_strided_slice %15 {offsets = [0, 0, 24], sizes = [2, 8, 8], strides = [1, 1, 1]} : vector<2x8x32xf32> to vector<2x8x8xf32>
    %53 = vector.extract_strided_slice %19 {offsets = [0, 0, 24], sizes = [2, 8, 8], strides = [1, 1, 1]} : vector<2x8x32xf32> to vector<2x8x8xf32>
    %54 = tpu.concatenate %52, %53 in 2 : vector<2x8x8xf32>, vector<2x8x8xf32> -> vector<2x8x16xf32>
    %55 = vector.shape_cast %54 : vector<2x8x16xf32> to vector<2x1x8x16xf32>
    %56 = tpu.concatenate %43, %47, %51, %55 in 1 : vector<2x1x8x16xf32>, vector<2x1x8x16xf32>, vector<2x1x8x16xf32>, vector<2x1x8x16xf32> -> vector<2x4x8x16xf32>
    %57 = vector.extract_strided_slice %23 {offsets = [0, 0, 0], sizes = [2, 8, 8], strides = [1, 1, 1]} : vector<2x8x32xf32> to vector<2x8x8xf32>
    %58 = vector.extract_strided_slice %37 {offsets = [0, 0, 0], sizes = [2, 8, 8], strides = [1, 1, 1]} : vector<2x8x32xf32> to vector<2x8x8xf32>
    %59 = tpu.concatenate %57, %58 in 2 : vector<2x8x8xf32>, vector<2x8x8xf32> -> vector<2x8x16xf32>
    %60 = vector.shape_cast %59 : vector<2x8x16xf32> to vector<2x1x8x16xf32>
    %61 = vector.extract_strided_slice %23 {offsets = [0, 0, 8], sizes = [2, 8, 8], strides = [1, 1, 1]} : vector<2x8x32xf32> to vector<2x8x8xf32>
    %62 = vector.extract_strided_slice %37 {offsets = [0, 0, 8], sizes = [2, 8, 8], strides = [1, 1, 1]} : vector<2x8x32xf32> to vector<2x8x8xf32>
    %63 = tpu.concatenate %61, %62 in 2 : vector<2x8x8xf32>, vector<2x8x8xf32> -> vector<2x8x16xf32>
    %64 = vector.shape_cast %63 : vector<2x8x16xf32> to vector<2x1x8x16xf32>
    %65 = vector.extract_strided_slice %23 {offsets = [0, 0, 16], sizes = [2, 8, 8], strides = [1, 1, 1]} : vector<2x8x32xf32> to vector<2x8x8xf32>
    %66 = vector.extract_strided_slice %37 {offsets = [0, 0, 16], sizes = [2, 8, 8], strides = [1, 1, 1]} : vector<2x8x32xf32> to vector<2x8x8xf32>
    %67 = tpu.concatenate %65, %66 in 2 : vector<2x8x8xf32>, vector<2x8x8xf32> -> vector<2x8x16xf32>
    %68 = vector.shape_cast %67 : vector<2x8x16xf32> to vector<2x1x8x16xf32>
    %69 = vector.extract_strided_slice %23 {offsets = [0, 0, 24], sizes = [2, 8, 8], strides = [1, 1, 1]} : vector<2x8x32xf32> to vector<2x8x8xf32>
    %70 = vector.extract_strided_slice %37 {offsets = [0, 0, 24], sizes = [2, 8, 8], strides = [1, 1, 1]} : vector<2x8x32xf32> to vector<2x8x8xf32>
    %71 = tpu.concatenate %69, %70 in 2 : vector<2x8x8xf32>, vector<2x8x8xf32> -> vector<2x8x16xf32>
    %72 = vector.shape_cast %71 : vector<2x8x16xf32> to vector<2x1x8x16xf32>
    %73 = tpu.concatenate %60, %64, %68, %72 in 1 : vector<2x1x8x16xf32>, vector<2x1x8x16xf32>, vector<2x1x8x16xf32>, vector<2x1x8x16xf32> -> vector<2x4x8x16xf32>
    %74 = vector.extract_strided_slice %27 {offsets = [0, 0, 0], sizes = [2, 8, 8], strides = [1, 1, 1]} : vector<2x8x32xf32> to vector<2x8x8xf32>
    %75 = vector.extract_strided_slice %23 {offsets = [0, 0, 0], sizes = [2, 8, 8], strides = [1, 1, 1]} : vector<2x8x32xf32> to vector<2x8x8xf32>
    %76 = tpu.concatenate %74, %75 in 2 : vector<2x8x8xf32>, vector<2x8x8xf32> -> vector<2x8x16xf32>
    %77 = vector.shape_cast %76 : vector<2x8x16xf32> to vector<2x1x8x16xf32>
    %78 = vector.extract_strided_slice %27 {offsets = [0, 0, 8], sizes = [2, 8, 8], strides = [1, 1, 1]} : vector<2x8x32xf32> to vector<2x8x8xf32>
    %79 = vector.extract_strided_slice %23 {offsets = [0, 0, 8], sizes = [2, 8, 8], strides = [1, 1, 1]} : vector<2x8x32xf32> to vector<2x8x8xf32>
    %80 = tpu.concatenate %78, %79 in 2 : vector<2x8x8xf32>, vector<2x8x8xf32> -> vector<2x8x16xf32>
    %81 = vector.shape_cast %80 : vector<2x8x16xf32> to vector<2x1x8x16xf32>
    %82 = vector.extract_strided_slice %27 {offsets = [0, 0, 16], sizes = [2, 8, 8], strides = [1, 1, 1]} : vector<2x8x32xf32> to vector<2x8x8xf32>
    %83 = vector.extract_strided_slice %23 {offsets = [0, 0, 16], sizes = [2, 8, 8], strides = [1, 1, 1]} : vector<2x8x32xf32> to vector<2x8x8xf32>
    %84 = tpu.concatenate %82, %83 in 2 : vector<2x8x8xf32>, vector<2x8x8xf32> -> vector<2x8x16xf32>
    %85 = vector.shape_cast %84 : vector<2x8x16xf32> to vector<2x1x8x16xf32>
    %86 = vector.extract_strided_slice %27 {offsets = [0, 0, 24], sizes = [2, 8, 8], strides = [1, 1, 1]} : vector<2x8x32xf32> to vector<2x8x8xf32>
    %87 = vector.extract_strided_slice %23 {offsets = [0, 0, 24], sizes = [2, 8, 8], strides = [1, 1, 1]} : vector<2x8x32xf32> to vector<2x8x8xf32>
    %88 = tpu.concatenate %86, %87 in 2 : vector<2x8x8xf32>, vector<2x8x8xf32> -> vector<2x8x16xf32>
    %89 = vector.shape_cast %88 : vector<2x8x16xf32> to vector<2x1x8x16xf32>
    %90 = tpu.concatenate %77, %81, %85, %89 in 1 : vector<2x1x8x16xf32>, vector<2x1x8x16xf32>, vector<2x1x8x16xf32>, vector<2x1x8x16xf32> -> vector<2x4x8x16xf32>
    %91 = vector.extract_strided_slice %31 {offsets = [0, 0, 0], sizes = [2, 8, 8], strides = [1, 1, 1]} : vector<2x8x32xf32> to vector<2x8x8xf32>
    %92 = vector.extract_strided_slice %39 {offsets = [0, 0, 0], sizes = [2, 8, 8], strides = [1, 1, 1]} : vector<2x8x32xf32> to vector<2x8x8xf32>
    %93 = tpu.concatenate %91, %92 in 1 : vector<2x8x8xf32>, vector<2x8x8xf32> -> vector<2x16x8xf32>
    %94 = vector.shape_cast %93 : vector<2x16x8xf32> to vector<2x1x16x8xf32>
    %95 = vector.extract_strided_slice %31 {offsets = [0, 0, 8], sizes = [2, 8, 8], strides = [1, 1, 1]} : vector<2x8x32xf32> to vector<2x8x8xf32>
    %96 = vector.extract_strided_slice %39 {offsets = [0, 0, 8], sizes = [2, 8, 8], strides = [1, 1, 1]} : vector<2x8x32xf32> to vector<2x8x8xf32>
    %97 = tpu.concatenate %95, %96 in 1 : vector<2x8x8xf32>, vector<2x8x8xf32> -> vector<2x16x8xf32>
    %98 = vector.shape_cast %97 : vector<2x16x8xf32> to vector<2x1x16x8xf32>
    %99 = vector.extract_strided_slice %31 {offsets = [0, 0, 16], sizes = [2, 8, 8], strides = [1, 1, 1]} : vector<2x8x32xf32> to vector<2x8x8xf32>
    %100 = vector.extract_strided_slice %39 {offsets = [0, 0, 16], sizes = [2, 8, 8], strides = [1, 1, 1]} : vector<2x8x32xf32> to vector<2x8x8xf32>
    %101 = tpu.concatenate %99, %100 in 1 : vector<2x8x8xf32>, vector<2x8x8xf32> -> vector<2x16x8xf32>
    %102 = vector.shape_cast %101 : vector<2x16x8xf32> to vector<2x1x16x8xf32>
    %103 = vector.extract_strided_slice %31 {offsets = [0, 0, 24], sizes = [2, 8, 8], strides = [1, 1, 1]} : vector<2x8x32xf32> to vector<2x8x8xf32>
    %104 = vector.extract_strided_slice %39 {offsets = [0, 0, 24], sizes = [2, 8, 8], strides = [1, 1, 1]} : vector<2x8x32xf32> to vector<2x8x8xf32>
    %105 = tpu.concatenate %103, %104 in 1 : vector<2x8x8xf32>, vector<2x8x8xf32> -> vector<2x16x8xf32>
    %106 = vector.shape_cast %105 : vector<2x16x8xf32> to vector<2x1x16x8xf32>
    %107 = tpu.concatenate %94, %98, %102, %106 in 1 : vector<2x1x16x8xf32>, vector<2x1x16x8xf32>, vector<2x1x16x8xf32>, vector<2x1x16x8xf32> -> vector<2x4x16x8xf32>
    %108 = vector.extract_strided_slice %35 {offsets = [0, 0, 0], sizes = [2, 8, 8], strides = [1, 1, 1]} : vector<2x8x32xf32> to vector<2x8x8xf32>
    %109 = vector.extract_strided_slice %31 {offsets = [0, 0, 0], sizes = [2, 8, 8], strides = [1, 1, 1]} : vector<2x8x32xf32> to vector<2x8x8xf32>
    %110 = tpu.concatenate %108, %109 in 1 : vector<2x8x8xf32>, vector<2x8x8xf32> -> vector<2x16x8xf32>
    %111 = vector.shape_cast %110 : vector<2x16x8xf32> to vector<2x1x16x8xf32>
    %112 = vector.extract_strided_slice %35 {offsets = [0, 0, 8], sizes = [2, 8, 8], strides = [1, 1, 1]} : vector<2x8x32xf32> to vector<2x8x8xf32>
    %113 = vector.extract_strided_slice %31 {offsets = [0, 0, 8], sizes = [2, 8, 8], strides = [1, 1, 1]} : vector<2x8x32xf32> to vector<2x8x8xf32>
    %114 = tpu.concatenate %112, %113 in 1 : vector<2x8x8xf32>, vector<2x8x8xf32> -> vector<2x16x8xf32>
    %115 = vector.shape_cast %114 : vector<2x16x8xf32> to vector<2x1x16x8xf32>
    %116 = vector.extract_strided_slice %35 {offsets = [0, 0, 16], sizes = [2, 8, 8], strides = [1, 1, 1]} : vector<2x8x32xf32> to vector<2x8x8xf32>
    %117 = vector.extract_strided_slice %31 {offsets = [0, 0, 16], sizes = [2, 8, 8], strides = [1, 1, 1]} : vector<2x8x32xf32> to vector<2x8x8xf32>
    %118 = tpu.concatenate %116, %117 in 1 : vector<2x8x8xf32>, vector<2x8x8xf32> -> vector<2x16x8xf32>
    %119 = vector.shape_cast %118 : vector<2x16x8xf32> to vector<2x1x16x8xf32>
    %120 = vector.extract_strided_slice %35 {offsets = [0, 0, 24], sizes = [2, 8, 8], strides = [1, 1, 1]} : vector<2x8x32xf32> to vector<2x8x8xf32>
    %121 = vector.extract_strided_slice %31 {offsets = [0, 0, 24], sizes = [2, 8, 8], strides = [1, 1, 1]} : vector<2x8x32xf32> to vector<2x8x8xf32>
    %122 = tpu.concatenate %120, %121 in 1 : vector<2x8x8xf32>, vector<2x8x8xf32> -> vector<2x16x8xf32>
    %123 = vector.shape_cast %122 : vector<2x16x8xf32> to vector<2x1x16x8xf32>
    %124 = tpu.concatenate %111, %115, %119, %123 in 1 : vector<2x1x16x8xf32>, vector<2x1x16x8xf32>, vector<2x1x16x8xf32>, vector<2x1x16x8xf32> -> vector<2x4x16x8xf32>
    %125 = vector.shape_cast %56 : vector<2x4x8x16xf32> to vector<8x8x16xf32>
    %126 = vector.shape_cast %73 : vector<2x4x8x16xf32> to vector<8x8x16xf32>
    %127 = vector.shape_cast %90 : vector<2x4x8x16xf32> to vector<8x8x16xf32>
    %128 = vector.shape_cast %107 : vector<2x4x16x8xf32> to vector<8x16x8xf32>
    %129 = vector.shape_cast %124 : vector<2x4x16x8xf32> to vector<8x16x8xf32>
    "tpu.trace_start"() <{level = 10 : i32, message = "bqd,bkd->bqk"}> : () -> ()
    %cst_41 = arith.constant dense<0.000000e+00> : vector<8x8x8xf32>
    %130 = tpu.matmul %125, %126, %cst_41 {dimension_numbers = #tpu.dot_dimension_numbers<[2], [2], [1], [1], [0, 0, 0, 1, 1, 1], [0], [0]>} : vector<8x8x16xf32>, vector<8x8x16xf32>, vector<8x8x8xf32> -> vector<8x8x8xf32>
    %cst_42 = arith.constant dense<0.000000e+00> : vector<8x8x8xf32>
    %131 = tpu.matmul %125, %127, %cst_42 {dimension_numbers = #tpu.dot_dimension_numbers<[2], [2], [1], [1], [0, 0, 0, 1, 1, 1], [0], [0]>} : vector<8x8x16xf32>, vector<8x8x16xf32>, vector<8x8x8xf32> -> vector<8x8x8xf32>
    "tpu.trace_stop"() : () -> ()
    %c0_43 = arith.constant 0 : index
    %c0_44 = arith.constant 0 : index
    %c0_45 = arith.constant 0 : index
    %132 = vector.load %arg7[%c0_43, %c0_44, %c0_45] : memref<2x8x8xf32, #tpu.memory_space<vmem>>, vector<2x8x8xf32>
    %133 = vector.shape_cast %132 : vector<2x8x8xf32> to vector<2x1x8x8xf32>
    %cst_46 = arith.constant dense<0xFF800000> : vector<8x8xf32>
    %134 = vector.multi_reduction <maximumf>, %130, %cst_46 [2] : vector<8x8x8xf32> to vector<8x8xf32>
    %135 = vector.shape_cast %134 : vector<8x8xf32> to vector<8x8x1xf32>
    %136 = vector.broadcast %135 : vector<8x8x1xf32> to vector<8x8x8xf32>
    %137 = arith.subf %130, %136 : vector<8x8x8xf32>
    %138 = math.exp %137 : vector<8x8x8xf32>
    %cst_47 = arith.constant dense<0.000000e+00> : vector<8x8xf32>
    %139 = vector.multi_reduction <add>, %138, %cst_47 [2] : vector<8x8x8xf32> to vector<8x8xf32>
    %140 = vector.shape_cast %139 : vector<8x8xf32> to vector<8x8x1xf32>
    %141 = tpu.reciprocal %140 : vector<8x8x1xf32> -> vector<8x8x1xf32>
    %142 = vector.broadcast %141 : vector<8x8x1xf32> to vector<8x8x8xf32>
    %143 = arith.mulf %138, %142 : vector<8x8x8xf32>
    %144 = vector.shape_cast %143 : vector<8x8x8xf32> to vector<2x4x8x8xf32>
    %145 = vector.broadcast %133 : vector<2x1x8x8xf32> to vector<2x4x8x8xf32>
    %146 = arith.mulf %144, %145 : vector<2x4x8x8xf32>
    %cst_48 = arith.constant dense<0xFF800000> : vector<8x8xf32>
    %147 = vector.multi_reduction <maximumf>, %131, %cst_48 [2] : vector<8x8x8xf32> to vector<8x8xf32>
    %148 = vector.shape_cast %147 : vector<8x8xf32> to vector<8x8x1xf32>
    %149 = vector.broadcast %148 : vector<8x8x1xf32> to vector<8x8x8xf32>
    %150 = arith.subf %131, %149 : vector<8x8x8xf32>
    %151 = math.exp %150 : vector<8x8x8xf32>
    %cst_49 = arith.constant dense<0.000000e+00> : vector<8x8xf32>
    %152 = vector.multi_reduction <add>, %151, %cst_49 [2] : vector<8x8x8xf32> to vector<8x8xf32>
    %153 = vector.shape_cast %152 : vector<8x8xf32> to vector<8x8x1xf32>
    %154 = tpu.reciprocal %153 : vector<8x8x1xf32> -> vector<8x8x1xf32>
    %155 = vector.broadcast %154 : vector<8x8x1xf32> to vector<8x8x8xf32>
    %156 = arith.mulf %151, %155 : vector<8x8x8xf32>
    %157 = vector.shape_cast %156 : vector<8x8x8xf32> to vector<2x4x8x8xf32>
    %158 = vector.broadcast %133 : vector<2x1x8x8xf32> to vector<2x4x8x8xf32>
    %159 = arith.mulf %157, %158 : vector<2x4x8x8xf32>
    %c0_50 = arith.constant 0 : index
    %c0_51 = arith.constant 0 : index
    %c0_52 = arith.constant 0 : index
    %c0_53 = arith.constant 0 : index
    %160 = vector.load %arg15[%c0_50, %c0_51, %c0_52, %c0_53] : memref<2x4x8x8xf32, #tpu.memory_space<vmem>>, vector<2x4x8x8xf32>
    tpu.vector_store %arg15[%c0_50, %c0_51, %c0_52, %c0_53], %146 {strides = array<i32>} : memref<2x4x8x8xf32, #tpu.memory_space<vmem>>, vector<2x4x8x8xf32>,
    %c0_54 = arith.constant 0 : index
    %c0_55 = arith.constant 0 : index
    %c0_56 = arith.constant 0 : index
    %c0_57 = arith.constant 0 : index
    %161 = vector.load %arg16[%c0_54, %c0_55, %c0_56, %c0_57] : memref<2x4x8x8xf32, #tpu.memory_space<vmem>>, vector<2x4x8x8xf32>
    tpu.vector_store %arg16[%c0_54, %c0_55, %c0_56, %c0_57], %159 {strides = array<i32>} : memref<2x4x8x8xf32, #tpu.memory_space<vmem>>, vector<2x4x8x8xf32>,
    %162 = vector.shape_cast %146 : vector<2x4x8x8xf32> to vector<8x8x8xf32>
    %163 = vector.shape_cast %159 : vector<2x4x8x8xf32> to vector<8x8x8xf32>
    %164 = tpu.concatenate %162, %163 in 2 : vector<8x8x8xf32>, vector<8x8x8xf32> -> vector<8x8x16xf32>
    "tpu.trace_start"() <{level = 10 : i32, message = "bqk,bkd->bqd"}> : () -> ()
    %cst_58 = arith.constant dense<0.000000e+00> : vector<8x8x8xf32>
    %165 = tpu.matmul %164, %128, %cst_58 {dimension_numbers = #tpu.dot_dimension_numbers<[2], [1], [1], [2], [0, 0, 0, 1, 1, 2], [0], [0]>} : vector<8x8x16xf32>, vector<8x16x8xf32>, vector<8x8x8xf32> -> vector<8x8x8xf32>
    %cst_59 = arith.constant dense<0.000000e+00> : vector<8x8x8xf32>
    %166 = tpu.matmul %164, %129, %cst_59 {dimension_numbers = #tpu.dot_dimension_numbers<[2], [1], [1], [2], [0, 0, 0, 1, 1, 2], [0], [0]>} : vector<8x8x16xf32>, vector<8x16x8xf32>, vector<8x8x8xf32> -> vector<8x8x8xf32>
    "tpu.trace_stop"() : () -> ()
    %167 = vector.shape_cast %165 : vector<8x8x8xf32> to vector<2x4x8x8xf32>
    %168 = vector.shape_cast %166 : vector<8x8x8xf32> to vector<2x4x8x8xf32>
    %169 = vector.extract_strided_slice %167 {offsets = [0, 0, 0, 0], sizes = [2, 1, 8, 8], strides = [1, 1, 1, 1]} : vector<2x4x8x8xf32> to vector<2x1x8x8xf32>
    %170 = vector.shape_cast %169 : vector<2x1x8x8xf32> to vector<2x8x8xf32>
    %c0_60 = arith.constant 0 : index
    %c0_61 = arith.constant 0 : index
    %c0_62 = arith.constant 0 : index
    %171 = vector.load %arg17[%c0_60, %c0_61, %c0_62] : memref<2x8x32xf32, #tpu.memory_space<vmem>>, vector<2x8x8xf32>
    tpu.vector_store %arg17[%c0_60, %c0_61, %c0_62], %170 {strides = array<i32>} : memref<2x8x32xf32, #tpu.memory_space<vmem>>, vector<2x8x8xf32>,
    %172 = vector.extract_strided_slice %168 {offsets = [0, 0, 0, 0], sizes = [2, 1, 8, 8], strides = [1, 1, 1, 1]} : vector<2x4x8x8xf32> to vector<2x1x8x8xf32>
    %173 = vector.shape_cast %172 : vector<2x1x8x8xf32> to vector<2x8x8xf32>
    %c0_63 = arith.constant 0 : index
    %c0_64 = arith.constant 0 : index
    %c0_65 = arith.constant 0 : index
    %174 = vector.load %arg18[%c0_63, %c0_64, %c0_65] : memref<2x8x32xf32, #tpu.memory_space<vmem>>, vector<2x8x8xf32>
    tpu.vector_store %arg18[%c0_63, %c0_64, %c0_65], %173 {strides = array<i32>} : memref<2x8x32xf32, #tpu.memory_space<vmem>>, vector<2x8x8xf32>,
    %175 = vector.extract_strided_slice %167 {offsets = [0, 1, 0, 0], sizes = [2, 1, 8, 8], strides = [1, 1, 1, 1]} : vector<2x4x8x8xf32> to vector<2x1x8x8xf32>
    %176 = vector.shape_cast %175 : vector<2x1x8x8xf32> to vector<2x8x8xf32>
    %c0_66 = arith.constant 0 : index
    %c0_67 = arith.constant 0 : index
    %c8 = arith.constant 8 : index
    %177 = vector.load %arg17[%c0_66, %c0_67, %c8] : memref<2x8x32xf32, #tpu.memory_space<vmem>>, vector<2x8x8xf32>
    tpu.vector_store %arg17[%c0_66, %c0_67, %c8], %176 {strides = array<i32>} : memref<2x8x32xf32, #tpu.memory_space<vmem>>, vector<2x8x8xf32>,
    %178 = vector.extract_strided_slice %168 {offsets = [0, 1, 0, 0], sizes = [2, 1, 8, 8], strides = [1, 1, 1, 1]} : vector<2x4x8x8xf32> to vector<2x1x8x8xf32>
    %179 = vector.shape_cast %178 : vector<2x1x8x8xf32> to vector<2x8x8xf32>
    %c0_68 = arith.constant 0 : index
    %c0_69 = arith.constant 0 : index
    %c8_70 = arith.constant 8 : index
    %180 = vector.load %arg18[%c0_68, %c0_69, %c8_70] : memref<2x8x32xf32, #tpu.memory_space<vmem>>, vector<2x8x8xf32>
    tpu.vector_store %arg18[%c0_68, %c0_69, %c8_70], %179 {strides = array<i32>} : memref<2x8x32xf32, #tpu.memory_space<vmem>>, vector<2x8x8xf32>,
    %181 = vector.extract_strided_slice %167 {offsets = [0, 2, 0, 0], sizes = [2, 1, 8, 8], strides = [1, 1, 1, 1]} : vector<2x4x8x8xf32> to vector<2x1x8x8xf32>
    %182 = vector.shape_cast %181 : vector<2x1x8x8xf32> to vector<2x8x8xf32>
    %c0_71 = arith.constant 0 : index
    %c0_72 = arith.constant 0 : index
    %c16 = arith.constant 16 : index
    %183 = vector.load %arg17[%c0_71, %c0_72, %c16] : memref<2x8x32xf32, #tpu.memory_space<vmem>>, vector<2x8x8xf32>
    tpu.vector_store %arg17[%c0_71, %c0_72, %c16], %182 {strides = array<i32>} : memref<2x8x32xf32, #tpu.memory_space<vmem>>, vector<2x8x8xf32>,
    %184 = vector.extract_strided_slice %168 {offsets = [0, 2, 0, 0], sizes = [2, 1, 8, 8], strides = [1, 1, 1, 1]} : vector<2x4x8x8xf32> to vector<2x1x8x8xf32>
    %185 = vector.shape_cast %184 : vector<2x1x8x8xf32> to vector<2x8x8xf32>
    %c0_73 = arith.constant 0 : index
    %c0_74 = arith.constant 0 : index
    %c16_75 = arith.constant 16 : index
    %186 = vector.load %arg18[%c0_73, %c0_74, %c16_75] : memref<2x8x32xf32, #tpu.memory_space<vmem>>, vector<2x8x8xf32>
    tpu.vector_store %arg18[%c0_73, %c0_74, %c16_75], %185 {strides = array<i32>} : memref<2x8x32xf32, #tpu.memory_space<vmem>>, vector<2x8x8xf32>,
    %187 = vector.extract_strided_slice %167 {offsets = [0, 3, 0, 0], sizes = [2, 1, 8, 8], strides = [1, 1, 1, 1]} : vector<2x4x8x8xf32> to vector<2x1x8x8xf32>
    %188 = vector.shape_cast %187 : vector<2x1x8x8xf32> to vector<2x8x8xf32>
    %c0_76 = arith.constant 0 : index
    %c0_77 = arith.constant 0 : index
    %c24 = arith.constant 24 : index
    %189 = vector.load %arg17[%c0_76, %c0_77, %c24] : memref<2x8x32xf32, #tpu.memory_space<vmem>>, vector<2x8x8xf32>
    tpu.vector_store %arg17[%c0_76, %c0_77, %c24], %188 {strides = array<i32>} : memref<2x8x32xf32, #tpu.memory_space<vmem>>, vector<2x8x8xf32>,
    %190 = vector.extract_strided_slice %168 {offsets = [0, 3, 0, 0], sizes = [2, 1, 8, 8], strides = [1, 1, 1, 1]} : vector<2x4x8x8xf32> to vector<2x1x8x8xf32>
    %191 = vector.shape_cast %190 : vector<2x1x8x8xf32> to vector<2x8x8xf32>
    %c0_78 = arith.constant 0 : index
    %c0_79 = arith.constant 0 : index
    %c24_80 = arith.constant 24 : index
    %192 = vector.load %arg18[%c0_78, %c0_79, %c24_80] : memref<2x8x32xf32, #tpu.memory_space<vmem>>, vector<2x8x8xf32>
    tpu.vector_store %arg18[%c0_78, %c0_79, %c24_80], %191 {strides = array<i32>} : memref<2x8x32xf32, #tpu.memory_space<vmem>>, vector<2x8x8xf32>,
    %c0_81 = arith.constant 0 : index
    %c0_82 = arith.constant 0 : index
    %c0_83 = arith.constant 0 : index
    %193 = vector.load %arg17[%c0_81, %c0_82, %c0_83] : memref<2x8x32xf32, #tpu.memory_space<vmem>>, vector<2x8x32xf32>
    %194 = vector.shape_cast %193 : vector<2x8x32xf32> to vector<16x32xf32>
    %c0_84 = arith.constant 0 : index
    %c0_85 = arith.constant 0 : index
    %c0_86 = arith.constant 0 : index
    %195 = vector.load %arg18[%c0_84, %c0_85, %c0_86] : memref<2x8x32xf32, #tpu.memory_space<vmem>>, vector<2x8x32xf32>
    %196 = vector.shape_cast %195 : vector<2x8x32xf32> to vector<16x32xf32>
    %c0_87 = arith.constant 0 : index
    %c0_88 = arith.constant 0 : index
    %197 = vector.load %arg12[%c0_87, %c0_88] : memref<4x32xf32, #tpu.memory_space<vmem>>, vector<4x32xf32>
    %c0_89 = arith.constant 0 : index
    %c0_90 = arith.constant 0 : index
    %c0_91 = arith.constant 0 : index
    %198 = vector.load %arg11[%c0_89, %c0_90, %c0_91] : memref<2x32x32xf32, #tpu.memory_space<vmem>>, vector<1x32x32xf32>
    %199 = vector.shape_cast %198 : vector<1x32x32xf32> to vector<32x32xf32>
    %cst_92 = arith.constant dense<0.000000e+00> : vector<16x32xf32>
    %200 = tpu.matmul %194, %199, %cst_92 {dimension_numbers = #tpu.dot_dimension_numbers<[1], [1], [0], [0], [0, 0, 1, 0], [], []>} : vector<16x32xf32>, vector<32x32xf32>, vector<16x32xf32> -> vector<16x32xf32>
    %201 = arith.addf %200, %2 : vector<16x32xf32>
    %c1_93 = arith.constant 1 : index
    %c0_94 = arith.constant 0 : index
    %c0_95 = arith.constant 0 : index
    %202 = vector.load %arg11[%c1_93, %c0_94, %c0_95] : memref<2x32x32xf32, #tpu.memory_space<vmem>>, vector<1x32x32xf32>
    %203 = vector.shape_cast %202 : vector<1x32x32xf32> to vector<32x32xf32>
    %cst_96 = arith.constant dense<0.000000e+00> : vector<16x32xf32>
    %204 = tpu.matmul %196, %203, %cst_96 {dimension_numbers = #tpu.dot_dimension_numbers<[1], [1], [0], [0], [0, 0, 1, 0], [], []>} : vector<16x32xf32>, vector<32x32xf32>, vector<16x32xf32> -> vector<16x32xf32>
    %205 = arith.addf %204, %3 : vector<16x32xf32>
    %206 = vector.extract_strided_slice %197 {offsets = [0, 0], sizes = [1, 32], strides = [1, 1]} : vector<4x32xf32> to vector<1x32xf32>
    %207 = vector.extract_strided_slice %197 {offsets = [1, 0], sizes = [1, 32], strides = [1, 1]} : vector<4x32xf32> to vector<1x32xf32>
    %cst_97 = arith.constant dense<0.000000e+00> : vector<16xf32>
    %208 = vector.multi_reduction <add>, %201, %cst_97 [1] : vector<16x32xf32> to vector<16xf32>
    %209 = vector.shape_cast %208 : vector<16xf32> to vector<16x1xf32>
    %cst_98 = arith.constant 3.200000e+01 : f32
    %210 = vector.broadcast %cst_98 : f32 to vector<16x1xf32>
    %211 = arith.divf %209, %210 : vector<16x1xf32>
    %212 = vector.broadcast %211 : vector<16x1xf32> to vector<16x32xf32>
    %213 = arith.subf %201, %212 : vector<16x32xf32>
    %214 = arith.mulf %213, %213 : vector<16x32xf32>
    %cst_99 = arith.constant dense<0.000000e+00> : vector<16xf32>
    %215 = vector.multi_reduction <add>, %214, %cst_99 [1] : vector<16x32xf32> to vector<16xf32>
    %216 = vector.shape_cast %215 : vector<16xf32> to vector<16x1xf32>
    %cst_100 = arith.constant 3.200000e+01 : f32
    %217 = vector.broadcast %cst_100 : f32 to vector<16x1xf32>
    %218 = arith.divf %216, %217 : vector<16x1xf32>
    %219 = vector.broadcast %211 : vector<16x1xf32> to vector<16x32xf32>
    %220 = arith.subf %201, %219 : vector<16x32xf32>
    %cst_101 = arith.constant 9.99999997E-7 : f32
    %221 = vector.broadcast %cst_101 : f32 to vector<16x1xf32>
    %222 = arith.addf %218, %221 : vector<16x1xf32>
    %223 = math.rsqrt %222 : vector<16x1xf32>
    %224 = vector.broadcast %223 : vector<16x1xf32> to vector<16x32xf32>
    %225 = arith.mulf %220, %224 : vector<16x32xf32>
    %226 = vector.broadcast %206 : vector<1x32xf32> to vector<16x32xf32>
    %227 = arith.mulf %225, %226 : vector<16x32xf32>
    %228 = vector.broadcast %207 : vector<1x32xf32> to vector<16x32xf32>
    %229 = arith.addf %227, %228 : vector<16x32xf32>
    %230 = vector.shape_cast %229 : vector<16x32xf32> to vector<2x8x32xf32>
    %c0_102 = arith.constant 0 : index
    %c0_103 = arith.constant 0 : index
    %c0_104 = arith.constant 0 : index
    %231 = vector.load %arg13[%c0_102, %c0_103, %c0_104] : memref<2x8x32xf32, #tpu.memory_space<vmem>>, vector<2x8x32xf32>
    tpu.vector_store %arg13[%c0_102, %c0_103, %c0_104], %230 {strides = array<i32>} : memref<2x8x32xf32, #tpu.memory_space<vmem>>, vector<2x8x32xf32>,
    %232 = vector.extract_strided_slice %197 {offsets = [2, 0], sizes = [1, 32], strides = [1, 1]} : vector<4x32xf32> to vector<1x32xf32>
    %233 = vector.extract_strided_slice %197 {offsets = [3, 0], sizes = [1, 32], strides = [1, 1]} : vector<4x32xf32> to vector<1x32xf32>
    %cst_105 = arith.constant dense<0.000000e+00> : vector<16xf32>
    %234 = vector.multi_reduction <add>, %205, %cst_105 [1] : vector<16x32xf32> to vector<16xf32>
    %235 = vector.shape_cast %234 : vector<16xf32> to vector<16x1xf32>
    %cst_106 = arith.constant 3.200000e+01 : f32
    %236 = vector.broadcast %cst_106 : f32 to vector<16x1xf32>
    %237 = arith.divf %235, %236 : vector<16x1xf32>
    %238 = vector.broadcast %237 : vector<16x1xf32> to vector<16x32xf32>
    %239 = arith.subf %205, %238 : vector<16x32xf32>
    %240 = arith.mulf %239, %239 : vector<16x32xf32>
    %cst_107 = arith.constant dense<0.000000e+00> : vector<16xf32>
    %241 = vector.multi_reduction <add>, %240, %cst_107 [1] : vector<16x32xf32> to vector<16xf32>
    %242 = vector.shape_cast %241 : vector<16xf32> to vector<16x1xf32>
    %cst_108 = arith.constant 3.200000e+01 : f32
    %243 = vector.broadcast %cst_108 : f32 to vector<16x1xf32>
    %244 = arith.divf %242, %243 : vector<16x1xf32>
    %245 = vector.broadcast %237 : vector<16x1xf32> to vector<16x32xf32>
    %246 = arith.subf %205, %245 : vector<16x32xf32>
    %cst_109 = arith.constant 9.99999997E-7 : f32
    %247 = vector.broadcast %cst_109 : f32 to vector<16x1xf32>
    %248 = arith.addf %244, %247 : vector<16x1xf32>
    %249 = math.rsqrt %248 : vector<16x1xf32>
    %250 = vector.broadcast %249 : vector<16x1xf32> to vector<16x32xf32>
    %251 = arith.mulf %246, %250 : vector<16x32xf32>
    %252 = vector.broadcast %232 : vector<1x32xf32> to vector<16x32xf32>
    %253 = arith.mulf %251, %252 : vector<16x32xf32>
    %254 = vector.broadcast %233 : vector<1x32xf32> to vector<16x32xf32>
    %255 = arith.addf %253, %254 : vector<16x32xf32>
    %256 = vector.shape_cast %255 : vector<16x32xf32> to vector<2x8x32xf32>
    %c0_110 = arith.constant 0 : index
    %c0_111 = arith.constant 0 : index
    %c0_112 = arith.constant 0 : index
    %257 = vector.load %arg14[%c0_110, %c0_111, %c0_112] : memref<2x8x32xf32, #tpu.memory_space<vmem>>, vector<2x8x32xf32>
    tpu.vector_store %arg14[%c0_110, %c0_111, %c0_112], %256 {strides = array<i32>} : memref<2x8x32xf32, #tpu.memory_space<vmem>>, vector<2x8x32xf32>,
    return
  }
  func.func @transform_0(%arg0: i32) -> (i32, i32, i32) {
    %c0_i32 = arith.constant 0 : i32
    %c0_i32_0 = arith.constant 0 : i32
    %c0_i32_1 = arith.constant 0 : i32
    return %arg0, %c0_i32, %c0_i32_0 : i32, i32, i32
  }
  func.func @transform_1(%arg0: i32) -> (i32, i32, i32) {
    %c0_i32 = arith.constant 0 : i32
    %c0_i32_0 = arith.constant 0 : i32
    %c0_i32_1 = arith.constant 0 : i32
    return %arg0, %c0_i32, %c0_i32_0 : i32, i32, i32
  }
  func.func @transform_2(%arg0: i32) -> (i32, i32, i32) {
    %c0_i32 = arith.constant 0 : i32
    %c0_i32_0 = arith.constant 0 : i32
    %c0_i32_1 = arith.constant 0 : i32
    return %arg0, %c0_i32, %c0_i32_0 : i32, i32, i32
  }
  func.func @transform_3(%arg0: i32) -> (i32, i32, i32) {
    %c0_i32 = arith.constant 0 : i32
    %c0_i32_0 = arith.constant 0 : i32
    %c0_i32_1 = arith.constant 0 : i32
    return %arg0, %c0_i32, %c0_i32_0 : i32, i32, i32
  }
  func.func @transform_4(%arg0: i32) -> (i32, i32, i32) {
    %c0_i32 = arith.constant 0 : i32
    %c0_i32_0 = arith.constant 0 : i32
    %c0_i32_1 = arith.constant 0 : i32
    return %arg0, %c0_i32, %c0_i32_0 : i32, i32, i32
  }
  func.func @transform_5(%arg0: i32) -> (i32, i32, i32) {
    %c0_i32 = arith.constant 0 : i32
    %c0_i32_0 = arith.constant 0 : i32
    %c0_i32_1 = arith.constant 0 : i32
    return %arg0, %c0_i32, %c0_i32_0 : i32, i32, i32
  }
  func.func @transform_6(%arg0: i32) -> (i32, i32, i32) {
    %c0_i32 = arith.constant 0 : i32
    %c0_i32_0 = arith.constant 0 : i32
    %c0_i32_1 = arith.constant 0 : i32
    return %arg0, %c0_i32, %c0_i32_0 : i32, i32, i32
  }
  func.func @transform_7(%arg0: i32) -> (i32, i32, i32) {
    %c0_i32 = arith.constant 0 : i32
    %c0_i32_0 = arith.constant 0 : i32
    %c0_i32_1 = arith.constant 0 : i32
    %c0_i32_2 = arith.constant 0 : i32
    return %c0_i32, %c0_i32_0, %c0_i32_1 : i32, i32, i32
  }
  func.func @transform_8(%arg0: i32) -> (i32, i32, i32) {
    %c0_i32 = arith.constant 0 : i32
    %c0_i32_0 = arith.constant 0 : i32
    %c0_i32_1 = arith.constant 0 : i32
    %c0_i32_2 = arith.constant 0 : i32
    return %c0_i32, %c0_i32_0, %c0_i32_1 : i32, i32, i32
  }
  func.func @transform_9(%arg0: i32) -> (i32, i32, i32) {
    %c0_i32 = arith.constant 0 : i32
    %c0_i32_0 = arith.constant 0 : i32
    %c0_i32_1 = arith.constant 0 : i32
    %c0_i32_2 = arith.constant 0 : i32
    return %c0_i32, %c0_i32_0, %c0_i32_1 : i32, i32, i32
  }
  func.func @transform_10(%arg0: i32) -> (i32, i32, i32) {
    %c0_i32 = arith.constant 0 : i32
    %c0_i32_0 = arith.constant 0 : i32
    %c0_i32_1 = arith.constant 0 : i32
    %c0_i32_2 = arith.constant 0 : i32
    return %c0_i32, %c0_i32_0, %c0_i32_1 : i32, i32, i32
  }
  func.func @transform_11(%arg0: i32) -> (i32, i32) {
    %c0_i32 = arith.constant 0 : i32
    %c0_i32_0 = arith.constant 0 : i32
    %c0_i32_1 = arith.constant 0 : i32
    return %c0_i32, %c0_i32_0 : i32, i32
  }
  func.func @transform_12(%arg0: i32) -> (i32, i32, i32) {
    %c0_i32 = arith.constant 0 : i32
    %c0_i32_0 = arith.constant 0 : i32
    %c0_i32_1 = arith.constant 0 : i32
    return %arg0, %c0_i32, %c0_i32_0 : i32, i32, i32
  }
  func.func @transform_13(%arg0: i32) -> (i32, i32, i32) {
    %c0_i32 = arith.constant 0 : i32
    %c0_i32_0 = arith.constant 0 : i32
    %c0_i32_1 = arith.constant 0 : i32
    return %arg0, %c0_i32, %c0_i32_0 : i32, i32, i32
  }
  func.func @transform_14(%arg0: i32) -> (i32, i32, i32, i32) {
    %c0_i32 = arith.constant 0 : i32
    %c0_i32_0 = arith.constant 0 : i32
    %c0_i32_1 = arith.constant 0 : i32
    %c0_i32_2 = arith.constant 0 : i32
    return %arg0, %c0_i32, %c0_i32_0, %c0_i32_1 : i32, i32, i32, i32
  }
  func.func @transform_15(%arg0: i32) -> (i32, i32, i32, i32) {
    %c0_i32 = arith.constant 0 : i32
    %c0_i32_0 = arith.constant 0 : i32
    %c0_i32_1 = arith.constant 0 : i32
    %c0_i32_2 = arith.constant 0 : i32
    return %arg0, %c0_i32, %c0_i32_0, %c0_i32_1 : i32, i32, i32, i32
  }
}

module attributes {stable_mosaic.version = 11 : i64} {
  func.func @_mha_kernel(%arg0: i32, %arg1: memref<2x8x32xf32, #tpu.memory_space<vmem>>, %arg2: memref<2x8x32xf32, #tpu.memory_space<vmem>>, %arg3: memref<2x8x32xf32, #tpu.memory_space<vmem>>, %arg4: memref<2x8x32xf32, #tpu.memory_space<vmem>>, %arg5: memref<2x8x32xf32, #tpu.memory_space<vmem>>, %arg6: memref<2x8x32xf32, #tpu.memory_space<vmem>>, %arg7: memref<2x8x8xf32, #tpu.memory_space<vmem>>, %arg8: memref<2x32x32xf32, #tpu.memory_space<vmem>>, %arg9: memref<2x32x32xf32, #tpu.memory_space<vmem>>, %arg10: memref<2x32x32xf32, #tpu.memory_space<vmem>>, %arg11: memref<2x32x32xf32, #tpu.memory_space<vmem>>, %arg12: memref<4x32xf32, #tpu.memory_space<vmem>>, %arg13: memref<2x8x32xf32, #tpu.memory_space<vmem>>, %arg14: memref<2x8x32xf32, #tpu.memory_space<vmem>>, %arg15: memref<2x4x8x8xf32, #tpu.memory_space<vmem>>, %arg16: memref<2x4x8x8xf32, #tpu.memory_space<vmem>>, %arg17: memref<2x8x32xf32, #tpu.memory_space<vmem>>, %arg18: memref<2x8x32xf32, #tpu.memory_space<vmem>>) attributes {dimension_semantics = [#tpu.dimension_semantics<parallel>], iteration_bounds = array<i64: 1>, scalar_prefetch = 0 : i64, scratch_operands = 2 : i64, tpu.core_type = #tpu.core_type<tc>, window_params = [{transform_indices = @transform_0, window_bounds = array<i64: 2, 8, 32>}, {transform_indices = @transform_1, window_bounds = array<i64: 2, 8, 32>}, {transform_indices = @transform_2, window_bounds = array<i64: 2, 8, 32>}, {transform_indices = @transform_3, window_bounds = array<i64: 2, 8, 32>}, {transform_indices = @transform_4, window_bounds = array<i64: 2, 8, 32>}, {transform_indices = @transform_5, window_bounds = array<i64: 2, 8, 32>}, {transform_indices = @transform_6, window_bounds = array<i64: 2, 8, 8>}, {pipeline_mode = #tpu.pipeline_mode<synchronous>, transform_indices = @transform_7, window_bounds = array<i64: 2, 32, 32>}, {pipeline_mode = #tpu.pipeline_mode<synchronous>, transform_indices = @transform_8, window_bounds = array<i64: 2, 32, 32>}, {pipeline_mode = #tpu.pipeline_mode<synchronous>, transform_indices = @transform_9, window_bounds = array<i64: 2, 32, 32>}, {pipeline_mode = #tpu.pipeline_mode<synchronous>, transform_indices = @transform_10, window_bounds = array<i64: 2, 32, 32>}, {pipeline_mode = #tpu.pipeline_mode<synchronous>, transform_indices = @transform_11, window_bounds = array<i64: 4, 32>}, {transform_indices = @transform_12, window_bounds = array<i64: 2, 8, 32>}, {transform_indices = @transform_13, window_bounds = array<i64: 2, 8, 32>}, {transform_indices = @transform_14, window_bounds = array<i64: 2, 4, 8, 8>}, {transform_indices = @transform_15, window_bounds = array<i64: 2, 4, 8, 8>}]} {
    %c0 = arith.constant 0 : index
    %c0_0 = arith.constant 0 : index
    %c0_1 = arith.constant 0 : index
    %0 = vector.load %arg1[%c0, %c0_0, %c0_1] : memref<2x8x32xf32, #tpu.memory_space<vmem>>, vector<2x8x32xf32>
    %c0_2 = arith.constant 0 : index
    %c0_3 = arith.constant 0 : index
    %c0_4 = arith.constant 0 : index
    %1 = vector.load %arg2[%c0_2, %c0_3, %c0_4] : memref<2x8x32xf32, #tpu.memory_space<vmem>>, vector<2x8x32xf32>
    %2 = vector.shape_cast %0 : vector<2x8x32xf32> to vector<16x32xf32>
    %3 = vector.shape_cast %1 : vector<2x8x32xf32> to vector<16x32xf32>
    %c0_5 = arith.constant 0 : index
    %c0_6 = arith.constant 0 : index
    %c0_7 = arith.constant 0 : index
    %4 = vector.load %arg3[%c0_5, %c0_6, %c0_7] : memref<2x8x32xf32, #tpu.memory_space<vmem>>, vector<2x8x32xf32>
    %5 = vector.shape_cast %4 : vector<2x8x32xf32> to vector<16x32xf32>
    %c0_8 = arith.constant 0 : index
    %c0_9 = arith.constant 0 : index
    %c0_10 = arith.constant 0 : index
    %6 = vector.load %arg4[%c0_8, %c0_9, %c0_10] : memref<2x8x32xf32, #tpu.memory_space<vmem>>, vector<2x8x32xf32>
    %7 = vector.shape_cast %6 : vector<2x8x32xf32> to vector<16x32xf32>
    %c0_11 = arith.constant 0 : index
    %c0_12 = arith.constant 0 : index
    %c0_13 = arith.constant 0 : index
    %8 = vector.load %arg5[%c0_11, %c0_12, %c0_13] : memref<2x8x32xf32, #tpu.memory_space<vmem>>, vector<2x8x32xf32>
    %9 = vector.shape_cast %8 : vector<2x8x32xf32> to vector<16x32xf32>
    %c0_14 = arith.constant 0 : index
    %c0_15 = arith.constant 0 : index
    %c0_16 = arith.constant 0 : index
    %10 = vector.load %arg6[%c0_14, %c0_15, %c0_16] : memref<2x8x32xf32, #tpu.memory_space<vmem>>, vector<2x8x32xf32>
    %11 = vector.shape_cast %10 : vector<2x8x32xf32> to vector<16x32xf32>
    %c0_17 = arith.constant 0 : index
    %c0_18 = arith.constant 0 : index
    %c0_19 = arith.constant 0 : index
    %12 = vector.load %arg8[%c0_17, %c0_18, %c0_19] : memref<2x32x32xf32, #tpu.memory_space<vmem>>, vector<1x32x32xf32>
    %13 = vector.shape_cast %12 : vector<1x32x32xf32> to vector<32x32xf32>
    %cst = arith.constant dense<0.000000e+00> : vector<16x32xf32>
    %14 = tpu.matmul %2, %13, %cst {dimension_numbers = #tpu.dot_dimension_numbers<[1], [1], [0], [0], [0, 0, 1, 0], [], []>} : vector<16x32xf32>, vector<32x32xf32>, vector<16x32xf32> -> vector<16x32xf32>
    %15 = vector.shape_cast %14 : vector<16x32xf32> to vector<2x8x32xf32>
    %c1 = arith.constant 1 : index
    %c0_20 = arith.constant 0 : index
    %c0_21 = arith.constant 0 : index
    %16 = vector.load %arg8[%c1, %c0_20, %c0_21] : memref<2x32x32xf32, #tpu.memory_space<vmem>>, vector<1x32x32xf32>
    %17 = vector.shape_cast %16 : vector<1x32x32xf32> to vector<32x32xf32>
    %cst_22 = arith.constant dense<0.000000e+00> : vector<16x32xf32>
    %18 = tpu.matmul %3, %17, %cst_22 {dimension_numbers = #tpu.dot_dimension_numbers<[1], [1], [0], [0], [0, 0, 1, 0], [], []>} : vector<16x32xf32>, vector<32x32xf32>, vector<16x32xf32> -> vector<16x32xf32>
    %19 = vector.shape_cast %18 : vector<16x32xf32> to vector<2x8x32xf32>
    %c0_23 = arith.constant 0 : index
    %c0_24 = arith.constant 0 : index
    %c0_25 = arith.constant 0 : index
    %20 = vector.load %arg9[%c0_23, %c0_24, %c0_25] : memref<2x32x32xf32, #tpu.memory_space<vmem>>, vector<1x32x32xf32>
    %21 = vector.shape_cast %20 : vector<1x32x32xf32> to vector<32x32xf32>
    %cst_26 = arith.constant dense<0.000000e+00> : vector<16x32xf32>
    %22 = tpu.matmul %5, %21, %cst_26 {dimension_numbers = #tpu.dot_dimension_numbers<[1], [1], [0], [0], [0, 0, 1, 0], [], []>} : vector<16x32xf32>, vector<32x32xf32>, vector<16x32xf32> -> vector<16x32xf32>
    %23 = vector.shape_cast %22 : vector<16x32xf32> to vector<2x8x32xf32>
    %c1_27 = arith.constant 1 : index
    %c0_28 = arith.constant 0 : index
    %c0_29 = arith.constant 0 : index
    %24 = vector.load %arg9[%c1_27, %c0_28, %c0_29] : memref<2x32x32xf32, #tpu.memory_space<vmem>>, vector<1x32x32xf32>
    %25 = vector.shape_cast %24 : vector<1x32x32xf32> to vector<32x32xf32>
    %cst_30 = arith.constant dense<0.000000e+00> : vector<16x32xf32>
    %26 = tpu.matmul %7, %25, %cst_30 {dimension_numbers = #tpu.dot_dimension_numbers<[1], [1], [0], [0], [0, 0, 1, 0], [], []>} : vector<16x32xf32>, vector<32x32xf32>, vector<16x32xf32> -> vector<16x32xf32>
    %27 = vector.shape_cast %26 : vector<16x32xf32> to vector<2x8x32xf32>
    %c0_31 = arith.constant 0 : index
    %c0_32 = arith.constant 0 : index
    %c0_33 = arith.constant 0 : index
    %28 = vector.load %arg10[%c0_31, %c0_32, %c0_33] : memref<2x32x32xf32, #tpu.memory_space<vmem>>, vector<1x32x32xf32>
    %29 = vector.shape_cast %28 : vector<1x32x32xf32> to vector<32x32xf32>
    %cst_34 = arith.constant dense<0.000000e+00> : vector<16x32xf32>
    %30 = tpu.matmul %9, %29, %cst_34 {dimension_numbers = #tpu.dot_dimension_numbers<[1], [1], [0], [0], [0, 0, 1, 0], [], []>} : vector<16x32xf32>, vector<32x32xf32>, vector<16x32xf32> -> vector<16x32xf32>
    %31 = vector.shape_cast %30 : vector<16x32xf32> to vector<2x8x32xf32>
    %c1_35 = arith.constant 1 : index
    %c0_36 = arith.constant 0 : index
    %c0_37 = arith.constant 0 : index
    %32 = vector.load %arg10[%c1_35, %c0_36, %c0_37] : memref<2x32x32xf32, #tpu.memory_space<vmem>>, vector<1x32x32xf32>
    %33 = vector.shape_cast %32 : vector<1x32x32xf32> to vector<32x32xf32>
    %cst_38 = arith.constant dense<0.000000e+00> : vector<16x32xf32>
    %34 = tpu.matmul %11, %33, %cst_38 {dimension_numbers = #tpu.dot_dimension_numbers<[1], [1], [0], [0], [0, 0, 1, 0], [], []>} : vector<16x32xf32>, vector<32x32xf32>, vector<16x32xf32> -> vector<16x32xf32>
    %35 = vector.shape_cast %34 : vector<16x32xf32> to vector<2x8x32xf32>
    %cst_39 = arith.constant 0.000000e+00 : f32
    %36 = vector.broadcast %cst_39 : f32 to vector<2x8x32xf32>
    %37 = arith.subf %36, %27 : vector<2x8x32xf32>
    %cst_40 = arith.constant 0.000000e+00 : f32
    %38 = vector.broadcast %cst_40 : f32 to vector<2x8x32xf32>
    %39 = arith.subf %38, %35 : vector<2x8x32xf32>
    %40 = vector.extract_strided_slice %15 {offsets = [0, 0, 0], sizes = [2, 8, 8], strides = [1, 1, 1]} : vector<2x8x32xf32> to vector<2x8x8xf32>
    %41 = vector.extract_strided_slice %19 {offsets = [0, 0, 0], sizes = [2, 8, 8], strides = [1, 1, 1]} : vector<2x8x32xf32> to vector<2x8x8xf32>
    %42 = tpu.concatenate %40, %41 in 2 : vector<2x8x8xf32>, vector<2x8x8xf32> -> vector<2x8x16xf32>
    %43 = vector.shape_cast %42 : vector<2x8x16xf32> to vector<2x1x8x16xf32>
    %44 = vector.extract_strided_slice %15 {offsets = [0, 0, 8], sizes = [2, 8, 8], strides = [1, 1, 1]} : vector<2x8x32xf32> to vector<2x8x8xf32>
    %45 = vector.extract_strided_slice %19 {offsets = [0, 0, 8], sizes = [2, 8, 8], strides = [1, 1, 1]} : vector<2x8x32xf32> to vector<2x8x8xf32>
    %46 = tpu.concatenate %44, %45 in 2 : vector<2x8x8xf32>, vector<2x8x8xf32> -> vector<2x8x16xf32>
    %47 = vector.shape_cast %46 : vector<2x8x16xf32> to vector<2x1x8x16xf32>
    %48 = vector.extract_strided_slice %15 {offsets = [0, 0, 16], sizes = [2, 8, 8], strides = [1, 1, 1]} : vector<2x8x32xf32> to vector<2x8x8xf32>
    %49 = vector.extract_strided_slice %19 {offsets = [0, 0, 16], sizes = [2, 8, 8], strides = [1, 1, 1]} : vector<2x8x32xf32> to vector<2x8x8xf32>
    %50 = tpu.concatenate %48, %49 in 2 : vector<2x8x8xf32>, vector<2x8x8xf32> -> vector<2x8x16xf32>
    %51 = vector.shape_cast %50 : vector<2x8x16xf32> to vector<2x1x8x16xf32>
    %52 = vector.extract_strided_slice %15 {offsets = [0, 0, 24], sizes = [2, 8, 8], strides = [1, 1, 1]} : vector<2x8x32xf32> to vector<2x8x8xf32>
    %53 = vector.extract_strided_slice %19 {offsets = [0, 0, 24], sizes = [2, 8, 8], strides = [1, 1, 1]} : vector<2x8x32xf32> to vector<2x8x8xf32>
    %54 = tpu.concatenate %52, %53 in 2 : vector<2x8x8xf32>, vector<2x8x8xf32> -> vector<2x8x16xf32>
    %55 = vector.shape_cast %54 : vector<2x8x16xf32> to vector<2x1x8x16xf32>
    %56 = tpu.concatenate %43, %47, %51, %55 in 1 : vector<2x1x8x16xf32>, vector<2x1x8x16xf32>, vector<2x1x8x16xf32>, vector<2x1x8x16xf32> -> vector<2x4x8x16xf32>
    %57 = vector.extract_strided_slice %23 {offsets = [0, 0, 0], sizes = [2, 8, 8], strides = [1, 1, 1]} : vector<2x8x32xf32> to vector<2x8x8xf32>
    %58 = vector.extract_strided_slice %37 {offsets = [0, 0, 0], sizes = [2, 8, 8], strides = [1, 1, 1]} : vector<2x8x32xf32> to vector<2x8x8xf32>
    %59 = tpu.concatenate %57, %58 in 2 : vector<2x8x8xf32>, vector<2x8x8xf32> -> vector<2x8x16xf32>
    %60 = vector.shape_cast %59 : vector<2x8x16xf32> to vector<2x1x8x16xf32>
    %61 = vector.extract_strided_slice %23 {offsets = [0, 0, 8], sizes = [2, 8, 8], strides = [1, 1, 1]} : vector<2x8x32xf32> to vector<2x8x8xf32>
    %62 = vector.extract_strided_slice %37 {offsets = [0, 0, 8], sizes = [2, 8, 8], strides = [1, 1, 1]} : vector<2x8x32xf32> to vector<2x8x8xf32>
    %63 = tpu.concatenate %61, %62 in 2 : vector<2x8x8xf32>, vector<2x8x8xf32> -> vector<2x8x16xf32>
    %64 = vector.shape_cast %63 : vector<2x8x16xf32> to vector<2x1x8x16xf32>
    %65 = vector.extract_strided_slice %23 {offsets = [0, 0, 16], sizes = [2, 8, 8], strides = [1, 1, 1]} : vector<2x8x32xf32> to vector<2x8x8xf32>
    %66 = vector.extract_strided_slice %37 {offsets = [0, 0, 16], sizes = [2, 8, 8], strides = [1, 1, 1]} : vector<2x8x32xf32> to vector<2x8x8xf32>
    %67 = tpu.concatenate %65, %66 in 2 : vector<2x8x8xf32>, vector<2x8x8xf32> -> vector<2x8x16xf32>
    %68 = vector.shape_cast %67 : vector<2x8x16xf32> to vector<2x1x8x16xf32>
    %69 = vector.extract_strided_slice %23 {offsets = [0, 0, 24], sizes = [2, 8, 8], strides = [1, 1, 1]} : vector<2x8x32xf32> to vector<2x8x8xf32>
    %70 = vector.extract_strided_slice %37 {offsets = [0, 0, 24], sizes = [2, 8, 8], strides = [1, 1, 1]} : vector<2x8x32xf32> to vector<2x8x8xf32>
    %71 = tpu.concatenate %69, %70 in 2 : vector<2x8x8xf32>, vector<2x8x8xf32> -> vector<2x8x16xf32>
    %72 = vector.shape_cast %71 : vector<2x8x16xf32> to vector<2x1x8x16xf32>
    %73 = tpu.concatenate %60, %64, %68, %72 in 1 : vector<2x1x8x16xf32>, vector<2x1x8x16xf32>, vector<2x1x8x16xf32>, vector<2x1x8x16xf32> -> vector<2x4x8x16xf32>
    %74 = vector.extract_strided_slice %27 {offsets = [0, 0, 0], sizes = [2, 8, 8], strides = [1, 1, 1]} : vector<2x8x32xf32> to vector<2x8x8xf32>
    %75 = vector.extract_strided_slice %23 {offsets = [0, 0, 0], sizes = [2, 8, 8], strides = [1, 1, 1]} : vector<2x8x32xf32> to vector<2x8x8xf32>
    %76 = tpu.concatenate %74, %75 in 2 : vector<2x8x8xf32>, vector<2x8x8xf32> -> vector<2x8x16xf32>
    %77 = vector.shape_cast %76 : vector<2x8x16xf32> to vector<2x1x8x16xf32>
    %78 = vector.extract_strided_slice %27 {offsets = [0, 0, 8], sizes = [2, 8, 8], strides = [1, 1, 1]} : vector<2x8x32xf32> to vector<2x8x8xf32>
    %79 = vector.extract_strided_slice %23 {offsets = [0, 0, 8], sizes = [2, 8, 8], strides = [1, 1, 1]} : vector<2x8x32xf32> to vector<2x8x8xf32>
    %80 = tpu.concatenate %78, %79 in 2 : vector<2x8x8xf32>, vector<2x8x8xf32> -> vector<2x8x16xf32>
    %81 = vector.shape_cast %80 : vector<2x8x16xf32> to vector<2x1x8x16xf32>
    %82 = vector.extract_strided_slice %27 {offsets = [0, 0, 16], sizes = [2, 8, 8], strides = [1, 1, 1]} : vector<2x8x32xf32> to vector<2x8x8xf32>
    %83 = vector.extract_strided_slice %23 {offsets = [0, 0, 16], sizes = [2, 8, 8], strides = [1, 1, 1]} : vector<2x8x32xf32> to vector<2x8x8xf32>
    %84 = tpu.concatenate %82, %83 in 2 : vector<2x8x8xf32>, vector<2x8x8xf32> -> vector<2x8x16xf32>
    %85 = vector.shape_cast %84 : vector<2x8x16xf32> to vector<2x1x8x16xf32>
    %86 = vector.extract_strided_slice %27 {offsets = [0, 0, 24], sizes = [2, 8, 8], strides = [1, 1, 1]} : vector<2x8x32xf32> to vector<2x8x8xf32>
    %87 = vector.extract_strided_slice %23 {offsets = [0, 0, 24], sizes = [2, 8, 8], strides = [1, 1, 1]} : vector<2x8x32xf32> to vector<2x8x8xf32>
    %88 = tpu.concatenate %86, %87 in 2 : vector<2x8x8xf32>, vector<2x8x8xf32> -> vector<2x8x16xf32>
    %89 = vector.shape_cast %88 : vector<2x8x16xf32> to vector<2x1x8x16xf32>
    %90 = tpu.concatenate %77, %81, %85, %89 in 1 : vector<2x1x8x16xf32>, vector<2x1x8x16xf32>, vector<2x1x8x16xf32>, vector<2x1x8x16xf32> -> vector<2x4x8x16xf32>
    %91 = vector.extract_strided_slice %31 {offsets = [0, 0, 0], sizes = [2, 8, 8], strides = [1, 1, 1]} : vector<2x8x32xf32> to vector<2x8x8xf32>
    %92 = vector.extract_strided_slice %39 {offsets = [0, 0, 0], sizes = [2, 8, 8], strides = [1, 1, 1]} : vector<2x8x32xf32> to vector<2x8x8xf32>
    %93 = tpu.concatenate %91, %92 in 1 : vector<2x8x8xf32>, vector<2x8x8xf32> -> vector<2x16x8xf32>
    %94 = vector.shape_cast %93 : vector<2x16x8xf32> to vector<2x1x16x8xf32>
    %95 = vector.extract_strided_slice %31 {offsets = [0, 0, 8], sizes = [2, 8, 8], strides = [1, 1, 1]} : vector<2x8x32xf32> to vector<2x8x8xf32>
    %96 = vector.extract_strided_slice %39 {offsets = [0, 0, 8], sizes = [2, 8, 8], strides = [1, 1, 1]} : vector<2x8x32xf32> to vector<2x8x8xf32>
    %97 = tpu.concatenate %95, %96 in 1 : vector<2x8x8xf32>, vector<2x8x8xf32> -> vector<2x16x8xf32>
    %98 = vector.shape_cast %97 : vector<2x16x8xf32> to vector<2x1x16x8xf32>
    %99 = vector.extract_strided_slice %31 {offsets = [0, 0, 16], sizes = [2, 8, 8], strides = [1, 1, 1]} : vector<2x8x32xf32> to vector<2x8x8xf32>
    %100 = vector.extract_strided_slice %39 {offsets = [0, 0, 16], sizes = [2, 8, 8], strides = [1, 1, 1]} : vector<2x8x32xf32> to vector<2x8x8xf32>
    %101 = tpu.concatenate %99, %100 in 1 : vector<2x8x8xf32>, vector<2x8x8xf32> -> vector<2x16x8xf32>
    %102 = vector.shape_cast %101 : vector<2x16x8xf32> to vector<2x1x16x8xf32>
    %103 = vector.extract_strided_slice %31 {offsets = [0, 0, 24], sizes = [2, 8, 8], strides = [1, 1, 1]} : vector<2x8x32xf32> to vector<2x8x8xf32>
    %104 = vector.extract_strided_slice %39 {offsets = [0, 0, 24], sizes = [2, 8, 8], strides = [1, 1, 1]} : vector<2x8x32xf32> to vector<2x8x8xf32>
    %105 = tpu.concatenate %103, %104 in 1 : vector<2x8x8xf32>, vector<2x8x8xf32> -> vector<2x16x8xf32>
    %106 = vector.shape_cast %105 : vector<2x16x8xf32> to vector<2x1x16x8xf32>
    %107 = tpu.concatenate %94, %98, %102, %106 in 1 : vector<2x1x16x8xf32>, vector<2x1x16x8xf32>, vector<2x1x16x8xf32>, vector<2x1x16x8xf32> -> vector<2x4x16x8xf32>
    %108 = vector.extract_strided_slice %35 {offsets = [0, 0, 0], sizes = [2, 8, 8], strides = [1, 1, 1]} : vector<2x8x32xf32> to vector<2x8x8xf32>
    %109 = vector.extract_strided_slice %31 {offsets = [0, 0, 0], sizes = [2, 8, 8], strides = [1, 1, 1]} : vector<2x8x32xf32> to vector<2x8x8xf32>
    %110 = tpu.concatenate %108, %109 in 1 : vector<2x8x8xf32>, vector<2x8x8xf32> -> vector<2x16x8xf32>
    %111 = vector.shape_cast %110 : vector<2x16x8xf32> to vector<2x1x16x8xf32>
    %112 = vector.extract_strided_slice %35 {offsets = [0, 0, 8], sizes = [2, 8, 8], strides = [1, 1, 1]} : vector<2x8x32xf32> to vector<2x8x8xf32>
    %113 = vector.extract_strided_slice %31 {offsets = [0, 0, 8], sizes = [2, 8, 8], strides = [1, 1, 1]} : vector<2x8x32xf32> to vector<2x8x8xf32>
    %114 = tpu.concatenate %112, %113 in 1 : vector<2x8x8xf32>, vector<2x8x8xf32> -> vector<2x16x8xf32>
    %115 = vector.shape_cast %114 : vector<2x16x8xf32> to vector<2x1x16x8xf32>
    %116 = vector.extract_strided_slice %35 {offsets = [0, 0, 16], sizes = [2, 8, 8], strides = [1, 1, 1]} : vector<2x8x32xf32> to vector<2x8x8xf32>
    %117 = vector.extract_strided_slice %31 {offsets = [0, 0, 16], sizes = [2, 8, 8], strides = [1, 1, 1]} : vector<2x8x32xf32> to vector<2x8x8xf32>
    %118 = tpu.concatenate %116, %117 in 1 : vector<2x8x8xf32>, vector<2x8x8xf32> -> vector<2x16x8xf32>
    %119 = vector.shape_cast %118 : vector<2x16x8xf32> to vector<2x1x16x8xf32>
    %120 = vector.extract_strided_slice %35 {offsets = [0, 0, 24], sizes = [2, 8, 8], strides = [1, 1, 1]} : vector<2x8x32xf32> to vector<2x8x8xf32>
    %121 = vector.extract_strided_slice %31 {offsets = [0, 0, 24], sizes = [2, 8, 8], strides = [1, 1, 1]} : vector<2x8x32xf32> to vector<2x8x8xf32>
    %122 = tpu.concatenate %120, %121 in 1 : vector<2x8x8xf32>, vector<2x8x8xf32> -> vector<2x16x8xf32>
    %123 = vector.shape_cast %122 : vector<2x16x8xf32> to vector<2x1x16x8xf32>
    %124 = tpu.concatenate %111, %115, %119, %123 in 1 : vector<2x1x16x8xf32>, vector<2x1x16x8xf32>, vector<2x1x16x8xf32>, vector<2x1x16x8xf32> -> vector<2x4x16x8xf32>
    %125 = vector.shape_cast %56 : vector<2x4x8x16xf32> to vector<8x8x16xf32>
    %126 = vector.shape_cast %73 : vector<2x4x8x16xf32> to vector<8x8x16xf32>
    %127 = vector.shape_cast %90 : vector<2x4x8x16xf32> to vector<8x8x16xf32>
    %128 = vector.shape_cast %107 : vector<2x4x16x8xf32> to vector<8x16x8xf32>
    %129 = vector.shape_cast %124 : vector<2x4x16x8xf32> to vector<8x16x8xf32>
    "tpu.trace_start"() <{level = 10 : i32, message = "bqd,bkd->bqk"}> : () -> ()
    %cst_41 = arith.constant dense<0.000000e+00> : vector<8x8x8xf32>
    %130 = tpu.matmul %125, %126, %cst_41 {dimension_numbers = #tpu.dot_dimension_numbers<[2], [2], [1], [1], [0, 0, 0, 1, 1, 1], [0], [0]>} : vector<8x8x16xf32>, vector<8x8x16xf32>, vector<8x8x8xf32> -> vector<8x8x8xf32>
    %cst_42 = arith.constant dense<0.000000e+00> : vector<8x8x8xf32>
    %131 = tpu.matmul %125, %127, %cst_42 {dimension_numbers = #tpu.dot_dimension_numbers<[2], [2], [1], [1], [0, 0, 0, 1, 1, 1], [0], [0]>} : vector<8x8x16xf32>, vector<8x8x16xf32>, vector<8x8x8xf32> -> vector<8x8x8xf32>
    "tpu.trace_stop"() : () -> ()
    %c0_43 = arith.constant 0 : index
    %c0_44 = arith.constant 0 : index
    %c0_45 = arith.constant 0 : index
    %132 = vector.load %arg7[%c0_43, %c0_44, %c0_45] : memref<2x8x8xf32, #tpu.memory_space<vmem>>, vector<2x8x8xf32>
    %133 = vector.shape_cast %132 : vector<2x8x8xf32> to vector<2x1x8x8xf32>
    %cst_46 = arith.constant dense<0xFF800000> : vector<8x8xf32>
    %134 = vector.multi_reduction <maximumf>, %130, %cst_46 [2] : vector<8x8x8xf32> to vector<8x8xf32>
    %135 = vector.shape_cast %134 : vector<8x8xf32> to vector<8x8x1xf32>
    %136 = vector.broadcast %135 : vector<8x8x1xf32> to vector<8x8x8xf32>
    %137 = arith.subf %130, %136 : vector<8x8x8xf32>
    %138 = math.exp %137 : vector<8x8x8xf32>
    %cst_47 = arith.constant dense<0.000000e+00> : vector<8x8xf32>
    %139 = vector.multi_reduction <add>, %138, %cst_47 [2] : vector<8x8x8xf32> to vector<8x8xf32>
    %140 = vector.shape_cast %139 : vector<8x8xf32> to vector<8x8x1xf32>
    %141 = tpu.reciprocal %140 : vector<8x8x1xf32> -> vector<8x8x1xf32>
    %142 = vector.broadcast %141 : vector<8x8x1xf32> to vector<8x8x8xf32>
    %143 = arith.mulf %138, %142 : vector<8x8x8xf32>
    %144 = vector.shape_cast %143 : vector<8x8x8xf32> to vector<2x4x8x8xf32>
    %145 = vector.broadcast %133 : vector<2x1x8x8xf32> to vector<2x4x8x8xf32>
    %146 = arith.mulf %144, %145 : vector<2x4x8x8xf32>
    %cst_48 = arith.constant dense<0xFF800000> : vector<8x8xf32>
    %147 = vector.multi_reduction <maximumf>, %131, %cst_48 [2] : vector<8x8x8xf32> to vector<8x8xf32>
    %148 = vector.shape_cast %147 : vector<8x8xf32> to vector<8x8x1xf32>
    %149 = vector.broadcast %148 : vector<8x8x1xf32> to vector<8x8x8xf32>
    %150 = arith.subf %131, %149 : vector<8x8x8xf32>
    %151 = math.exp %150 : vector<8x8x8xf32>
    %cst_49 = arith.constant dense<0.000000e+00> : vector<8x8xf32>
    %152 = vector.multi_reduction <add>, %151, %cst_49 [2] : vector<8x8x8xf32> to vector<8x8xf32>
    %153 = vector.shape_cast %152 : vector<8x8xf32> to vector<8x8x1xf32>
    %154 = tpu.reciprocal %153 : vector<8x8x1xf32> -> vector<8x8x1xf32>
    %155 = vector.broadcast %154 : vector<8x8x1xf32> to vector<8x8x8xf32>
    %156 = arith.mulf %151, %155 : vector<8x8x8xf32>
    %157 = vector.shape_cast %156 : vector<8x8x8xf32> to vector<2x4x8x8xf32>
    %158 = vector.broadcast %133 : vector<2x1x8x8xf32> to vector<2x4x8x8xf32>
    %159 = arith.mulf %157, %158 : vector<2x4x8x8xf32>
    %c0_50 = arith.constant 0 : index
    %c0_51 = arith.constant 0 : index
    %c0_52 = arith.constant 0 : index
    %c0_53 = arith.constant 0 : index
    %160 = vector.load %arg15[%c0_50, %c0_51, %c0_52, %c0_53] : memref<2x4x8x8xf32, #tpu.memory_space<vmem>>, vector<2x4x8x8xf32>
    tpu.vector_store %arg15[%c0_50, %c0_51, %c0_52, %c0_53], %146 {strides = array<i32>} : memref<2x4x8x8xf32, #tpu.memory_space<vmem>>, vector<2x4x8x8xf32>,
    %c0_54 = arith.constant 0 : index
    %c0_55 = arith.constant 0 : index
    %c0_56 = arith.constant 0 : index
    %c0_57 = arith.constant 0 : index
    %161 = vector.load %arg16[%c0_54, %c0_55, %c0_56, %c0_57] : memref<2x4x8x8xf32, #tpu.memory_space<vmem>>, vector<2x4x8x8xf32>
    tpu.vector_store %arg16[%c0_54, %c0_55, %c0_56, %c0_57], %159 {strides = array<i32>} : memref<2x4x8x8xf32, #tpu.memory_space<vmem>>, vector<2x4x8x8xf32>,
    %162 = vector.shape_cast %146 : vector<2x4x8x8xf32> to vector<8x8x8xf32>
    %163 = vector.shape_cast %159 : vector<2x4x8x8xf32> to vector<8x8x8xf32>
    %164 = tpu.concatenate %162, %163 in 2 : vector<8x8x8xf32>, vector<8x8x8xf32> -> vector<8x8x16xf32>
    "tpu.trace_start"() <{level = 10 : i32, message = "bqk,bkd->bqd"}> : () -> ()
    %cst_58 = arith.constant dense<0.000000e+00> : vector<8x8x8xf32>
    %165 = tpu.matmul %164, %128, %cst_58 {dimension_numbers = #tpu.dot_dimension_numbers<[2], [1], [1], [2], [0, 0, 0, 1, 1, 2], [0], [0]>} : vector<8x8x16xf32>, vector<8x16x8xf32>, vector<8x8x8xf32> -> vector<8x8x8xf32>
    %cst_59 = arith.constant dense<0.000000e+00> : vector<8x8x8xf32>
    %166 = tpu.matmul %164, %129, %cst_59 {dimension_numbers = #tpu.dot_dimension_numbers<[2], [1], [1], [2], [0, 0, 0, 1, 1, 2], [0], [0]>} : vector<8x8x16xf32>, vector<8x16x8xf32>, vector<8x8x8xf32> -> vector<8x8x8xf32>
    "tpu.trace_stop"() : () -> ()
    %167 = vector.shape_cast %165 : vector<8x8x8xf32> to vector<2x4x8x8xf32>
    %168 = vector.shape_cast %166 : vector<8x8x8xf32> to vector<2x4x8x8xf32>
    %169 = vector.extract_strided_slice %167 {offsets = [0, 0, 0, 0], sizes = [2, 1, 8, 8], strides = [1, 1, 1, 1]} : vector<2x4x8x8xf32> to vector<2x1x8x8xf32>
    %170 = vector.shape_cast %169 : vector<2x1x8x8xf32> to vector<2x8x8xf32>
    %c0_60 = arith.constant 0 : index
    %c0_61 = arith.constant 0 : index
    %c0_62 = arith.constant 0 : index
    %171 = vector.load %arg17[%c0_60, %c0_61, %c0_62] : memref<2x8x32xf32, #tpu.memory_space<vmem>>, vector<2x8x8xf32>
    tpu.vector_store %arg17[%c0_60, %c0_61, %c0_62], %170 {strides = array<i32>} : memref<2x8x32xf32, #tpu.memory_space<vmem>>, vector<2x8x8xf32>,
    %172 = vector.extract_strided_slice %168 {offsets = [0, 0, 0, 0], sizes = [2, 1, 8, 8], strides = [1, 1, 1, 1]} : vector<2x4x8x8xf32> to vector<2x1x8x8xf32>
    %173 = vector.shape_cast %172 : vector<2x1x8x8xf32> to vector<2x8x8xf32>
    %c0_63 = arith.constant 0 : index
    %c0_64 = arith.constant 0 : index
    %c0_65 = arith.constant 0 : index
    %174 = vector.load %arg18[%c0_63, %c0_64, %c0_65] : memref<2x8x32xf32, #tpu.memory_space<vmem>>, vector<2x8x8xf32>
    tpu.vector_store %arg18[%c0_63, %c0_64, %c0_65], %173 {strides = array<i32>} : memref<2x8x32xf32, #tpu.memory_space<vmem>>, vector<2x8x8xf32>,
    %175 = vector.extract_strided_slice %167 {offsets = [0, 1, 0, 0], sizes = [2, 1, 8, 8], strides = [1, 1, 1, 1]} : vector<2x4x8x8xf32> to vector<2x1x8x8xf32>
    %176 = vector.shape_cast %175 : vector<2x1x8x8xf32> to vector<2x8x8xf32>
    %c0_66 = arith.constant 0 : index
    %c0_67 = arith.constant 0 : index
    %c8 = arith.constant 8 : index
    %177 = vector.load %arg17[%c0_66, %c0_67, %c8] : memref<2x8x32xf32, #tpu.memory_space<vmem>>, vector<2x8x8xf32>
    tpu.vector_store %arg17[%c0_66, %c0_67, %c8], %176 {strides = array<i32>} : memref<2x8x32xf32, #tpu.memory_space<vmem>>, vector<2x8x8xf32>,
    %178 = vector.extract_strided_slice %168 {offsets = [0, 1, 0, 0], sizes = [2, 1, 8, 8], strides = [1, 1, 1, 1]} : vector<2x4x8x8xf32> to vector<2x1x8x8xf32>
    %179 = vector.shape_cast %178 : vector<2x1x8x8xf32> to vector<2x8x8xf32>
    %c0_68 = arith.constant 0 : index
    %c0_69 = arith.constant 0 : index
    %c8_70 = arith.constant 8 : index
    %180 = vector.load %arg18[%c0_68, %c0_69, %c8_70] : memref<2x8x32xf32, #tpu.memory_space<vmem>>, vector<2x8x8xf32>
    tpu.vector_store %arg18[%c0_68, %c0_69, %c8_70], %179 {strides = array<i32>} : memref<2x8x32xf32, #tpu.memory_space<vmem>>, vector<2x8x8xf32>,
    %181 = vector.extract_strided_slice %167 {offsets = [0, 2, 0, 0], sizes = [2, 1, 8, 8], strides = [1, 1, 1, 1]} : vector<2x4x8x8xf32> to vector<2x1x8x8xf32>
    %182 = vector.shape_cast %181 : vector<2x1x8x8xf32> to vector<2x8x8xf32>
    %c0_71 = arith.constant 0 : index
    %c0_72 = arith.constant 0 : index
    %c16 = arith.constant 16 : index
    %183 = vector.load %arg17[%c0_71, %c0_72, %c16] : memref<2x8x32xf32, #tpu.memory_space<vmem>>, vector<2x8x8xf32>
    tpu.vector_store %arg17[%c0_71, %c0_72, %c16], %182 {strides = array<i32>} : memref<2x8x32xf32, #tpu.memory_space<vmem>>, vector<2x8x8xf32>,
    %184 = vector.extract_strided_slice %168 {offsets = [0, 2, 0, 0], sizes = [2, 1, 8, 8], strides = [1, 1, 1, 1]} : vector<2x4x8x8xf32> to vector<2x1x8x8xf32>
    %185 = vector.shape_cast %184 : vector<2x1x8x8xf32> to vector<2x8x8xf32>
    %c0_73 = arith.constant 0 : index
    %c0_74 = arith.constant 0 : index
    %c16_75 = arith.constant 16 : index
    %186 = vector.load %arg18[%c0_73, %c0_74, %c16_75] : memref<2x8x32xf32, #tpu.memory_space<vmem>>, vector<2x8x8xf32>
    tpu.vector_store %arg18[%c0_73, %c0_74, %c16_75], %185 {strides = array<i32>} : memref<2x8x32xf32, #tpu.memory_space<vmem>>, vector<2x8x8xf32>,
    %187 = vector.extract_strided_slice %167 {offsets = [0, 3, 0, 0], sizes = [2, 1, 8, 8], strides = [1, 1, 1, 1]} : vector<2x4x8x8xf32> to vector<2x1x8x8xf32>
    %188 = vector.shape_cast %187 : vector<2x1x8x8xf32> to vector<2x8x8xf32>
    %c0_76 = arith.constant 0 : index
    %c0_77 = arith.constant 0 : index
    %c24 = arith.constant 24 : index
    %189 = vector.load %arg17[%c0_76, %c0_77, %c24] : memref<2x8x32xf32, #tpu.memory_space<vmem>>, vector<2x8x8xf32>
    tpu.vector_store %arg17[%c0_76, %c0_77, %c24], %188 {strides = array<i32>} : memref<2x8x32xf32, #tpu.memory_space<vmem>>, vector<2x8x8xf32>,
    %190 = vector.extract_strided_slice %168 {offsets = [0, 3, 0, 0], sizes = [2, 1, 8, 8], strides = [1, 1, 1, 1]} : vector<2x4x8x8xf32> to vector<2x1x8x8xf32>
    %191 = vector.shape_cast %190 : vector<2x1x8x8xf32> to vector<2x8x8xf32>
    %c0_78 = arith.constant 0 : index
    %c0_79 = arith.constant 0 : index
    %c24_80 = arith.constant 24 : index
    %192 = vector.load %arg18[%c0_78, %c0_79, %c24_80] : memref<2x8x32xf32, #tpu.memory_space<vmem>>, vector<2x8x8xf32>
    tpu.vector_store %arg18[%c0_78, %c0_79, %c24_80], %191 {strides = array<i32>} : memref<2x8x32xf32, #tpu.memory_space<vmem>>, vector<2x8x8xf32>,
    %c0_81 = arith.constant 0 : index
    %c0_82 = arith.constant 0 : index
    %c0_83 = arith.constant 0 : index
    %193 = vector.load %arg17[%c0_81, %c0_82, %c0_83] : memref<2x8x32xf32, #tpu.memory_space<vmem>>, vector<2x8x32xf32>
    %194 = vector.shape_cast %193 : vector<2x8x32xf32> to vector<16x32xf32>
    %c0_84 = arith.constant 0 : index
    %c0_85 = arith.constant 0 : index
    %c0_86 = arith.constant 0 : index
    %195 = vector.load %arg18[%c0_84, %c0_85, %c0_86] : memref<2x8x32xf32, #tpu.memory_space<vmem>>, vector<2x8x32xf32>
    %196 = vector.shape_cast %195 : vector<2x8x32xf32> to vector<16x32xf32>
    %c0_87 = arith.constant 0 : index
    %c0_88 = arith.constant 0 : index
    %197 = vector.load %arg12[%c0_87, %c0_88] : memref<4x32xf32, #tpu.memory_space<vmem>>, vector<4x32xf32>
    %c0_89 = arith.constant 0 : index
    %c0_90 = arith.constant 0 : index
    %c0_91 = arith.constant 0 : index
    %198 = vector.load %arg11[%c0_89, %c0_90, %c0_91] : memref<2x32x32xf32, #tpu.memory_space<vmem>>, vector<1x32x32xf32>
    %199 = vector.shape_cast %198 : vector<1x32x32xf32> to vector<32x32xf32>
    %cst_92 = arith.constant dense<0.000000e+00> : vector<16x32xf32>
    %200 = tpu.matmul %194, %199, %cst_92 {dimension_numbers = #tpu.dot_dimension_numbers<[1], [1], [0], [0], [0, 0, 1, 0], [], []>} : vector<16x32xf32>, vector<32x32xf32>, vector<16x32xf32> -> vector<16x32xf32>
    %201 = arith.addf %200, %2 : vector<16x32xf32>
    %c1_93 = arith.constant 1 : index
    %c0_94 = arith.constant 0 : index
    %c0_95 = arith.constant 0 : index
    %202 = vector.load %arg11[%c1_93, %c0_94, %c0_95] : memref<2x32x32xf32, #tpu.memory_space<vmem>>, vector<1x32x32xf32>
    %203 = vector.shape_cast %202 : vector<1x32x32xf32> to vector<32x32xf32>
    %cst_96 = arith.constant dense<0.000000e+00> : vector<16x32xf32>
    %204 = tpu.matmul %196, %203, %cst_96 {dimension_numbers = #tpu.dot_dimension_numbers<[1], [1], [0], [0], [0, 0, 1, 0], [], []>} : vector<16x32xf32>, vector<32x32xf32>, vector<16x32xf32> -> vector<16x32xf32>
    %205 = arith.addf %204, %3 : vector<16x32xf32>
    %206 = vector.extract_strided_slice %197 {offsets = [0, 0], sizes = [1, 32], strides = [1, 1]} : vector<4x32xf32> to vector<1x32xf32>
    %207 = vector.extract_strided_slice %197 {offsets = [1, 0], sizes = [1, 32], strides = [1, 1]} : vector<4x32xf32> to vector<1x32xf32>
    %cst_97 = arith.constant dense<0.000000e+00> : vector<16xf32>
    %208 = vector.multi_reduction <add>, %201, %cst_97 [1] : vector<16x32xf32> to vector<16xf32>
    %209 = vector.shape_cast %208 : vector<16xf32> to vector<16x1xf32>
    %cst_98 = arith.constant 3.200000e+01 : f32
    %210 = vector.broadcast %cst_98 : f32 to vector<16x1xf32>
    %211 = arith.divf %209, %210 : vector<16x1xf32>
    %212 = vector.broadcast %211 : vector<16x1xf32> to vector<16x32xf32>
    %213 = arith.subf %201, %212 : vector<16x32xf32>
    %214 = arith.mulf %213, %213 : vector<16x32xf32>
    %cst_99 = arith.constant dense<0.000000e+00> : vector<16xf32>
    %215 = vector.multi_reduction <add>, %214, %cst_99 [1] : vector<16x32xf32> to vector<16xf32>
    %216 = vector.shape_cast %215 : vector<16xf32> to vector<16x1xf32>
    %cst_100 = arith.constant 3.200000e+01 : f32
    %217 = vector.broadcast %cst_100 : f32 to vector<16x1xf32>
    %218 = arith.divf %216, %217 : vector<16x1xf32>
    %219 = vector.broadcast %211 : vector<16x1xf32> to vector<16x32xf32>
    %220 = arith.subf %201, %219 : vector<16x32xf32>
    %cst_101 = arith.constant 9.99999997E-7 : f32
    %221 = vector.broadcast %cst_101 : f32 to vector<16x1xf32>
    %222 = arith.addf %218, %221 : vector<16x1xf32>
    %223 = math.rsqrt %222 : vector<16x1xf32>
    %224 = vector.broadcast %223 : vector<16x1xf32> to vector<16x32xf32>
    %225 = arith.mulf %220, %224 : vector<16x32xf32>
    %226 = vector.broadcast %206 : vector<1x32xf32> to vector<16x32xf32>
    %227 = arith.mulf %225, %226 : vector<16x32xf32>
    %228 = vector.broadcast %207 : vector<1x32xf32> to vector<16x32xf32>
    %229 = arith.addf %227, %228 : vector<16x32xf32>
    %230 = vector.shape_cast %229 : vector<16x32xf32> to vector<2x8x32xf32>
    %c0_102 = arith.constant 0 : index
    %c0_103 = arith.constant 0 : index
    %c0_104 = arith.constant 0 : index
    %231 = vector.load %arg13[%c0_102, %c0_103, %c0_104] : memref<2x8x32xf32, #tpu.memory_space<vmem>>, vector<2x8x32xf32>
    tpu.vector_store %arg13[%c0_102, %c0_103, %c0_104], %230 {strides = array<i32>} : memref<2x8x32xf32, #tpu.memory_space<vmem>>, vector<2x8x32xf32>,
    %232 = vector.extract_strided_slice %197 {offsets = [2, 0], sizes = [1, 32], strides = [1, 1]} : vector<4x32xf32> to vector<1x32xf32>
    %233 = vector.extract_strided_slice %197 {offsets = [3, 0], sizes = [1, 32], strides = [1, 1]} : vector<4x32xf32> to vector<1x32xf32>
    %cst_105 = arith.constant dense<0.000000e+00> : vector<16xf32>
    %234 = vector.multi_reduction <add>, %205, %cst_105 [1] : vector<16x32xf32> to vector<16xf32>
    %235 = vector.shape_cast %234 : vector<16xf32> to vector<16x1xf32>
    %cst_106 = arith.constant 3.200000e+01 : f32
    %236 = vector.broadcast %cst_106 : f32 to vector<16x1xf32>
    %237 = arith.divf %235, %236 : vector<16x1xf32>
    %238 = vector.broadcast %237 : vector<16x1xf32> to vector<16x32xf32>
    %239 = arith.subf %205, %238 : vector<16x32xf32>
    %240 = arith.mulf %239, %239 : vector<16x32xf32>
    %cst_107 = arith.constant dense<0.000000e+00> : vector<16xf32>
    %241 = vector.multi_reduction <add>, %240, %cst_107 [1] : vector<16x32xf32> to vector<16xf32>
    %242 = vector.shape_cast %241 : vector<16xf32> to vector<16x1xf32>
    %cst_108 = arith.constant 3.200000e+01 : f32
    %243 = vector.broadcast %cst_108 : f32 to vector<16x1xf32>
    %244 = arith.divf %242, %243 : vector<16x1xf32>
    %245 = vector.broadcast %237 : vector<16x1xf32> to vector<16x32xf32>
    %246 = arith.subf %205, %245 : vector<16x32xf32>
    %cst_109 = arith.constant 9.99999997E-7 : f32
    %247 = vector.broadcast %cst_109 : f32 to vector<16x1xf32>
    %248 = arith.addf %244, %247 : vector<16x1xf32>
    %249 = math.rsqrt %248 : vector<16x1xf32>
    %250 = vector.broadcast %249 : vector<16x1xf32> to vector<16x32xf32>
    %251 = arith.mulf %246, %250 : vector<16x32xf32>
    %252 = vector.broadcast %232 : vector<1x32xf32> to vector<16x32xf32>
    %253 = arith.mulf %251, %252 : vector<16x32xf32>
    %254 = vector.broadcast %233 : vector<1x32xf32> to vector<16x32xf32>
    %255 = arith.addf %253, %254 : vector<16x32xf32>
    %256 = vector.shape_cast %255 : vector<16x32xf32> to vector<2x8x32xf32>
    %c0_110 = arith.constant 0 : index
    %c0_111 = arith.constant 0 : index
    %c0_112 = arith.constant 0 : index
    %257 = vector.load %arg14[%c0_110, %c0_111, %c0_112] : memref<2x8x32xf32, #tpu.memory_space<vmem>>, vector<2x8x32xf32>
    tpu.vector_store %arg14[%c0_110, %c0_111, %c0_112], %256 {strides = array<i32>} : memref<2x8x32xf32, #tpu.memory_space<vmem>>, vector<2x8x32xf32>,
    return
  }
  func.func @transform_0(%arg0: i32) -> (i32, i32, i32) {
    %c0_i32 = arith.constant 0 : i32
    %c0_i32_0 = arith.constant 0 : i32
    %c0_i32_1 = arith.constant 0 : i32
    return %arg0, %c0_i32, %c0_i32_0 : i32, i32, i32
  }
  func.func @transform_1(%arg0: i32) -> (i32, i32, i32) {
    %c0_i32 = arith.constant 0 : i32
    %c0_i32_0 = arith.constant 0 : i32
    %c0_i32_1 = arith.constant 0 : i32
    return %arg0, %c0_i32, %c0_i32_0 : i32, i32, i32
  }
  func.func @transform_2(%arg0: i32) -> (i32, i32, i32) {
    %c0_i32 = arith.constant 0 : i32
    %c0_i32_0 = arith.constant 0 : i32
    %c0_i32_1 = arith.constant 0 : i32
    return %arg0, %c0_i32, %c0_i32_0 : i32, i32, i32
  }
  func.func @transform_3(%arg0: i32) -> (i32, i32, i32) {
    %c0_i32 = arith.constant 0 : i32
    %c0_i32_0 = arith.constant 0 : i32
    %c0_i32_1 = arith.constant 0 : i32
    return %arg0, %c0_i32, %c0_i32_0 : i32, i32, i32
  }
  func.func @transform_4(%arg0: i32) -> (i32, i32, i32) {
    %c0_i32 = arith.constant 0 : i32
    %c0_i32_0 = arith.constant 0 : i32
    %c0_i32_1 = arith.constant 0 : i32
    return %arg0, %c0_i32, %c0_i32_0 : i32, i32, i32
  }
  func.func @transform_5(%arg0: i32) -> (i32, i32, i32) {
    %c0_i32 = arith.constant 0 : i32
    %c0_i32_0 = arith.constant 0 : i32
    %c0_i32_1 = arith.constant 0 : i32
    return %arg0, %c0_i32, %c0_i32_0 : i32, i32, i32
  }
  func.func @transform_6(%arg0: i32) -> (i32, i32, i32) {
    %c0_i32 = arith.constant 0 : i32
    %c0_i32_0 = arith.constant 0 : i32
    %c0_i32_1 = arith.constant 0 : i32
    return %arg0, %c0_i32, %c0_i32_0 : i32, i32, i32
  }
  func.func @transform_7(%arg0: i32) -> (i32, i32, i32) {
    %c0_i32 = arith.constant 0 : i32
    %c0_i32_0 = arith.constant 0 : i32
    %c0_i32_1 = arith.constant 0 : i32
    %c0_i32_2 = arith.constant 0 : i32
    return %c0_i32, %c0_i32_0, %c0_i32_1 : i32, i32, i32
  }
  func.func @transform_8(%arg0: i32) -> (i32, i32, i32) {
    %c0_i32 = arith.constant 0 : i32
    %c0_i32_0 = arith.constant 0 : i32
    %c0_i32_1 = arith.constant 0 : i32
    %c0_i32_2 = arith.constant 0 : i32
    return %c0_i32, %c0_i32_0, %c0_i32_1 : i32, i32, i32
  }
  func.func @transform_9(%arg0: i32) -> (i32, i32, i32) {
    %c0_i32 = arith.constant 0 : i32
    %c0_i32_0 = arith.constant 0 : i32
    %c0_i32_1 = arith.constant 0 : i32
    %c0_i32_2 = arith.constant 0 : i32
    return %c0_i32, %c0_i32_0, %c0_i32_1 : i32, i32, i32
  }
  func.func @transform_10(%arg0: i32) -> (i32, i32, i32) {
    %c0_i32 = arith.constant 0 : i32
    %c0_i32_0 = arith.constant 0 : i32
    %c0_i32_1 = arith.constant 0 : i32
    %c0_i32_2 = arith.constant 0 : i32
    return %c0_i32, %c0_i32_0, %c0_i32_1 : i32, i32, i32
  }
  func.func @transform_11(%arg0: i32) -> (i32, i32) {
    %c0_i32 = arith.constant 0 : i32
    %c0_i32_0 = arith.constant 0 : i32
    %c0_i32_1 = arith.constant 0 : i32
    return %c0_i32, %c0_i32_0 : i32, i32
  }
  func.func @transform_12(%arg0: i32) -> (i32, i32, i32) {
    %c0_i32 = arith.constant 0 : i32
    %c0_i32_0 = arith.constant 0 : i32
    %c0_i32_1 = arith.constant 0 : i32
    return %arg0, %c0_i32, %c0_i32_0 : i32, i32, i32
  }
  func.func @transform_13(%arg0: i32) -> (i32, i32, i32) {
    %c0_i32 = arith.constant 0 : i32
    %c0_i32_0 = arith.constant 0 : i32
    %c0_i32_1 = arith.constant 0 : i32
    return %arg0, %c0_i32, %c0_i32_0 : i32, i32, i32
  }
  func.func @transform_14(%arg0: i32) -> (i32, i32, i32, i32) {
    %c0_i32 = arith.constant 0 : i32
    %c0_i32_0 = arith.constant 0 : i32
    %c0_i32_1 = arith.constant 0 : i32
    %c0_i32_2 = arith.constant 0 : i32
    return %arg0, %c0_i32, %c0_i32_0, %c0_i32_1 : i32, i32, i32, i32
  }
  func.func @transform_15(%arg0: i32) -> (i32, i32, i32, i32) {
    %c0_i32 = arith.constant 0 : i32
    %c0_i32_0 = arith.constant 0 : i32
    %c0_i32_1 = arith.constant 0 : i32
    %c0_i32_2 = arith.constant 0 : i32
    return %arg0, %c0_i32, %c0_i32_0, %c0_i32_1 : i32, i32, i32, i32
  }
}

</mosaic_0001>

<bundles_post_ra>
// kernel: tpu_custom_call.1
= control target key start
LH: loop header
LB: loop body
LE: loop exit
PB: predicated region body
PF: predicated region fallthrough
CT: control target
= control target key end

     0   :  { %21 = vsyncpa [#allocation5], 0  ;;  %s6162_s0 = inlined_call_operand.hbm [shape: f32[2,8,32], index: 0, kind: input, shape index: {}]   ;;  %s6163_s1 = inlined_call_operand.hbm [shape: f32[2,8,32], index: 1, kind: input, shape index: {}]   ;;  %s6164_s2 = inlined_call_operand.hbm [shape: f32[2,8,32], index: 2, kind: input, shape index: {}]   ;;  %s6165_s3 = inlined_call_operand.hbm [shape: f32[2,8,32], index: 3, kind: input, shape index: {}]   ;;  %s6166_s4 = inlined_call_operand.hbm [shape: f32[2,8,32], index: 4, kind: input, shape index: {}]   ;;  %s6167_s5 = inlined_call_operand.vmem [shape: f32[2,8,32], index: 5, kind: input, shape index: {}]   ;;  %s6168_s6 = inlined_call_operand.hbm [shape: f32[2,8,8], index: 6, kind: input, shape index: {}]   ;;  %s6169_s7 = inlined_call_operand.hbm [shape: f32[2,32,32], index: 7, kind: input, shape index: {}]   ;;  %s6170_s8 = inlined_call_operand.hbm [shape: f32[2,32,32], index: 8, kind: input, shape index: {}]   ;;  %s6171_s9 = inlined_call_operand.hbm [shape: f32[2,32,32], index: 9, kind: input, shape index: {}]   ;;  %s6172_s10 = inlined_call_operand.hbm [shape: f32[2,32,32], index: 10, kind: input, shape index: {}]   ;;  %s6173_s11 = inlined_call_operand.vmem [shape: f32[4,32], index: 11, kind: input, shape index: {}]   ;;  %s6174_s12 = inlined_call_operand.hbm [shape: f32[2,8,32], index: 12, kind: output, shape index: {0}]   ;;  %s6175_s13 = inlined_call_operand.hbm [shape: f32[2,8,32], index: 13, kind: output, shape index: {1}]   ;;  %s6176_s14 = inlined_call_operand.hbm [shape: f32[2,4,8,8], index: 14, kind: output, shape index: {2}]   ;;  %s6177_s15 = inlined_call_operand.hbm [shape: f32[2,4,8,8], index: 15, kind: output, shape index: {3}]  }
   0x1   :  { %22 = vsyncpa [#allocation8], 0 }
   0x2   :  { %23 = vsyncpa [#allocation11], 0 }
   0x3   :  { %24 = vsyncpa [#allocation14], 0 }
   0x4   :  { %25 = vsyncpa [#allocation17], 0 }
   0x5   :  { %26 = vsyncpa [#allocation20], 0 }
   0x6   :  { %27 = vsyncpa [#allocation6], 0 }
   0x7   :  { %28 = vsyncpa [#allocation23], 0 }
   0x8   :  { %29 = vsyncpa [#allocation26], 0  ;;  %s5083_s18 = smov [#allocation7]   ;;  %s5084_s20 = smov [#allocation10]  }
   0x9   :  { %s47_s19 = sshll.u32 %s5083_s18, 4  ;;  %s71_s21 = sshll.u32 %s5084_s20, 4  ;;  %s48_s19 = int_to_ptr.vmem [resolvable:$true] %s47_s19  ;;  %s5187_s21 = int_to_ptr.vmem [resolvable:$true] %s71_s21 }
   0xa   :  { %s4757_s24 = scalar_lea.hbm %s6163_s1, 256 }
   0xb   :  { %p4758_p0 = scmp.ne.s32.totalorder %s6163_s1, %s4757_s24  ;;  %p4761_p1 = scmp.lt.u32.totalorder %s4757_s24, %s6163_s1 }
   0xd   :  { %p4763_p2 = pnand %p4761_p1, %p4758_p0 }
   0xf   :  { %4766 = shalt.err (!%p4763_p2)
}
  0x10   :  { %s4767_s29 = scalar_lea.vmem %s48_s19, 256  ;;  %p4772_p4 = scmp.lt.s32.totalorder %s48_s19, %s48_s19 }
  0x11   :  { %p4768_p3 = scmp.ne.s32.totalorder %s48_s19, %s4767_s29  ;;  %p4773_p5 = scmp.lt.s32.totalorder %s4767_s29, %s4767_s29 }
  0x13   :  { %p4774_p6 = por %p4773_p5, %p4772_p4 }
  0x15   :  { %p4775_p7 = pnand %p4774_p6, %p4768_p3 }
  0x17   :  { %4778 = shalt.err (!%p4775_p7)
}
  0x18   :  { %s5085_s30 = smov 128   ;;  %s5086_s16 = smov 8  }
  0x19   :  { %53 = dma.hbm_to_vmem [thread:$0]  %s6163_s1, 256, %s48_s19, [#allocation8], %s5085_s30, %s5085_s30, %s5086_s16  }
  0x1a   :  { %s4779_s23 = scalar_lea.hbm %s6165_s3, 256 }
  0x1b   :  { %p4780_p8 = scmp.ne.s32.totalorder %s6165_s3, %s4779_s23  ;;  %p4783_p9 = scmp.lt.u32.totalorder %s4779_s23, %s6165_s3 }
  0x1d   :  { %p4785_p10 = pnand %p4783_p9, %p4780_p8 }
  0x1f   :  { %4788 = shalt.err (!%p4785_p10)
}
  0x20   :  { %s4789_s28 = scalar_lea.vmem %s5187_s21, 256  ;;  %p4794_p12 = scmp.lt.s32.totalorder %s5187_s21, %s5187_s21 }
  0x21   :  { %p4790_p11 = scmp.ne.s32.totalorder %s5187_s21, %s4789_s28  ;;  %p4795_p13 = scmp.lt.s32.totalorder %s4789_s28, %s4789_s28 }
  0x23   :  { %p4796_p0 = por %p4795_p13, %p4794_p12 }
  0x25   :  { %p4797_p1 = pnand %p4796_p0, %p4790_p11 }
  0x27   :  { %4800 = shalt.err (!%p4797_p1)
}
  0x28   :  { %77 = dma.hbm_to_vmem [thread:$0]  %s6165_s3, 256, %s5187_s21, [#allocation11], %s5085_s30, %s5085_s30, %s5086_s16  }
  0x29   :  { %s5087_s29 = smov [#allocation13]   ;;  %s5088_s18 = smov [#allocation16]  }
  0x2a   :  { %s97_s17 = sshll.u32 %s5087_s29, 4  ;;  %s121_s20 = sshll.u32 %s5088_s18, 4  ;;  %s98_s17 = int_to_ptr.vmem [resolvable:$true] %s97_s17  ;;  %s5224_s20 = int_to_ptr.vmem [resolvable:$true] %s121_s20 }
  0x2b   :  { %s4801_s24 = scalar_lea.hbm %s6168_s6, 256 }
  0x2c   :  { %p4802_p2 = scmp.ne.s32.totalorder %s6168_s6, %s4801_s24  ;;  %p4805_p3 = scmp.lt.u32.totalorder %s4801_s24, %s6168_s6 }
  0x2e   :  { %p4807_p4 = pnand %p4805_p3, %p4802_p2 }
  0x30   :  { %4810 = shalt.err (!%p4807_p4)
}
  0x31   :  { %s4811_s3 = scalar_lea.vmem %s98_s17, 256  ;;  %p4816_p6 = scmp.lt.s32.totalorder %s98_s17, %s98_s17 }
  0x32   :  { %p4812_p5 = scmp.ne.s32.totalorder %s98_s17, %s4811_s3  ;;  %p4817_p7 = scmp.lt.s32.totalorder %s4811_s3, %s4811_s3 }
  0x34   :  { %p4818_p8 = por %p4817_p7, %p4816_p6 }
  0x36   :  { %p4819_p9 = pnand %p4818_p8, %p4812_p5 }
  0x38   :  { %4822 = shalt.err (!%p4819_p9)
}
  0x39   :  { %103 = dma.hbm_to_vmem [thread:$0]  %s6168_s6, 256, %s98_s17, [#allocation14], %s5085_s30, %s5085_s30, %s5086_s16  }
  0x3a   :  { %s4823_s18 = scalar_lea.hbm %s6170_s8, 1024 }
  0x3b   :  { %p4824_p10 = scmp.ne.s32.totalorder %s6170_s8, %s4823_s18  ;;  %p4827_p11 = scmp.lt.u32.totalorder %s4823_s18, %s6170_s8 }
  0x3d   :  { %p4829_p12 = pnand %p4827_p11, %p4824_p10 }
  0x3f   :  { %4832 = shalt.err (!%p4829_p12)
}
  0x40   :  { %s4833_s26 = scalar_lea.vmem %s5224_s20, 1024  ;;  %p4838_p0 = scmp.lt.s32.totalorder %s5224_s20, %s5224_s20 }
  0x41   :  { %p4834_p13 = scmp.ne.s32.totalorder %s5224_s20, %s4833_s26  ;;  %p4839_p1 = scmp.lt.s32.totalorder %s4833_s26, %s4833_s26 }
  0x43   :  { %p4840_p2 = por %p4839_p1, %p4838_p0 }
  0x45   :  { %p4841_p3 = pnand %p4840_p2, %p4834_p13 }
  0x47   :  { %4844 = shalt.err (!%p4841_p3)
}
  0x48   :  { %127 = dma.hbm_to_vmem [thread:$0]  %s6170_s8, 1024, %s5224_s20, [#allocation17], %s5085_s30, %s5085_s30, %s5086_s16  }
  0x49   :  { %s5089_s27 = smov [#allocation4]   ;;  %s5090_s3 = smov [#allocation9]  }
  0x4a   :  { %s35_s28 = sshll.u32 %s5089_s27, 4  ;;  %s59_s21 = sshll.u32 %s5090_s3, 4  ;;  %s36_s28 = int_to_ptr.vmem [resolvable:$true] %s35_s28  ;;  %s5261_s21 = int_to_ptr.vmem [resolvable:$true] %s59_s21 }
  0x4b   :  { %s4845_s29 = scalar_lea.hbm %s6162_s0, 256 }
  0x4c   :  { %p4846_p4 = scmp.ne.s32.totalorder %s6162_s0, %s4845_s29  ;;  %p4849_p5 = scmp.lt.u32.totalorder %s4845_s29, %s6162_s0 }
  0x4e   :  { %p4851_p6 = pnand %p4849_p5, %p4846_p4 }
  0x50   :  { %4854 = shalt.err (!%p4851_p6)
}
  0x51   :  { %s4855_s8 = scalar_lea.vmem %s36_s28, 256  ;;  %p4860_p8 = scmp.lt.s32.totalorder %s36_s28, %s36_s28 }
  0x52   :  { %p4856_p7 = scmp.ne.s32.totalorder %s36_s28, %s4855_s8  ;;  %p4861_p9 = scmp.lt.s32.totalorder %s4855_s8, %s4855_s8 }
  0x54   :  { %p4862_p10 = por %p4861_p9, %p4860_p8 }
  0x56   :  { %p4863_p11 = pnand %p4862_p10, %p4856_p7 }
  0x58   :  { %4866 = shalt.err (!%p4863_p11)
}
  0x59   :  { %41 = dma.hbm_to_vmem [thread:$0]  %s6162_s0, 256, %s36_s28, [#allocation5], %s5085_s30, %s5085_s30, %s5086_s16  }
  0x5a   :  { %s4867_s17 = scalar_lea.hbm %s6164_s2, 256 }
  0x5b   :  { %p4868_p12 = scmp.ne.s32.totalorder %s6164_s2, %s4867_s17  ;;  %p4871_p13 = scmp.lt.u32.totalorder %s4867_s17, %s6164_s2 }
  0x5d   :  { %p4873_p0 = pnand %p4871_p13, %p4868_p12 }
  0x5f   :  { %4876 = shalt.err (!%p4873_p0)
}
  0x60   :  { %s4877_s29 = scalar_lea.vmem %s5261_s21, 256  ;;  %p4882_p2 = scmp.lt.s32.totalorder %s5261_s21, %s5261_s21 }
  0x61   :  { %p4878_p1 = scmp.ne.s32.totalorder %s5261_s21, %s4877_s29  ;;  %p4883_p3 = scmp.lt.s32.totalorder %s4877_s29, %s4877_s29 }
  0x63   :  { %p4884_p4 = por %p4883_p3, %p4882_p2 }
  0x65   :  { %p4885_p5 = pnand %p4884_p4, %p4878_p1 }
  0x67   :  { %4888 = shalt.err (!%p4885_p5)
}
  0x68   :  { %65 = dma.hbm_to_vmem [thread:$0]  %s6164_s2, 256, %s5261_s21, [#allocation8], %s5085_s30, %s5085_s30, %s5086_s16  }
  0x69   :  { %s5091_s18 = smov [#allocation12]   ;;  %s5092_s23 = smov [#allocation15]  }
  0x6a   :  { %s83_s22 = sshll.u32 %s5091_s18, 4  ;;  %s109_s24 = sshll.u32 %s5092_s23, 4  ;;  %s84_s22 = int_to_ptr.vmem [resolvable:$true] %s83_s22  ;;  %s5298_s24 = int_to_ptr.vmem [resolvable:$true] %s109_s24 }
  0x6b   :  { %s4889_s25 = scalar_lea.hbm %s6166_s4, 256 }
  0x6c   :  { %p4890_p6 = scmp.ne.s32.totalorder %s6166_s4, %s4889_s25  ;;  %p4893_p7 = scmp.lt.u32.totalorder %s4889_s25, %s6166_s4 }
  0x6e   :  { %p4895_p8 = pnand %p4893_p7, %p4890_p6 }
  0x70   :  { %4898 = shalt.err (!%p4895_p8)
}
  0x71   :  { %s4899_s2 = scalar_lea.vmem %s84_s22, 256  ;;  %p4904_p10 = scmp.lt.s32.totalorder %s84_s22, %s84_s22 }
  0x72   :  { %p4900_p9 = scmp.ne.s32.totalorder %s84_s22, %s4899_s2  ;;  %p4905_p11 = scmp.lt.s32.totalorder %s4899_s2, %s4899_s2 }
  0x74   :  { %p4906_p12 = por %p4905_p11, %p4904_p10 }
  0x76   :  { %p4907_p13 = pnand %p4906_p12, %p4900_p9 }
  0x78   :  { %4910 = shalt.err (!%p4907_p13)
}
  0x79   :  { %89 = dma.hbm_to_vmem [thread:$0]  %s6166_s4, 256, %s84_s22, [#allocation11], %s5085_s30, %s5085_s30, %s5086_s16  }
  0x7a   :  { %s4911_s29 = scalar_lea.hbm %s6169_s7, 1024 }
  0x7b   :  { %p4912_p0 = scmp.ne.s32.totalorder %s6169_s7, %s4911_s29  ;;  %p4915_p1 = scmp.lt.u32.totalorder %s4911_s29, %s6169_s7 }
  0x7d   :  { %p4917_p2 = pnand %p4915_p1, %p4912_p0 }
  0x7f   :  { %4920 = shalt.err (!%p4917_p2)
}
  0x80   :  { %s4921_s8 = scalar_lea.vmem %s5298_s24, 1024  ;;  %p4926_p4 = scmp.lt.s32.totalorder %s5298_s24, %s5298_s24 }
  0x81   :  { %p4922_p3 = scmp.ne.s32.totalorder %s5298_s24, %s4921_s8  ;;  %p4927_p5 = scmp.lt.s32.totalorder %s4921_s8, %s4921_s8 }
  0x83   :  { %p4928_p6 = por %p4927_p5, %p4926_p4 }
  0x85   :  { %p4929_p7 = pnand %p4928_p6, %p4922_p3 }
  0x87   :  { %4932 = shalt.err (!%p4929_p7)
}
  0x88   :  { %115 = dma.hbm_to_vmem [thread:$0]  %s6169_s7, 1024, %s5298_s24, [#allocation14], %s5085_s30, %s5085_s30, %s5086_s16  }
  0x89   :  { %s5093_s20 = smov [#allocation18]   ;;  %s5094_s26 = smov [#allocation19]  }
  0x8a   :  { %s133_s25 = sshll.u32 %s5093_s20, 4  ;;  %s145_s6 = sshll.u32 %s5094_s26, 4  ;;  %s134_s25 = int_to_ptr.vmem [resolvable:$true] %s133_s25  ;;  %s5335_s6 = int_to_ptr.vmem [resolvable:$true] %s145_s6 }
  0x8b   :  { %s4933_s2 = scalar_lea.hbm %s6171_s9, 1024 }
  0x8c   :  { %p4934_p8 = scmp.ne.s32.totalorder %s6171_s9, %s4933_s2  ;;  %p4937_p9 = scmp.lt.u32.totalorder %s4933_s2, %s6171_s9 }
  0x8e   :  { %p4939_p10 = pnand %p4937_p9, %p4934_p8 }
  0x90   :  { %4942 = shalt.err (!%p4939_p10)
}
  0x91   :  { %s4943_s7 = scalar_lea.vmem %s134_s25, 1024  ;;  %p4948_p12 = scmp.lt.s32.totalorder %s134_s25, %s134_s25 }
  0x92   :  { %p4944_p11 = scmp.ne.s32.totalorder %s134_s25, %s4943_s7  ;;  %p4949_p13 = scmp.lt.s32.totalorder %s4943_s7, %s4943_s7 }
  0x94   :  { %p4950_p0 = por %p4949_p13, %p4948_p12 }
  0x96   :  { %p4951_p1 = pnand %p4950_p0, %p4944_p11 }
  0x98   :  { %4954 = shalt.err (!%p4951_p1)
}
  0x99   :  { %139 = dma.hbm_to_vmem [thread:$0]  %s6171_s9, 1024, %s134_s25, [#allocation17], %s5085_s30, %s5085_s30, %s5086_s16  }
  0x9a   :  { %s4955_s18 = scalar_lea.hbm %s6172_s10, 1024 }
  0x9b   :  { %p4956_p2 = scmp.ne.s32.totalorder %s6172_s10, %s4955_s18  ;;  %p4959_p3 = scmp.lt.u32.totalorder %s4955_s18, %s6172_s10 }
  0x9d   :  { %p4961_p4 = pnand %p4959_p3, %p4956_p2 }
  0x9f   :  { %4964 = shalt.err (!%p4961_p4)
}
  0xa0   :  { %s4965_s20 = scalar_lea.vmem %s5335_s6, 1024  ;;  %p4970_p6 = scmp.lt.s32.totalorder %s5335_s6, %s5335_s6 }
  0xa1   :  { %p4966_p5 = scmp.ne.s32.totalorder %s5335_s6, %s4965_s20  ;;  %p4971_p7 = scmp.lt.s32.totalorder %s4965_s20, %s4965_s20 }
  0xa3   :  { %p4972_p8 = por %p4971_p7, %p4970_p6 }
  0xa5   :  { %p4973_p9 = pnand %p4972_p8, %p4966_p5 }
  0xa7   :  { %4976 = shalt.err (!%p4973_p9)
}
  0xa8   :  { %151 = dma.hbm_to_vmem [thread:$0]  %s6172_s10, 1024, %s5335_s6, [#allocation20], %s5085_s30, %s5085_s30, %s5086_s16  }
  0xa9   :  { %5065 = dma.done.wait [#allocation5], 256  }
  0xaa   :  { %5066 = vsyncadd [#allocation5], 4294967040 }
  0xab   :  { %5067 = dma.done.wait [#allocation8], 512  }
  0xac   :  { %5068 = vsyncadd [#allocation8], 4294966784 }
  0xad   :  { %5069 = dma.done.wait [#allocation11], 512  }
  0xae   :  { %5070 = vsyncadd [#allocation11], 4294966784 }
  0xaf   :  { %5071 = dma.done.wait [#allocation14], 1280  }
  0xb0   :  { %5072 = vsyncadd [#allocation14], 4294966016 }
  0xb1   :  { %5073 = dma.done.wait [#allocation17], 2048  }
  0xb2   :  { %5074 = vsyncadd [#allocation17], 4294965248 }
  0xb3   :  { %5075 = dma.done.wait [#allocation20], 1024  }
  0xb4   :  { %5076 = vsyncadd [#allocation20], 4294966272  ;;  %vm200_vm0 = vcmask 261120   ;;  %v196_v1 = vld [vmem:[#allocation15] sm:$0xff]  ;;  %v197_v2 = vld [vmem:[#allocation15 + $0x8] sm:$0xff]  ;;  %s5095_s10 = smov 120  }
  0xb5   :  { %vm5374_vm1 = vmpackc.low %vm200_vm0, %vm200_vm0  ;;  %v295_v3 = vld [vmem:[#allocation15 + $0x20] sm:$0xff]  ;;  %v4485_v4 = vpack.c.bf16 %v197_v2, %v196_v1  ;;  %v296_v5 = vld [vmem:[#allocation15 + $0x28] sm:$0xff]  ;;  %s5096_s17 = smov 112   ;;  %s5097_s21 = smov 104   ;;  %v5098_v46 = vmov 0.0   ;;  %vm5099_vm2 = vmmov 0  }
  0xb6   :  { %v198_v6 = vld [vmem:[#allocation15 + $0x10] sm:$0xff]  ;;  %v199_v7 = vld [vmem:[#allocation15 + $0x18] sm:$0xff]  ;;  %v4497_v8 = vpack.c.bf16 %v296_v5, %v295_v3  ;;  %v392_v13 = vld [vmem:[#allocation16] sm:$0xff]  ;;  %vm977_vm3 = vcmask 130048   ;;  %vm794_vm4 = vcmask 64512   ;;  %s5102_s3 = smov 16  }
  0xb7   :  { %v4491_v9 = vpack.c.bf16 %v199_v7, %v198_v6  ;;  %v297_v10 = vld [vmem:[#allocation15 + $0x30] sm:$0xff]  ;;  %v298_v11 = vld [vmem:[#allocation15 + $0x38] sm:$0xff]  ;;  %4487 = vmatprep.subr.msk.bf16.mxu0 %vm5374_vm1, %v4485_v4  ;;  %v393_v14 = vld [vmem:[#allocation16 + $0x8] sm:$0xff]  ;;  %vm3576_vm5 = vcmask 130112   ;;  %vm3597_vm6 = vcmask 195712   ;;  %vm3618_vm7 = vcmask 261312  }
  0xb8   :  { %v4503_v12 = vpack.c.bf16 %v298_v11, %v297_v10  ;;  %4499 = vmatprep.subr.msk.bf16.mxu1 %vm5374_vm1, %v4497_v8  ;;  %4490 = vmatpush3.bf16.xpose.msk.msra.mxu0 %vm5374_vm1, %v4485_v4  ;;  %v490_v15 = vld [vmem:[#allocation16 + $0x20] sm:$0xff]  ;;  %v491_v16 = vld [vmem:[#allocation16 + $0x28] sm:$0xff]  ;;  %v4509_v17 = vpack.c.bf16 %v393_v14, %v392_v13  ;;  %v394_v19 = vld [vmem:[#allocation16 + $0x10] sm:$0xff]  ;;  %s5103_s1 = smov [#allocation25]  }
  0xb9   :  { %4502 = vmatpush3.bf16.xpose.msk.msra.mxu1 %vm5374_vm1, %v4497_v8  ;;  %4493 = vmatprep.subr.msk.bf16.mxu0 %vm5374_vm1, %v4491_v9  ;;  %v4521_v18 = vpack.c.bf16 %v491_v16, %v490_v15  ;;  %v395_v20 = vld [vmem:[#allocation16 + $0x18] sm:$0xff]  ;;  %v492_v21 = vld [vmem:[#allocation16 + $0x30] sm:$0xff]  ;;  %v185_v23 = vld [vmem:[#allocation4 + $0x8] sm:$0xff]  ;;  %s3953_s19 = sshll.u32 %s5103_s1, 4  ;;  %s3954_s19 = int_to_ptr.vmem [resolvable:$true] %s3953_s19 }
  0xba   :  { %4505 = vmatprep.subr.msk.bf16.mxu1 %vm5374_vm1, %v4503_v12  ;;  %v493_v22 = vld [vmem:[#allocation16 + $0x38] sm:$0xff]  ;;  %v4515_v25 = vpack.c.bf16 %v395_v20, %v394_v19  ;;  %v188_v27 = vld [vmem:[#allocation9] sm:$0xff]  ;;  %v190_v28 = vld [vmem:[#allocation10] sm:$0xff]  ;;  %s4977_s7 = scalar_lea.vmem %s3954_s19, 1024  ;;  %p4982_p11 = scmp.lt.s32.totalorder %s3954_s19, %s3954_s19 }
  0xbb   :  { %v187_v24 = vld [vmem:[#allocation7 + $0x8] sm:$0xff]  ;;  %v4527_v26 = vpack.c.bf16 %v493_v22, %v492_v21  ;;  %v189_v29 = vld [vmem:[#allocation9 + $0x8] sm:$0xff]  ;;  %v685_v31 = vld [vmem:[#allocation18 + $0x20] sm:$0xff]  ;;  %p4978_p10 = scmp.ne.s32.totalorder %s3954_s19, %s4977_s7  ;;  %p4983_p12 = scmp.lt.s32.totalorder %s4977_s7, %s4977_s7 }
  0xbc   :  { %v191_v30 = vld [vmem:[#allocation10 + $0x8] sm:$0xff]  ;;  %v686_v32 = vld [vmem:[#allocation18 + $0x28] sm:$0xff]  ;;  %v687_v34 = vld [vmem:[#allocation18 + $0x30] sm:$0xff] }
  0xbd   :  { %v4545_v33 = vpack.c.bf16 %v686_v32, %v685_v31  ;;  %v688_v35 = vld [vmem:[#allocation18 + $0x38] sm:$0xff]  ;;  %v587_v41 = vld [vmem:[#allocation18] sm:$0xff]  ;;  %v588_v42 = vld [vmem:[#allocation18 + $0x8] sm:$0xff]  ;;  %p4984_p13 = por %p4983_p12, %p4982_p11 }
  0xbe   :  { %v4551_v36 = vpack.c.bf16 %v688_v35, %v687_v34  ;;  %v194_v43 = vld [vmem:[%s6167_s5] sm:$0xff]  ;;  %v4533_v44 = vpack.c.bf16 %v588_v42, %v587_v41  ;;  %v195_v45 = vld [vmem:[%s6167_s5 + $0x8] sm:$0xff]  ;;  %v589_v47 = vld [vmem:[#allocation18 + $0x10] sm:$0xff]  ;;  %s5101_s5 = smov 24  }
  0xbf   :  { %v590_v48 = vld [vmem:[#allocation18 + $0x18] sm:$0xff]  ;;  %v192_v54 = vld [vmem:[#allocation12] sm:$0xff]  ;;  %v193_v55 = vld [vmem:[#allocation12 + $0x8] sm:$0xff]  ;;  %p4985_p0 = pnand %p4984_p13, %p4978_p10 }
  0xc0   :  { %4496 = vmatpush3.bf16.xpose.msk.msra.mxu0 %vm5374_vm1, %v4491_v9  ;;  %v4539_v49 = vpack.c.bf16 %v590_v48, %v589_v47 }
  0xc1   :  { %4508 = vmatpush3.bf16.xpose.msk.msra.mxu1 %vm5374_vm1, %v4503_v12  ;;  %4511 = vmatprep.subr.msk.bf16.mxu0 %vm5374_vm1, %v4509_v17 }
  0xc2   :  { %4523 = vmatprep.subr.msk.bf16.mxu1 %vm5374_vm1, %v4521_v18 }
  0xc7   :  { %4214 = vmatmul.mubr.msk.f32.vlgmr.msra.gmra.mrb[0].mxu0 %vm200_vm0, %v185_v23 }
  0xc8   :  { %4225 = vmatmul.mubr.msk.f32.vlgmr.msra.gmra.mrb[0].mxu1 %vm200_vm0, %v187_v24  ;;  %4514 = vmatpush3.bf16.xpose.msk.msra.mxu0 %vm5374_vm1, %v4509_v17 }
  0xc9   :  { %4526 = vmatpush3.bf16.xpose.msk.msra.mxu1 %vm5374_vm1, %v4521_v18  ;;  %4517 = vmatprep.subr.msk.bf16.mxu0 %vm5374_vm1, %v4515_v25 }
  0xca   :  { %4529 = vmatprep.subr.msk.bf16.mxu1 %vm5374_vm1, %v4527_v26  ;;  %4235 = vmatprep.mubr.msk.f32.mxu0 %vm200_vm0, %v188_v27 }
  0xcb   :  { %4246 = vmatprep.mubr.msk.f32.mxu1 %vm200_vm0, %v190_v28 }
  0xd0   :  { %4520 = vmatpush3.bf16.xpose.msk.msra.mxu0 %vm5374_vm1, %v4515_v25 }
  0xd1   :  { %4532 = vmatpush3.bf16.xpose.msk.msra.mxu1 %vm5374_vm1, %v4527_v26  ;;  %4535 = vmatprep.subr.msk.bf16.mxu0 %vm5374_vm1, %v4533_v44 }
  0xd2   :  { %4547 = vmatprep.subr.msk.bf16.mxu1 %vm5374_vm1, %v4545_v33 }
  0xd7   :  { %4236 = vmatmul.mubr.msk.f32.vlgmr.msra.gmra.mrb[2].mxu0 %vm200_vm0, %v189_v29 }
  0xd8   :  { %4247 = vmatmul.mubr.msk.f32.vlgmr.msra.gmra.mrb[2].mxu1 %vm200_vm0, %v191_v30  ;;  %4538 = vmatpush3.bf16.xpose.msk.msra.mxu0 %vm5374_vm1, %v4533_v44 }
  0xd9   :  { %4550 = vmatpush3.bf16.xpose.msk.msra.mxu1 %vm5374_vm1, %v4545_v33  ;;  %4268 = vmatprep.mubr.msk.f32.mxu1 %vm200_vm0, %v194_v43 }
  0xda   :  { %4553 = vmatprep.subr.msk.bf16.mxu1 %vm5374_vm1, %v4551_v36  ;;  %4541 = vmatprep.subr.msk.bf16.mxu0 %vm5374_vm1, %v4539_v49 }
  0xdb   :  { %4257 = vmatprep.mubr.msk.f32.mxu0 %vm200_vm0, %v192_v54  ;;  %v5100_v54 = vmov 0.0|0.0  }
  0xe0   :  { %4544 = vmatpush3.bf16.xpose.msk.msra.mxu0 %vm5374_vm1, %v4539_v49 }
  0xe1   :  { %4556 = vmatpush3.bf16.xpose.msk.msra.mxu1 %vm5374_vm1, %v4551_v36  ;;  %4271 = vmatprep.subr.mxu0 %v5098_v46 }
  0xe2   :  { %4276 = vmatprep.subr.mxu1 %v5098_v46 }
  0xe7   :  { %4258 = vmatmul.mubr.msk.f32.vlgmr.msra.gmra.mrb[4].mxu0 %vm200_vm0, %v193_v55 }
  0xe8   :  { %4269 = vmatmul.mubr.msk.f32.vlgmr.msra.gmra.mrb[4].mxu1 %vm200_vm0, %v195_v45  ;;  %4273 = vmatprep.mubr.msk.f32.mxu0 %vm5099_vm2, %v5098_v46 }
  0xe9   :  { %4278 = vmatprep.mubr.msk.f32.mxu1 %vm5099_vm2, %v5098_v46 }
 0x19a   :  { %v5420_v37 = vpop.f32.mrb[0].mxu0 }
 0x19b   :  { %v5422_v38 = vpop.f32.mrb[0].mxu1  ;;  %801 = vrot.lane.b32.xlu1 %v5420_v37, %s5095_s10  ;;  %v5426_v39 = vpop.f32.mrb[1].mxu0 }
 0x19c   :  { %790 = vrot.lane.b32.xlu0 %v5422_v38, %s5086_s16  ;;  %v5432_v40 = vpop.f32.mrb[1].mxu1 }
 0x19f   :  { %788 = vrot.lane.b32.xlu1 %v5432_v40, %s5086_s16 }
 0x1a0   :  { %807 = vrot.lane.b32.xlu0 %v5426_v39, %s5096_s17 }
 0x1a3   :  { %799 = vrot.lane.b32.xlu1 %v5426_v39, %s5095_s10 }
 0x1a4   :  { %821 = vrot.lane.b32.xlu0 %v5426_v39, %s5097_s21 }
 0x1a7   :  { %813 = vrot.lane.b32.xlu1 %v5432_v40, %s5095_s10 }
 0x1aa   :  { %v5463_v50 = vpop.f32.mrb[2].mxu0 }
 0x1ab   :  { %827 = vrot.lane.b32.xlu1 %v5432_v40, %s5096_s17  ;;  %857 = vrot.lane.b32.xlu0 %v5463_v50, %s5096_s17  ;;  %v5471_v51 = vpop.f32.mrb[3].mxu0  ;;  %v5473_v52 = vpop.f32.mrb[2].mxu1 }
 0x1ac   :  { %v5475_v53 = vpop.f32.mrb[3].mxu1  ;;  %v5483_v56 = vsub.f32 0.0, %v5473_v52 }
 0x1ad   :  { %v782_v57 = vsub.f32 0.0, %v5475_v53 }
 0x1af   :  { %849 = vrot.lane.b32.xlu1 %v5463_v50, %s5095_s10  ;;  %847 = vrot.lane.b32.xlu0 %v5471_v51, %s5095_s10 }
 0x1b3   :  { %863 = vrot.lane.b32.xlu1 %v5483_v56, %s5095_s10  ;;  %855 = vrot.lane.b32.xlu0 %v5471_v51, %s5096_s17 }
 0x1b7   :  { %877 = vrot.lane.b32.xlu1 %v5483_v56, %s5096_s17  ;;  %869 = vrot.lane.b32.xlu0 %v5471_v51, %s5097_s21 }
 0x1bb   :  { %861 = vrot.lane.b32.xlu1 %v782_v57, %s5095_s10  ;;  %839 = vrot.lane.b32.xlu0 %v5483_v56, %s5086_s16 }
 0x1bf   :  { %875 = vrot.lane.b32.xlu1 %v782_v57, %s5096_s17  ;;  %837 = vrot.lane.b32.xlu0 %v782_v57, %s5086_s16 }
 0x1c3   :  { %815 = vrot.lane.b32.xlu1 %v5422_v38, %s5095_s10  ;;  %871 = vrot.lane.b32.xlu0 %v5463_v50, %s5097_s21 }
 0x1c7   :  { %829 = vrot.lane.b32.xlu1 %v5422_v38, %s5096_s17  ;;  %809 = vrot.lane.b32.xlu0 %v5420_v37, %s5096_s17 }
 0x1cb   :  { %893 = vrot.lane.b32.xlu1 %v5475_v53, %s5095_s10  ;;  %823 = vrot.lane.b32.xlu0 %v5420_v37, %s5097_s21 }
 0x1cf   :  { %909 = vrot.lane.b32.xlu1 %v5475_v53, %s5097_s21  ;;  %883 = vrot.lane.b32.xlu0 %v5471_v51, %s5086_s16 }
 0x1d3   :  { %895 = vrot.lane.b32.xlu1 %v5473_v52, %s5095_s10  ;;  %901 = vrot.lane.b32.xlu0 %v5475_v53, %s5096_s17 }
 0x1d7   :  { %911 = vrot.lane.b32.xlu1 %v5473_v52, %s5097_s21  ;;  %885 = vrot.lane.b32.xlu0 %v5463_v50, %s5086_s16 }
 0x1db   :  { %903 = vrot.lane.b32.xlu0 %v5473_v52, %s5096_s17 }
 0x20d   :  { %v802_v58 = vpop.permute.xlu1 %801 }
 0x20e   :  { %v791_v59 = vpop.permute.xlu0 %790  ;;  %v806_v24 = vsel %vm794_vm4, %v802_v58, %v5422_v38 }
 0x20f   :  { %v796_v30 = vsel %vm794_vm4, %v5420_v37, %v791_v59 }
 0x211   :  { %v789_v60 = vpop.permute.xlu1 %788 }
 0x212   :  { %v808_v61 = vpop.permute.xlu0 %807  ;;  %v795_v18 = vsel %vm794_vm4, %v5426_v39, %v789_v60 }
 0x215   :  { %v800_v62 = vpop.permute.xlu1 %799 }
 0x216   :  { %v822_v63 = vpop.permute.xlu0 %821  ;;  %v5541_v7 = vsel %vm794_vm4, %v800_v62, %v5432_v40 }
 0x219   :  { %v814_v1 = vpop.permute.xlu1 %813 }
 0x21a   :  { %v819_v25 = vsel %vm794_vm4, %v808_v61, %v814_v1 }
 0x21d   :  { %v828_v2 = vpop.permute.xlu1 %827  ;;  %v5529_v3 = vpop.permute.xlu0 %857 }
 0x21e   :  { %v833_v19 = vsel %vm794_vm4, %v822_v63, %v828_v2 }
 0x221   :  { %v5531_v4 = vpop.permute.xlu1 %849  ;;  %v5533_v5 = vpop.permute.xlu0 %847 }
 0x222   :  { %v853_v6 = vsel %vm794_vm4, %v5533_v5, %v782_v57  ;;  %v854_v22 = vsel %vm794_vm4, %v5531_v4, %v5483_v56  ;;  %v5666_v57 = vpop.f32.mrb[4].mxu0 }
 0x223   :  { %4277 = vmatpush3.xpose.msk.msra.mxu1 %vm977_vm3, %v853_v6  ;;  %v5668_v58 = vpop.f32.mrb[5].mxu0 }
 0x224   :  { %4286 = vmatprep.subr.mxu1 %v5098_v46 }
 0x225   :  { %v864_v8 = vpop.permute.xlu1 %863  ;;  %v856_v9 = vpop.permute.xlu0 %855 }
 0x226   :  { %4279 = vmatmul.mubr.msk.f32.vlgmr.msra.gmra.mrb[6].mxu1 %vm977_vm3, %v5541_v7  ;;  %v868_v33 = vsel %vm794_vm4, %v5529_v3, %v864_v8 }
 0x227   :  { %4288 = vmatprep.mubr.msk.f32.mxu1 %vm5099_vm2, %v5098_v46 }
 0x229   :  { %v878_v10 = vpop.permute.xlu1 %877  ;;  %v870_v11 = vpop.permute.xlu0 %869 }
 0x22d   :  { %v862_v12 = vpop.permute.xlu1 %861  ;;  %v840_v13 = vpop.permute.xlu0 %839 }
 0x22e   :  { %v867_v23 = vsel %vm794_vm4, %v856_v9, %v862_v12  ;;  %v844_v28 = vsel %vm794_vm4, %v5463_v50, %v840_v13 }
 0x231   :  { %v876_v14 = vpop.permute.xlu1 %875  ;;  %v838_v15 = vpop.permute.xlu0 %837 }
 0x232   :  { %v881_v16 = vsel %vm794_vm4, %v870_v11, %v876_v14  ;;  %v843_v17 = vsel %vm794_vm4, %v5471_v51, %v838_v15 }
 0x233   :  { %4272 = vmatpush3.xpose.msk.msra.mxu0 %vm977_vm3, %v843_v17  ;;  %4287 = vmatpush3.xpose.msk.msra.mxu1 %vm977_vm3, %v881_v16 }
 0x234   :  { %4281 = vmatprep.subr.mxu0 %v5098_v46  ;;  %4296 = vmatprep.subr.mxu1 %v5098_v46 }
 0x235   :  { %v816_v20 = vpop.permute.xlu1 %815  ;;  %v872_v21 = vpop.permute.xlu0 %871 }
 0x236   :  { %4274 = vmatmul.mubr.msk.f32.vlgmr.msra.gmra.mrb[6].mxu0 %vm977_vm3, %v795_v18  ;;  %4289 = vmatmul.mubr.msk.f32.vlgmr.msra.gmra.mrb[8].mxu1 %vm977_vm3, %v833_v19  ;;  %v882_v29 = vsel %vm794_vm4, %v872_v21, %v878_v10 }
 0x237   :  { %4282 = vmatpush3.xpose.msk.msra.mxu0 %vm977_vm3, %v867_v23  ;;  %4297 = vmatpush3.xpose.msk.msra.mxu1 %vm977_vm3, %v854_v22 }
 0x238   :  { %4283 = vmatprep.mubr.msk.f32.mxu0 %vm5099_vm2, %v5098_v46  ;;  %4298 = vmatprep.mubr.msk.f32.mxu1 %vm5099_vm2, %v5098_v46 }
 0x239   :  { %v830_v26 = vpop.permute.xlu1 %829  ;;  %v810_v27 = vpop.permute.xlu0 %809  ;;  %4291 = vmatprep.subr.mxu0 %v5098_v46  ;;  %4306 = vmatprep.subr.mxu1 %v5098_v46 }
 0x23a   :  { %4284 = vmatmul.mubr.msk.f32.vlgmr.msra.gmra.mrb[8].mxu0 %vm977_vm3, %v819_v25  ;;  %4299 = vmatmul.mubr.msk.f32.vlgmr.msra.gmra.mrb[10].mxu1 %vm977_vm3, %v806_v24  ;;  %v820_v36 = vsel %vm794_vm4, %v810_v27, %v816_v20 }
 0x23b   :  { %4292 = vmatpush3.xpose.msk.msra.mxu0 %vm977_vm3, %v844_v28  ;;  %4307 = vmatpush3.xpose.msk.msra.mxu1 %vm977_vm3, %v882_v29 }
 0x23c   :  { %4293 = vmatprep.mubr.msk.f32.mxu0 %vm5099_vm2, %v5098_v46  ;;  %4301 = vmatprep.subr.mxu0 %v5098_v46 }
 0x23d   :  { %v894_v31 = vpop.permute.xlu1 %893  ;;  %v824_v32 = vpop.permute.xlu0 %823  ;;  %4308 = vmatprep.mubr.msk.f32.mxu1 %vm5099_vm2, %v5098_v46  ;;  %4316 = vmatprep.subr.mxu1 %v5098_v46 }
 0x23e   :  { %v899_v34 = vsel %vm794_vm4, %v894_v31, %v5471_v51  ;;  %v834_v35 = vsel %vm794_vm4, %v824_v32, %v830_v26  ;;  %4294 = vmatmul.mubr.msk.f32.vlgmr.msra.gmra.mrb[10].mxu0 %vm977_vm3, %v796_v30 }
 0x23f   :  { %4302 = vmatpush3.xpose.msk.msra.mxu0 %vm977_vm3, %v868_v33  ;;  %4309 = vmatmul.mubr.msk.f32.vlgmr.msra.gmra.mrb[12].mxu1 %vm977_vm3, %v834_v35 }
 0x240   :  { %4317 = vmatpush3.xpose.msk.msra.mxu1 %vm977_vm3, %v899_v34  ;;  %4303 = vmatprep.mubr.msk.f32.mxu0 %vm5099_vm2, %v5098_v46 }
 0x241   :  { %v910_v37 = vpop.permute.xlu1 %909  ;;  %v884_v38 = vpop.permute.xlu0 %883  ;;  %4311 = vmatprep.subr.mxu0 %v5098_v46  ;;  %4318 = vmatprep.mubr.msk.f32.mxu1 %vm5099_vm2, %v5098_v46 }
 0x242   :  { %v915_v39 = vsel %vm794_vm4, %v910_v37, %v856_v9  ;;  %v889_v40 = vsel %vm794_vm4, %v5475_v53, %v884_v38  ;;  %4304 = vmatmul.mubr.msk.f32.vlgmr.msra.gmra.mrb[12].mxu0 %vm977_vm3, %v820_v36  ;;  %4326 = vmatprep.subr.mxu1 %v5098_v46 }
 0x243   :  { %4312 = vmatpush3.xpose.msk.msra.mxu0 %vm977_vm3, %v889_v40  ;;  %4319 = vmatmul.mubr.msk.f32.vlgmr.msra.gmra.mrb[14].mxu1 %vm977_vm3, %v5541_v7 }
 0x244   :  { %4327 = vmatpush3.xpose.msk.msra.mxu1 %vm977_vm3, %v915_v39  ;;  %4313 = vmatprep.mubr.msk.f32.mxu0 %vm5099_vm2, %v5098_v46 }
 0x245   :  { %v896_v41 = vpop.permute.xlu1 %895  ;;  %v902_v42 = vpop.permute.xlu0 %901  ;;  %4321 = vmatprep.subr.mxu0 %v5098_v46  ;;  %4328 = vmatprep.mubr.msk.f32.mxu1 %vm5099_vm2, %v5098_v46 }
 0x246   :  { %v900_v43 = vsel %vm794_vm4, %v896_v41, %v5463_v50  ;;  %v907_v44 = vsel %vm794_vm4, %v902_v42, %v5533_v5  ;;  %4314 = vmatmul.mubr.msk.f32.vlgmr.msra.gmra.mrb[14].mxu0 %vm977_vm3, %v795_v18  ;;  %4336 = vmatprep.subr.mxu1 %v5098_v46 }
 0x247   :  { %4322 = vmatpush3.xpose.msk.msra.mxu0 %vm977_vm3, %v907_v44  ;;  %4329 = vmatmul.mubr.msk.f32.vlgmr.msra.gmra.mrb[16].mxu1 %vm977_vm3, %v833_v19 }
 0x248   :  { %4337 = vmatpush3.xpose.msk.msra.mxu1 %vm977_vm3, %v900_v43  ;;  %4323 = vmatprep.mubr.msk.f32.mxu0 %vm5099_vm2, %v5098_v46 }
 0x249   :  { %v912_v45 = vpop.permute.xlu1 %911  ;;  %v886_v47 = vpop.permute.xlu0 %885  ;;  %4331 = vmatprep.subr.mxu0 %v5098_v46  ;;  %4338 = vmatprep.mubr.msk.f32.mxu1 %vm5099_vm2, %v5098_v46 }
 0x24a   :  { %v916_v48 = vsel %vm794_vm4, %v912_v45, %v5529_v3  ;;  %v890_v49 = vsel %vm794_vm4, %v5473_v52, %v886_v47  ;;  %4324 = vmatmul.mubr.msk.f32.vlgmr.msra.gmra.mrb[16].mxu0 %vm977_vm3, %v819_v25  ;;  %4346 = vmatprep.subr.mxu1 %v5098_v46  ;;  %v5658_v52 = vpop.f32.mrb[4].mxu1 }
 0x24b   :  { %4332 = vmatpush3.xpose.msk.msra.mxu0 %vm977_vm3, %v890_v49  ;;  %4339 = vmatmul.mubr.msk.f32.vlgmr.msra.gmra.mrb[18].mxu1 %vm977_vm3, %v806_v24  ;;  %v5660_v53 = vpop.f32.mrb[5].mxu1  ;;  %v785_v56 = vsub.f32 0.0, %v5658_v52  ;;  %v4594_v1 = vpack.c.bf16 %v5666_v57, %v5658_v52 }
 0x24c   :  { %4347 = vmatpush3.xpose.msk.msra.mxu1 %vm977_vm3, %v916_v48  ;;  %4333 = vmatprep.mubr.msk.f32.mxu0 %vm5099_vm2, %v5098_v46  ;;  %v784_v55 = vsub.f32 0.0, %v5660_v53  ;;  %v4582_v63 = vpack.c.bf16 %v5668_v58, %v5660_v53 }
 0x24d   :  { %v904_v50 = vpop.permute.xlu0 %903  ;;  %4341 = vmatprep.subr.mxu0 %v5098_v46  ;;  %4348 = vmatprep.mubr.msk.f32.mxu1 %vm5099_vm2, %v5098_v46  ;;  %v5675_v61 = vpack.i.bf16 %v785_v56, %v5666_v57  ;;  %v5678_v62 = vpack.c.bf16 %v785_v56, %v5666_v57 }
 0x24e   :  { %v908_v51 = vsel %vm794_vm4, %v904_v50, %v5531_v4  ;;  %4334 = vmatmul.mubr.msk.f32.vlgmr.msra.gmra.mrb[18].mxu0 %vm977_vm3, %v796_v30  ;;  %4560 = vmatprep.subr.bf16.mxu1 %v5100_v54  ;;  %v4558_v59 = vpack.c.bf16 %v784_v55, %v5668_v58  ;;  %v5672_v60 = vpack.i.bf16 %v784_v55, %v5668_v58 }
 0x24f   :  { %4342 = vmatpush3.xpose.msk.msra.mxu0 %vm977_vm3, %v908_v51  ;;  %4349 = vmatmul.mubr.msk.f32.vlgmr.msra.gmra.mrb[20].mxu1 %vm977_vm3, %v834_v35 }
 0x250   :  { %4343 = vmatprep.mubr.msk.f32.mxu0 %vm5099_vm2, %v5098_v46  ;;  %4362 = vmatprep.mubr.msk.f32.mxu1 %vm5099_vm2, %v5098_v46 }
 0x251   :  { %4557 = vmatprep.subr.bf16.mxu0 %v5100_v54 }
 0x252   :  { %4344 = vmatmul.mubr.msk.f32.vlgmr.msra.gmra.mrb[20].mxu0 %vm977_vm3, %v820_v36 }
 0x253   :  { %4355 = vmatprep.mubr.msk.f32.mxu0 %vm5099_vm2, %v5098_v46  ;;  %4559 = vmatpush3.bf16.msra.mxu0 %v4558_v59 }
 0x254   :  { %4563 = vmatprep.subr.bf16.mxu0 %v5100_v54 }
 0x2f9   :  { %v5685_v2 = vpop.f32.mrb[6].mxu1 }
 0x2fa   :  { %v4280_v3 = vpop.f32.mrb[7].mxu1  ;;  %v2175_v43 = vsel %vm794_vm4, %v5685_v2, -inf }
 0x309   :  { %v5687_v4 = vpop.f32.mrb[6].mxu0  ;;  %v5689_v5 = vpop.f32.mrb[8].mxu1 }
 0x30a   :  { %v4275_v6 = vpop.f32.mrb[7].mxu0  ;;  %v4290_v7 = vpop.f32.mrb[9].mxu1  ;;  %v2172_v42 = vsel %vm794_vm4, %v5687_v4, -inf  ;;  %v2181_v45 = vsel %vm794_vm4, %v5689_v5, -inf }
 0x30d   :  { %v5691_v8 = vpop.f32.mrb[8].mxu0  ;;  %v5693_v9 = vpop.f32.mrb[10].mxu1 }
 0x30e   :  { %v4285_v10 = vpop.f32.mrb[9].mxu0  ;;  %v4300_v11 = vpop.f32.mrb[11].mxu1  ;;  %v2178_v44 = vsel %vm794_vm4, %v5691_v8, -inf  ;;  %v2187_v48 = vsel %vm794_vm4, %v5693_v9, -inf }
 0x311   :  { %v5695_v12 = vpop.f32.mrb[10].mxu0 }
 0x312   :  { %v4295_v13 = vpop.f32.mrb[11].mxu0  ;;  %v5697_v14 = vpop.f32.mrb[12].mxu1  ;;  %v2184_v47 = vsel %vm794_vm4, %v5695_v12, -inf }
 0x313   :  { %v4310_v15 = vpop.f32.mrb[13].mxu1  ;;  %v2193_v50 = vsel %vm794_vm4, %v5697_v14, -inf }
 0x315   :  { %v5699_v16 = vpop.f32.mrb[12].mxu0 }
 0x316   :  { %v4305_v17 = vpop.f32.mrb[13].mxu0  ;;  %v1728_v18 = vpop.f32.mrb[14].mxu1  ;;  %v2190_v49 = vsel %vm794_vm4, %v5699_v16, -inf }
 0x317   :  { %v4320_v19 = vpop.f32.mrb[15].mxu1  ;;  %v2271_v20 = vsel %vm794_vm4, %v1728_v18, -inf }
 0x318   :  { %2272 = vmax.xlane.f32.xlu1 %v2271_v20 }
 0x319   :  { %v1655_v21 = vpop.f32.mrb[14].mxu0 }
 0x31a   :  { %v4315_v22 = vpop.f32.mrb[15].mxu0  ;;  %v1874_v23 = vpop.f32.mrb[16].mxu1  ;;  %v2268_v24 = vsel %vm794_vm4, %v1655_v21, -inf }
 0x31b   :  { %v4330_v25 = vpop.f32.mrb[17].mxu1  ;;  %2269 = vmax.xlane.f32.xlu0 %v2268_v24  ;;  %v2277_v34 = vsel %vm794_vm4, %v1874_v23, -inf }
 0x31d   :  { %v1801_v26 = vpop.f32.mrb[16].mxu0 }
 0x31e   :  { %v4325_v27 = vpop.f32.mrb[17].mxu0  ;;  %v5703_v28 = vpop.f32.mrb[18].mxu1  ;;  %v2274_v29 = vsel %vm794_vm4, %v1801_v26, -inf }
 0x31f   :  { %v4340_v30 = vpop.f32.mrb[19].mxu1  ;;  %2275 = vmax.xlane.f32.xlu0 %v2274_v29  ;;  %v2283_v39 = vsel %vm794_vm4, %v5703_v28, -inf }
 0x321   :  { %v1947_v31 = vpop.f32.mrb[18].mxu0 }
 0x322   :  { %v4335_v32 = vpop.f32.mrb[19].mxu0  ;;  %v5706_v33 = vpop.f32.mrb[20].mxu1  ;;  %v2280_v35 = vsel %vm794_vm4, %v1947_v31, -inf }
 0x323   :  { %v4350_v36 = vpop.f32.mrb[21].mxu1  ;;  %2278 = vmax.xlane.f32.xlu0 %v2277_v34  ;;  %2281 = vmax.xlane.f32.xlu1 %v2280_v35  ;;  %v2289_v41 = vsel %vm794_vm4, %v5706_v33, -inf }
 0x325   :  { %v2093_v37 = vpop.f32.mrb[20].mxu0 }
 0x326   :  { %v4345_v38 = vpop.f32.mrb[21].mxu0  ;;  %v2286_v40 = vsel %vm794_vm4, %v2093_v37, -inf }
 0x327   :  { %2284 = vmax.xlane.f32.xlu0 %v2283_v39  ;;  %2287 = vmax.xlane.f32.xlu1 %v2286_v40 }
 0x32b   :  { %2290 = vmax.xlane.f32.xlu0 %v2289_v41  ;;  %2173 = vmax.xlane.f32.xlu1 %v2172_v42 }
 0x32f   :  { %2176 = vmax.xlane.f32.xlu0 %v2175_v43  ;;  %2179 = vmax.xlane.f32.xlu1 %v2178_v44 }
 0x333   :  { %2182 = vmax.xlane.f32.xlu0 %v2181_v45  ;;  %2185 = vmax.xlane.f32.xlu1 %v2184_v47 }
 0x337   :  { %2188 = vmax.xlane.f32.xlu0 %v2187_v48  ;;  %2191 = vmax.xlane.f32.xlu1 %v2190_v49 }
 0x33b   :  { %2194 = vmax.xlane.f32.xlu0 %v2193_v50 }
 0x3a5   :  { %v2273_v51 = vpop.xlane.xlu1 %2272 }
 0x3a6   :  { %v2293_v55 = vsub.f32 %v1728_v18, %v2273_v51 }
 0x3a8   :  { %v2302_v56 = vmul.f32 1.442695, %v2293_v55  ;;  %v2270_v59 = vpop.xlane.xlu0 %2269 }
 0x3a9   :  { %v2292_v3 = vsub.f32 %v1655_v21, %v2270_v59 }
 0x3aa   :  { %4683 = vpow2.f32 %v2302_v56 }
 0x3ab   :  { %v2300_v6 = vmul.f32 1.442695, %v2292_v3 }
 0x3ac   :  { %v2276_v7 = vpop.xlane.xlu0 %2275 }
 0x3ad   :  { %4685 = vpow2.f32 %v2300_v6  ;;  %v2294_v10 = vsub.f32 %v1801_v26, %v2276_v7 }
 0x3af   :  { %v2304_v11 = vmul.f32 1.442695, %v2294_v10 }
 0x3b0   :  { %v2279_v13 = vpop.xlane.xlu0 %2278  ;;  %v2282_v15 = vpop.xlane.xlu1 %2281 }
 0x3b1   :  { %4687 = vpow2.f32 %v2304_v11  ;;  %v2295_v17 = vsub.f32 %v1874_v23, %v2279_v13  ;;  %v2296_v19 = vsub.f32 %v1947_v31, %v2282_v15 }
 0x3b3   :  { %v2306_v20 = vmul.f32 1.442695, %v2295_v17  ;;  %v2308_v22 = vmul.f32 1.442695, %v2296_v19 }
 0x3b4   :  { %v5731_v24 = vpop.eup %4683  ;;  %v2285_v25 = vpop.xlane.xlu0 %2284 }
 0x3b5   :  { %v2288_v18 = vpop.xlane.xlu1 %2287  ;;  %4689 = vpow2.f32 %v2306_v20  ;;  %v2297_v21 = vsub.f32 %v5703_v28, %v2285_v25  ;;  %v2319_v29 = vsel %vm794_vm4, %v5731_v24, 0.0 }
 0x3b6   :  { %v2298_v27 = vsub.f32 %v2093_v37, %v2288_v18  ;;  %4691 = vpow2.f32 %v2308_v22  ;;  %2320 = vadd.xlane.f32.xlu0 %v2319_v29 }
 0x3b7   :  { %v5736_v26 = vpop.eup %4685  ;;  %v2310_v30 = vmul.f32 1.442695, %v2297_v21 }
 0x3b8   :  { %v2312_v23 = vmul.f32 1.442695, %v2298_v27  ;;  %v2291_v31 = vpop.xlane.xlu0 %2290  ;;  %v2316_v34 = vsel %vm794_vm4, %v5736_v26, 0.0 }
 0x3b9   :  { %v2174_v32 = vpop.xlane.xlu1 %2173  ;;  %4693 = vpow2.f32 %v2310_v30  ;;  %v2299_v35 = vsub.f32 %v5706_v33, %v2291_v31  ;;  %2317 = vadd.xlane.f32.xlu1 %v2316_v34 }
 0x3ba   :  { %v2196_v28 = vsub.f32 %v5687_v4, %v2174_v32  ;;  %4695 = vpow2.f32 %v2312_v23 }
 0x3bb   :  { %v5742_v36 = vpop.eup %4687  ;;  %v2314_v37 = vmul.f32 1.442695, %v2299_v35 }
 0x3bc   :  { %v2204_v38 = vmul.f32 1.442695, %v2196_v28  ;;  %v2177_v39 = vpop.xlane.xlu0 %2176  ;;  %v2322_v41 = vsel %vm794_vm4, %v5742_v36, 0.0 }
 0x3bd   :  { %v2180_v40 = vpop.xlane.xlu1 %2179  ;;  %4697 = vpow2.f32 %v2314_v37  ;;  %v2197_v42 = vsub.f32 %v5685_v2, %v2177_v39  ;;  %2323 = vadd.xlane.f32.xlu1 %v2322_v41 }
 0x3be   :  { %v2198_v43 = vsub.f32 %v5691_v8, %v2180_v40  ;;  %4699 = vpow2.f32 %v2204_v38 }
 0x3bf   :  { %v5748_v33 = vpop.eup %4689  ;;  %v2206_v4 = vmul.f32 1.442695, %v2197_v42 }
 0x3c0   :  { %v2208_v44 = vmul.f32 1.442695, %v2198_v43  ;;  %v5750_v45 = vpop.eup %4691  ;;  %v2183_v47 = vpop.xlane.xlu0 %2182  ;;  %v2325_v49 = vsel %vm794_vm4, %v5748_v33, 0.0  ;;  %v5815_v43 = vld [vmem:[#allocation13] sm:$0xff] }
 0x3c1   :  { %v2186_v48 = vpop.xlane.xlu1 %2185  ;;  %4701 = vpow2.f32 %v2206_v4  ;;  %v2199_v50 = vsub.f32 %v5689_v5, %v2183_v47  ;;  %2326 = vadd.xlane.f32.xlu0 %v2325_v49  ;;  %v2328_v8 = vsel %vm794_vm4, %v5750_v45, 0.0 }
 0x3c2   :  { %v2200_v2 = vsub.f32 %v5695_v12, %v2186_v48  ;;  %4703 = vpow2.f32 %v2208_v44  ;;  %2329 = vadd.xlane.f32.xlu1 %v2328_v8 }
 0x3c3   :  { %v5758_v51 = vpop.eup %4693  ;;  %v2210_v55 = vmul.f32 1.442695, %v2199_v50 }
 0x3c4   :  { %v2212_v56 = vmul.f32 1.442695, %v2200_v2  ;;  %v5760_v59 = vpop.eup %4695  ;;  %v2189_v3 = vpop.xlane.xlu0 %2188  ;;  %v2331_v7 = vsel %vm794_vm4, %v5758_v51, 0.0 }
 0x3c5   :  { %v2192_v6 = vpop.xlane.xlu1 %2191  ;;  %4705 = vpow2.f32 %v2210_v55  ;;  %v2201_v5 = vsub.f32 %v5693_v9, %v2189_v3  ;;  %2332 = vadd.xlane.f32.xlu0 %v2331_v7  ;;  %v2334_v10 = vsel %vm794_vm4, %v5760_v59, 0.0 }
 0x3c6   :  { %v2202_v12 = vsub.f32 %v5699_v16, %v2192_v6  ;;  %4707 = vpow2.f32 %v2212_v56  ;;  %2335 = vadd.xlane.f32.xlu1 %v2334_v10 }
 0x3c7   :  { %v5768_v11 = vpop.eup %4697  ;;  %v2214_v13 = vmul.f32 1.442695, %v2201_v5 }
 0x3c8   :  { %v2216_v15 = vmul.f32 1.442695, %v2202_v12  ;;  %v5770_v17 = vpop.eup %4699  ;;  %v2195_v19 = vpop.xlane.xlu0 %2194  ;;  %v2337_v20 = vsel %vm794_vm4, %v5768_v11, 0.0  ;;  %v5831_v12 = vld [vmem:[#allocation13 + $0x8] sm:$0xff] }
 0x3c9   :  { %4709 = vpow2.f32 %v2214_v13  ;;  %v2203_v9 = vsub.f32 %v5697_v14, %v2195_v19  ;;  %2338 = vadd.xlane.f32.xlu0 %v2337_v20  ;;  %v2220_v16 = vsel %vm794_vm4, %v5770_v17, 0.0 }
 0x3ca   :  { %4711 = vpow2.f32 %v2216_v15  ;;  %2221 = vadd.xlane.f32.xlu1 %v2220_v16 }
 0x3cb   :  { %v5777_v22 = vpop.eup %4701  ;;  %v2218_v25 = vmul.f32 1.442695, %v2203_v9 }
 0x3cc   :  { %v5779_v18 = vpop.eup %4703  ;;  %v2223_v21 = vsel %vm794_vm4, %v5777_v22, 0.0 }
 0x3cd   :  { %4713 = vpow2.f32 %v2218_v25  ;;  %2224 = vadd.xlane.f32.xlu0 %v2223_v21  ;;  %v2226_v27 = vsel %vm794_vm4, %v5779_v18, 0.0 }
 0x3ce   :  { %2227 = vadd.xlane.f32.xlu1 %v2226_v27 }
 0x3cf   :  { %v5785_v14 = vpop.eup %4705 }
 0x3d0   :  { %v5787_v29 = vpop.eup %4707  ;;  %v2229_v30 = vsel %vm794_vm4, %v5785_v14, 0.0 }
 0x3d1   :  { %2230 = vadd.xlane.f32.xlu0 %v2229_v30  ;;  %v2232_v23 = vsel %vm794_vm4, %v5787_v29, 0.0 }
 0x3d2   :  { %2233 = vadd.xlane.f32.xlu1 %v2232_v23 }
 0x3d3   :  { %v5793_v31 = vpop.eup %4709 }
 0x3d4   :  { %v5795_v32 = vpop.eup %4711  ;;  %v2235_v34 = vsel %vm794_vm4, %v5793_v31, 0.0 }
 0x3d5   :  { %2236 = vadd.xlane.f32.xlu0 %v2235_v34  ;;  %v2238_v35 = vsel %vm794_vm4, %v5795_v32, 0.0 }
 0x3d6   :  { %2239 = vadd.xlane.f32.xlu1 %v2238_v35 }
 0x3d7   :  { %v5801_v28 = vpop.eup %4713 }
 0x3d8   :  { %v2241_v37 = vsel %vm794_vm4, %v5801_v28, 0.0 }
 0x3d9   :  { %2242 = vadd.xlane.f32.xlu0 %v2241_v37 }
 0x3e7   :  { %4654 = vrot.lane.b32.xlu1 %v5672_v60, %s5095_s10 }
 0x3eb   :  { %4664 = vrot.lane.b32.xlu1 %v5672_v60, %s5097_s21 }
 0x3ef   :  { %4659 = vrot.lane.b32.xlu0 %v5672_v60, %s5096_s17 }
 0x3f3   :  { %4669 = vrot.lane.b32.xlu0 %v5675_v61, %s5095_s10 }
 0x3f7   :  { %4674 = vrot.lane.b32.xlu0 %v5675_v61, %s5096_s17 }
 0x443   :  { %v2321_v38 = vpop.xlane.xlu0 %2320 }
 0x444   :  { %4715 = vrcp.f32 %v2321_v38 }
 0x446   :  { %v2318_v39 = vpop.xlane.xlu1 %2317 }
 0x447   :  { %4717 = vrcp.f32 %v2318_v39 }
 0x44a   :  { %v2324_v40 = vpop.xlane.xlu1 %2323 }
 0x44b   :  { %4719 = vrcp.f32 %v2324_v40 }
 0x44e   :  { %v4716_v41 = vpop.eup %4715  ;;  %v2327_v42 = vpop.xlane.xlu0 %2326 }
 0x44f   :  { %4721 = vrcp.f32 %v2327_v42  ;;  %v2330_v4 = vpop.xlane.xlu1 %2329  ;;  %v2349_v60 = vmul.f32 %v4716_v41, %v5731_v24 }
 0x450   :  { %4723 = vrcp.f32 %v2330_v4 }
 0x451   :  { %v4718_v44 = vpop.eup %4717  ;;  %v2357_v47 = vmul.f32 %v2349_v60, %v5815_v43 }
 0x452   :  { %v2333_v48 = vpop.xlane.xlu0 %2332  ;;  %v2348_v49 = vmul.f32 %v4718_v44, %v5736_v26 }
 0x453   :  { %4725 = vrcp.f32 %v2333_v48  ;;  %v2336_v50 = vpop.xlane.xlu1 %2335  ;;  %2390 = vrot.lane.b32.xlu0 %v2357_v47, %s5086_s16  ;;  %2373 = vst.msk [vmem:[#allocation25 + $0x8] sm:$0xff] %vm794_vm4, %v2357_v47 }
 0x454   :  { %4727 = vrcp.f32 %v2336_v50  ;;  %v2356_v2 = vmul.f32 %v2348_v49, %v5815_v43 }
 0x455   :  { %v4720_v8 = vpop.eup %4719 }
 0x456   :  { %v2339_v55 = vpop.xlane.xlu0 %2338  ;;  %2388 = vrot.lane.b32.xlu1 %v2356_v2, %s5086_s16  ;;  %2372 = vst.msk [vmem:[#allocation25] sm:$0xff] %vm794_vm4, %v2356_v2  ;;  %v2350_v24 = vmul.f32 %v4720_v8, %v5742_v36 }
 0x457   :  { %4729 = vrcp.f32 %v2339_v55  ;;  %v2222_v56 = vpop.xlane.xlu1 %2221  ;;  %4679 = vrot.lane.b32.xlu0 %v5675_v61, %s5097_s21 }
 0x458   :  { %4731 = vrcp.f32 %v2222_v56  ;;  %v2358_v26 = vmul.f32 %v2350_v24, %v5815_v43 }
 0x459   :  { %v4722_v3 = vpop.eup %4721 }
 0x45a   :  { %v4724_v6 = vpop.eup %4723  ;;  %v2225_v7 = vpop.xlane.xlu0 %2224  ;;  %v2351_v5 = vmul.f32 %v4722_v3, %v5748_v33  ;;  %2374 = vst.msk [vmem:[#allocation25 + $0x10] sm:$0xff] %vm794_vm4, %v2358_v26 }
 0x45b   :  { %4733 = vrcp.f32 %v2225_v7  ;;  %v2228_v10 = vpop.xlane.xlu1 %2227  ;;  %v2352_v36 = vmul.f32 %v4724_v6, %v5750_v45 }
 0x45c   :  { %4735 = vrcp.f32 %v2228_v10  ;;  %v2359_v13 = vmul.f32 %v2351_v5, %v5815_v43 }
 0x45d   :  { %v4726_v61 = vpop.eup %4725  ;;  %v2360_v15 = vmul.f32 %v2352_v36, %v5831_v12 }
 0x45e   :  { %v4728_v19 = vpop.eup %4727  ;;  %v2231_v20 = vpop.xlane.xlu0 %2230  ;;  %2375 = vst.msk [vmem:[#allocation25 + $0x18] sm:$0xff] %vm794_vm4, %v2359_v13  ;;  %2394 = vrot.lane.b32.xlu1 %v2359_v13, %s5086_s16  ;;  %v2353_v33 = vmul.f32 %v4726_v61, %v5758_v51 }
 0x45f   :  { %4737 = vrcp.f32 %v2231_v20  ;;  %v2234_v9 = vpop.xlane.xlu1 %2233  ;;  %v2354_v16 = vmul.f32 %v4728_v19, %v5760_v59  ;;  %2376 = vst.msk [vmem:[#allocation25 + $0x20] sm:$0xff] %vm794_vm4, %v2360_v15 }
 0x460   :  { %4739 = vrcp.f32 %v2234_v9  ;;  %v2361_v45 = vmul.f32 %v2353_v33, %v5831_v12 }
 0x461   :  { %v4730_v25 = vpop.eup %4729  ;;  %v2362_v21 = vmul.f32 %v2354_v16, %v5831_v12 }
 0x462   :  { %v4732_v27 = vpop.eup %4731  ;;  %v2237_v30 = vpop.xlane.xlu0 %2236  ;;  %2392 = vrot.lane.b32.xlu1 %v2358_v26, %s5086_s16  ;;  %2377 = vst.msk [vmem:[#allocation25 + $0x28] sm:$0xff] %vm794_vm4, %v2361_v45  ;;  %v2355_v51 = vmul.f32 %v4730_v25, %v5768_v11 }
 0x463   :  { %4741 = vrcp.f32 %v2237_v30  ;;  %2400 = vrot.lane.b32.xlu0 %v2362_v21, %s5086_s16  ;;  %2378 = vst.msk [vmem:[#allocation25 + $0x30] sm:$0xff] %vm794_vm4, %v2362_v21  ;;  %v2240_v59 = vpop.xlane.xlu1 %2239  ;;  %v2252_v23 = vmul.f32 %v4732_v27, %v5770_v17 }
 0x464   :  { %4743 = vrcp.f32 %v2240_v59  ;;  %v2363_v34 = vmul.f32 %v2355_v51, %v5831_v12 }
 0x465   :  { %v4734_v35 = vpop.eup %4733  ;;  %v5851_v37 = vmul.f32 %v2252_v23, %v5815_v43 }
 0x466   :  { %v4736_v38 = vpop.eup %4735  ;;  %v2243_v39 = vpop.xlane.xlu0 %2242  ;;  %2398 = vrot.lane.b32.xlu1 %v2361_v45, %s5086_s16  ;;  %2379 = vst.msk [vmem:[#allocation25 + $0x38] sm:$0xff] %vm794_vm4, %v2363_v34  ;;  %v2253_v11 = vmul.f32 %v4734_v35, %v5777_v22 }
 0x467   :  { %4745 = vrcp.f32 %v2243_v39  ;;  %2402 = vrot.lane.b32.xlu0 %v2363_v34, %s5086_s16  ;;  %v5857_v40 = vpop.permute.xlu1 %4654  ;;  %2364 = vst.msk [vmem:[#allocation24] sm:$0xff] %vm794_vm4, %v5851_v37  ;;  %v2254_v17 = vmul.f32 %v4736_v38, %v5779_v18 }
 0x468   :  { %v4657_v41 = vunpack.i.h.bf16 %v5857_v40  ;;  %v4656_v42 = vunpack.i.l.bf16 %v5857_v40  ;;  %v2261_v4 = vmul.f32 %v2253_v11, %v5815_v43 }
 0x469   :  { %v4738_v60 = vpop.eup %4737  ;;  %v5866_v44 = vmul.f32 %v2254_v17, %v5815_v43 }
 0x46a   :  { %v4740_v22 = vpop.eup %4739  ;;  %v4561_v47 = vpack.c.bf16 %v4657_v41, %v4656_v42  ;;  %2396 = vrot.lane.b32.xlu1 %v2360_v15, %s5086_s16  ;;  %2365 = vst.msk [vmem:[#allocation24 + $0x8] sm:$0xff] %vm794_vm4, %v2261_v4  ;;  %v2255_v18 = vmul.f32 %v4738_v60, %v5785_v14 }
 0x46b   :  { %971 = vrot.lane.b32.xlu0 %v5660_v53, %s5097_s21  ;;  %2366 = vst.msk [vmem:[#allocation24 + $0x10] sm:$0xff] %vm794_vm4, %v5866_v44  ;;  %v2256_v48 = vmul.f32 %v4740_v22, %v5787_v29 }
 0x46c   :  { %4562 = vmatpush3.bf16.msra.mxu1 %v4561_v47  ;;  %v2263_v49 = vmul.f32 %v2255_v18, %v5815_v43 }
 0x46d   :  { %v4742_v50 = vpop.eup %4741  ;;  %4566 = vmatprep.subr.bf16.mxu1 %v5100_v54  ;;  %v5881_v2 = vmul.f32 %v2256_v48, %v5831_v12 }
 0x46e   :  { %v4744_v8 = vpop.eup %4743  ;;  %959 = vrot.lane.b32.xlu1 %v5660_v53, %s5095_s10  ;;  %2367 = vst.msk [vmem:[#allocation24 + $0x18] sm:$0xff] %vm794_vm4, %v2263_v49  ;;  %v2257_v14 = vmul.f32 %v4742_v50, %v5793_v31 }
 0x46f   :  { %967 = vrot.lane.b32.xlu0 %v5658_v52, %s5096_s17  ;;  %v2258_v29 = vmul.f32 %v4744_v8, %v5795_v32  ;;  %2368 = vst.msk [vmem:[#allocation24 + $0x20] sm:$0xff] %vm794_vm4, %v5881_v2  ;;  %v5908_v32 = vpop.permute.xlu0 %4659 }
 0x470   :  { %v2265_v43 = vmul.f32 %v2257_v14, %v5831_v12  ;;  %v4662_v5 = vunpack.i.h.bf16 %v5908_v32 }
 0x471   :  { %v4746_v55 = vpop.eup %4745  ;;  %v5894_v24 = vmul.f32 %v2258_v29, %v5831_v12 }
 0x472   :  { %965 = vrot.lane.b32.xlu1 %v5660_v53, %s5096_s17  ;;  %v2259_v56 = vmul.f32 %v4746_v55, %v5801_v28  ;;  %2369 = vst.msk [vmem:[#allocation24 + $0x28] sm:$0xff] %vm794_vm4, %v2265_v43  ;;  %v5912_v28 = vpop.permute.xlu1 %4664  ;;  %v3637_v55 = vld [vmem:[#allocation19 + $0x8] sm:$0xff] }
 0x473   :  { %2370 = vst.msk [vmem:[#allocation24 + $0x30] sm:$0xff] %vm794_vm4, %v5894_v24  ;;  %v5910_v26 = vpop.permute.xlu0 %4669  ;;  %v4667_v6 = vunpack.i.h.bf16 %v5912_v28  ;;  %v4666_v7 = vunpack.i.l.bf16 %v5912_v28  ;;  %v3734_v28 = vld [vmem:[#allocation19 + $0x20] sm:$0xff] }
 0x474   :  { %v2267_v31 = vmul.f32 %v2259_v56, %v5831_v12  ;;  %v4661_v12 = vunpack.i.l.bf16 %v5908_v32  ;;  %v4672_v20 = vunpack.i.h.bf16 %v5910_v26  ;;  %v4671_v33 = vunpack.i.l.bf16 %v5910_v26 }
 0x475   :  { %v4567_v36 = vpack.c.bf16 %v4667_v6, %v4666_v7 }
 0x476   :  { %961 = vrot.lane.b32.xlu1 %v5658_v52, %s5095_s10  ;;  %2371 = vst.msk [vmem:[#allocation24 + $0x38] sm:$0xff] %vm794_vm4, %v2267_v31  ;;  %v4564_v15 = vpack.c.bf16 %v4662_v5, %v4661_v12  ;;  %v4573_v16 = vpack.c.bf16 %v4672_v20, %v4671_v33  ;;  %v3736_v20 = vld [vmem:[#allocation19 + $0x30] sm:$0xff] }
 0x477   :  { %v5914_v3 = vpop.permute.xlu0 %4674 }
 0x478   :  { %v4677_v34 = vunpack.i.h.bf16 %v5914_v3  ;;  %v4676_v35 = vunpack.i.l.bf16 %v5914_v3  ;;  %v3735_v3 = vld [vmem:[#allocation19 + $0x28] sm:$0xff] }
 0x479   :  { %v4617_v6 = vpack.c.bf16 %v3735_v3, %v3734_v28 }
 0x47a   :  { %973 = vrot.lane.b32.xlu1 %v5658_v52, %s5097_s21  ;;  %v4576_v11 = vpack.c.bf16 %v4677_v34, %v4676_v35 }
 0x4c5   :  { %v2391_v10 = vpop.permute.xlu0 %2390 }
 0x4c6   :  { %v5923_v13 = vsel %vm794_vm4, %v2261_v4, %v2391_v10  ;;  %v3639_v10 = vld [vmem:[#allocation19 + $0x18] sm:$0xff] }
 0x4c7   :  { %4363 = vmatmul.mubr.msk.f32.vlgmr.msra.gmra.mrb[22].mxu1 %vm977_vm3, %v5923_v13 }
 0x4c8   :  { %4568 = vmatpush3.bf16.msra.mxu1 %v4567_v36  ;;  %v2389_v61 = vpop.permute.xlu1 %2388  ;;  %4376 = vmatprep.mubr.msk.f32.mxu1 %vm5099_vm2, %v5098_v46 }
 0x4c9   :  { %v2412_v19 = vsel %vm794_vm4, %v5851_v37, %v2389_v61  ;;  %4572 = vmatprep.subr.bf16.mxu1 %v5100_v54  ;;  %v5940_v45 = vpop.permute.xlu0 %4679 }
 0x4ca   :  { %4356 = vmatmul.mubr.msk.f32.vlgmr.msra.gmra.mrb[22].mxu0 %vm977_vm3, %v2412_v19  ;;  %v4682_v27 = vunpack.i.h.bf16 %v5940_v45  ;;  %v4681_v30 = vunpack.i.l.bf16 %v5940_v45 }
 0x4cb   :  { %4565 = vmatpush3.bf16.msra.mxu0 %v4564_v15  ;;  %4369 = vmatprep.mubr.msk.f32.mxu0 %vm5099_vm2, %v5098_v46 }
 0x4cc   :  { %4569 = vmatprep.subr.bf16.mxu0 %v5100_v54  ;;  %v4579_v37 = vpack.c.bf16 %v4682_v27, %v4681_v30 }
 0x4d0   :  { %v2395_v9 = vpop.permute.xlu1 %2394 }
 0x4d1   :  { %v2415_v25 = vsel %vm794_vm4, %v2263_v49, %v2395_v9 }
 0x4d2   :  { %4377 = vmatmul.mubr.msk.f32.vlgmr.msra.gmra.mrb[24].mxu1 %vm977_vm3, %v2415_v25 }
 0x4d3   :  { %4574 = vmatpush3.bf16.msra.mxu1 %v4573_v16  ;;  %4390 = vmatprep.mubr.msk.f32.mxu1 %vm5099_vm2, %v5098_v46 }
 0x4d4   :  { %v2393_v21 = vpop.permute.xlu1 %2392  ;;  %4578 = vmatprep.subr.bf16.mxu1 %v5100_v54 }
 0x4d5   :  { %v2401_v51 = vpop.permute.xlu0 %2400  ;;  %v2414_v59 = vsel %vm794_vm4, %v5866_v44, %v2393_v21 }
 0x4d6   :  { %4370 = vmatmul.mubr.msk.f32.vlgmr.msra.gmra.mrb[24].mxu0 %vm977_vm3, %v2414_v59  ;;  %v2418_v60 = vsel %vm794_vm4, %v5894_v24, %v2401_v51 }
 0x4d7   :  { %4571 = vmatpush3.bf16.msra.mxu0 %v5678_v62  ;;  %4383 = vmatprep.mubr.msk.f32.mxu0 %vm5099_vm2, %v5098_v46 }
 0x4d8   :  { %v2399_v23 = vpop.permute.xlu1 %2398  ;;  %4575 = vmatprep.subr.bf16.mxu0 %v5100_v54 }
 0x4d9   :  { %v2417_v38 = vsel %vm794_vm4, %v2265_v43, %v2399_v23  ;;  %v2403_v39 = vpop.permute.xlu0 %2402  ;;  %v3636_v43 = vld [vmem:[#allocation19] sm:$0xff] }
 0x4da   :  { %4391 = vmatmul.mubr.msk.f32.vlgmr.msra.gmra.mrb[26].mxu1 %vm977_vm3, %v2417_v38  ;;  %v2419_v17 = vsel %vm794_vm4, %v2267_v31, %v2403_v39  ;;  %v4605_v24 = vpack.c.bf16 %v3637_v55, %v3636_v43 }
 0x4db   :  { %4580 = vmatpush3.bf16.msra.mxu1 %v4579_v37  ;;  %4404 = vmatprep.mubr.msk.f32.mxu1 %vm5099_vm2, %v5098_v46 }
 0x4dc   :  { %v2397_v62 = vpop.permute.xlu1 %2396  ;;  %4584 = vmatprep.subr.bf16.mxu1 %v5100_v54 }
 0x4dd   :  { %v2416_v41 = vsel %vm794_vm4, %v5881_v2, %v2397_v62  ;;  %v972_v22 = vpop.permute.xlu0 %971 }
 0x4de   :  { %4384 = vmatmul.mubr.msk.f32.vlgmr.msra.gmra.mrb[26].mxu0 %vm977_vm3, %v2416_v41  ;;  %4405 = vmatmul.mubr.msk.f32.vlgmr.msra.gmra.mrb[28].mxu1 %vm977_vm3, %v2419_v17  ;;  %v4591_v18 = vpack.c.bf16 %v4666_v7, %v972_v22 }
 0x4df   :  { %4577 = vmatpush3.bf16.msra.mxu0 %v4576_v11  ;;  %4397 = vmatprep.mubr.msk.f32.mxu0 %vm5099_vm2, %v5098_v46 }
 0x4e0   :  { %v960_v4 = vpop.permute.xlu1 %959  ;;  %4581 = vmatprep.subr.bf16.mxu0 %v5100_v54  ;;  %4418 = vmatprep.mubr.msk.f32.mxu1 %vm5099_vm2, %v5098_v46 }
 0x4e1   :  { %v4585_v44 = vpack.c.bf16 %v4656_v42, %v960_v4 }
 0x4e2   :  { %4398 = vmatmul.mubr.msk.f32.vlgmr.msra.gmra.mrb[28].mxu0 %vm977_vm3, %v2418_v60 }
 0x4e3   :  { %4583 = vmatpush3.bf16.msra.mxu0 %v4582_v63  ;;  %4586 = vmatpush3.bf16.msra.mxu1 %v4585_v44  ;;  %v968_v63 = vpop.permute.xlu0 %967 }
 0x4e4   :  { %v966_v47 = vpop.permute.xlu1 %965  ;;  %4411 = vmatprep.mubr.msk.f32.mxu0 %vm5099_vm2, %v5098_v46  ;;  %4587 = vmatprep.subr.bf16.mxu0 %v5100_v54  ;;  %v4600_v48 = vpack.c.bf16 %v4676_v35, %v968_v63  ;;  %v184_v63 = vld [vmem:[#allocation4] sm:$0xff] }
 0x4e5   :  { %v4588_v40 = vpack.c.bf16 %v4661_v12, %v966_v47  ;;  %4590 = vmatprep.subr.bf16.mxu1 %v5100_v54  ;;  %v3638_v12 = vld [vmem:[#allocation19 + $0x10] sm:$0xff] }
 0x4e6   :  { %4412 = vmatmul.mubr.msk.f32.vlgmr.msra.gmra.mrb[30].mxu0 %vm977_vm3, %v2412_v19  ;;  %4419 = vmatmul.mubr.msk.f32.vlgmr.msra.gmra.mrb[30].mxu1 %vm977_vm3, %v5923_v13  ;;  %v4611_v36 = vpack.c.bf16 %v3639_v10, %v3638_v12 }
 0x4e7   :  { %4589 = vmatpush3.bf16.msra.mxu0 %v4588_v40  ;;  %4592 = vmatpush3.bf16.msra.mxu1 %v4591_v18 }
 0x4e8   :  { %v962_v53 = vpop.permute.xlu1 %961  ;;  %4425 = vmatprep.mubr.msk.f32.mxu0 %vm5099_vm2, %v5098_v46  ;;  %4432 = vmatprep.mubr.msk.f32.mxu1 %vm5099_vm2, %v5098_v46 }
 0x4e9   :  { %v4597_v58 = vpack.c.bf16 %v4671_v33, %v962_v53  ;;  %4593 = vmatprep.subr.bf16.mxu0 %v5100_v54  ;;  %4596 = vmatprep.subr.bf16.mxu1 %v5100_v54  ;;  %v3737_v33 = vld [vmem:[#allocation19 + $0x38] sm:$0xff] }
 0x4ea   :  { %4426 = vmatmul.mubr.msk.f32.vlgmr.msra.gmra.mrb[32].mxu0 %vm977_vm3, %v2414_v59  ;;  %4433 = vmatmul.mubr.msk.f32.vlgmr.msra.gmra.mrb[32].mxu1 %vm977_vm3, %v2415_v25  ;;  %v4623_v9 = vpack.c.bf16 %v3737_v33, %v3736_v20 }
 0x4eb   :  { %4595 = vmatpush3.bf16.msra.mxu0 %v4594_v1  ;;  %4598 = vmatpush3.bf16.msra.mxu1 %v4597_v58 }
 0x4ec   :  { %v974_v42 = vpop.permute.xlu1 %973  ;;  %4439 = vmatprep.mubr.msk.f32.mxu0 %vm5099_vm2, %v5098_v46  ;;  %4446 = vmatprep.mubr.msk.f32.mxu1 %vm5099_vm2, %v5098_v46 }
 0x4ed   :  { %v4603_v49 = vpack.c.bf16 %v4681_v30, %v974_v42  ;;  %4599 = vmatprep.subr.bf16.mxu0 %v5100_v54  ;;  %4602 = vmatprep.subr.bf16.mxu1 %v5100_v54  ;;  %v186_v42 = vld [vmem:[#allocation7] sm:$0xff] }
 0x4ee   :  { %4440 = vmatmul.mubr.msk.f32.vlgmr.msra.gmra.mrb[34].mxu0 %vm977_vm3, %v2416_v41  ;;  %4447 = vmatmul.mubr.msk.f32.vlgmr.msra.gmra.mrb[34].mxu1 %vm977_vm3, %v2417_v38 }
 0x4ef   :  { %4601 = vmatpush3.bf16.msra.mxu0 %v4600_v48  ;;  %4604 = vmatpush3.bf16.msra.mxu1 %v4603_v49 }
 0x4f0   :  { %4453 = vmatprep.mubr.msk.f32.mxu0 %vm5099_vm2, %v5098_v46  ;;  %4460 = vmatprep.mubr.msk.f32.mxu1 %vm5099_vm2, %v5098_v46 }
 0x4f1   :  { %4607 = vmatprep.subr.msk.bf16.mxu0 %vm5374_vm1, %v4605_v24  ;;  %4619 = vmatprep.subr.msk.bf16.mxu1 %vm5374_vm1, %v4617_v6 }
 0x4f2   :  { %4454 = vmatmul.mubr.msk.f32.vlgmr.msra.gmra.mrb[36].mxu0 %vm977_vm3, %v2418_v60  ;;  %4461 = vmatmul.mubr.msk.f32.vlgmr.msra.gmra.mrb[36].mxu1 %vm977_vm3, %v2419_v17 }
 0x4f8   :  { %4610 = vmatpush3.bf16.xpose.msk.msra.mxu0 %vm5374_vm1, %v4605_v24  ;;  %4622 = vmatpush3.bf16.xpose.msk.msra.mxu1 %vm5374_vm1, %v4617_v6 }
 0x4f9   :  { %4613 = vmatprep.subr.msk.bf16.mxu0 %vm5374_vm1, %v4611_v36  ;;  %4625 = vmatprep.subr.msk.bf16.mxu1 %vm5374_vm1, %v4623_v9 }
 0x500   :  { %4616 = vmatpush3.bf16.xpose.msk.msra.mxu0 %vm5374_vm1, %v4611_v36  ;;  %4628 = vmatpush3.bf16.xpose.msk.msra.mxu1 %vm5374_vm1, %v4623_v9 }
 0x59a   :  { %v2562_v52 = vpop.f32.mrb[22].mxu1 }
 0x59b   :  { %3570 = vrot.lane.b32.xlu1 %v2562_v52, %s5086_s16  ;;  %v4364_v54 = vpop.f32.mrb[23].mxu1 }
 0x59d   :  { %v2489_v57 = vpop.f32.mrb[22].mxu0 }
 0x59e   :  { %3564 = vst.msk [vmem:[#allocation2] sm:$0xff] %vm794_vm4, %v2489_v57  ;;  %v4357_v1 = vpop.f32.mrb[23].mxu0 }
 0x59f   :  { %v4755_v1 = vld [vmem:[#allocation7 + $0x8] sm:$0xff] }
 0x5a5   :  { %v2708_v50 = vpop.f32.mrb[24].mxu1 }
 0x5a6   :  { %3612 = vrot.lane.b32.xlu1 %v2708_v50, %s5101_s5  ;;  %v4378_v2 = vpop.f32.mrb[25].mxu1 }
 0x5a9   :  { %v2635_v8 = vpop.f32.mrb[24].mxu0 }
 0x5aa   :  { %3591 = vrot.lane.b32.xlu1 %v2635_v8, %s5102_s3  ;;  %v4371_v46 = vpop.f32.mrb[25].mxu0 }
 0x5ad   :  { %v2854_v14 = vpop.f32.mrb[26].mxu1 }
 0x5ae   :  { %3572 = vrot.lane.b32.xlu0 %v2854_v14, %s5086_s16  ;;  %v4392_v29 = vpop.f32.mrb[27].mxu1  ;;  %v4756_v14 = vld [vmem:[#allocation4 + $0x8] sm:$0xff] }
 0x5b1   :  { %v2781_v56 = vpop.f32.mrb[26].mxu0  ;;  %v3000_v31 = vpop.f32.mrb[28].mxu1 }
 0x5b2   :  { %3565 = vst.msk [vmem:[#allocation2 + $0x8] sm:$0xff] %vm794_vm4, %v2781_v56  ;;  %v4385_v32 = vpop.f32.mrb[27].mxu0  ;;  %v4406_v26 = vpop.f32.mrb[29].mxu1 }
 0x5b5   :  { %v2927_v7 = vpop.f32.mrb[28].mxu0 }
 0x5b6   :  { %3593 = vrot.lane.b32.xlu0 %v2927_v7, %s5102_s3  ;;  %v4399_v5 = vpop.f32.mrb[29].mxu0 }
 0x5b9   :  { %v3070_v13 = vpop.f32.mrb[30].mxu0  ;;  %v3140_v61 = vpop.f32.mrb[30].mxu1 }
 0x5ba   :  { %3566 = vst.msk [vmem:[#allocation3] sm:$0xff] %vm794_vm4, %v3070_v13  ;;  %v4420_v15 = vpop.f32.mrb[31].mxu1  ;;  %3581 = vrot.lane.b32.xlu0 %v3140_v61, %s5086_s16  ;;  %v4413_v19 = vpop.f32.mrb[31].mxu0 }
 0x5bd   :  { %v3210_v16 = vpop.f32.mrb[32].mxu0  ;;  %v3280_v45 = vpop.f32.mrb[32].mxu1 }
 0x5be   :  { %v4434_v25 = vpop.f32.mrb[33].mxu1  ;;  %3623 = vrot.lane.b32.xlu1 %v3280_v45, %s5101_s5  ;;  %v4427_v21 = vpop.f32.mrb[33].mxu0 }
 0x5c1   :  { %v3350_v27 = vpop.f32.mrb[34].mxu0  ;;  %v3420_v30 = vpop.f32.mrb[34].mxu1 }
 0x5c2   :  { %3567 = vst.msk [vmem:[#allocation3 + $0x8] sm:$0xff] %vm794_vm4, %v3350_v27  ;;  %v4448_v51 = vpop.f32.mrb[35].mxu1  ;;  %3583 = vrot.lane.b32.xlu0 %v3420_v30, %s5086_s16  ;;  %3602 = vrot.lane.b32.xlu1 %v3210_v16, %s5102_s3  ;;  %v4441_v59 = vpop.f32.mrb[35].mxu0 }
 0x5c5   :  { %v3490_v23 = vpop.f32.mrb[36].mxu0  ;;  %v3560_v34 = vpop.f32.mrb[36].mxu1 }
 0x5c6   :  { %v4462_v35 = vpop.f32.mrb[37].mxu1  ;;  %3614 = vrot.lane.b32.xlu1 %v3000_v31, %s5101_s5  ;;  %3604 = vrot.lane.b32.xlu0 %v3490_v23, %s5102_s3  ;;  %v4455_v37 = vpop.f32.mrb[37].mxu0 }
 0x5ca   :  { %3625 = vrot.lane.b32.xlu0 %v3560_v34, %s5101_s5 }
 0x60d   :  { %v3571_v0 = vpop.permute.xlu1 %3570 }
 0x60e   :  { %3577 = vst.msk [vmem:[#allocation2] sm:$0xff] %vm3576_vm5, %v3571_v0 }
 0x618   :  { %v3613_v38 = vpop.permute.xlu1 %3612 }
 0x61c   :  { %v3592_v39 = vpop.permute.xlu1 %3591 }
 0x61d   :  { %3598 = vst.msk [vmem:[#allocation2] sm:$0xff] %vm3597_vm6, %v3592_v39 }
 0x61e   :  { %3619 = vst.msk [vmem:[#allocation2] sm:$0xff] %vm3618_vm7, %v3613_v38 }
 0x620   :  { %v3573_v62 = vpop.permute.xlu0 %3572 }
 0x621   :  { %3578 = vst.msk [vmem:[#allocation2 + $0x8] sm:$0xff] %vm3576_vm5, %v3573_v62 }
 0x625   :  { %v3631_v11 = vld [vmem:[#allocation2] sm:$0xff] }
 0x626   :  { %4471 = vmatprep.mubr.msk.f32.mxu0 %vm200_vm0, %v3631_v11 }
 0x628   :  { %v3594_v17 = vpop.permute.xlu0 %3593 }
 0x629   :  { %3599 = vst.msk [vmem:[#allocation2 + $0x8] sm:$0xff] %vm3597_vm6, %v3594_v17 }
 0x62c   :  { %v3582_v41 = vpop.permute.xlu0 %3581 }
 0x62d   :  { %3587 = vst.msk [vmem:[#allocation3] sm:$0xff] %vm3576_vm5, %v3582_v41 }
 0x630   :  { %v3624_v4 = vpop.permute.xlu1 %3623 }
 0x634   :  { %v3584_v60 = vpop.permute.xlu0 %3583  ;;  %v3603_v44 = vpop.permute.xlu1 %3602 }
 0x635   :  { %3588 = vst.msk [vmem:[#allocation3 + $0x8] sm:$0xff] %vm3576_vm5, %v3584_v60 }
 0x636   :  { %3608 = vst.msk [vmem:[#allocation3] sm:$0xff] %vm3597_vm6, %v3603_v44 }
 0x637   :  { %3629 = vst.msk [vmem:[#allocation3] sm:$0xff] %vm3618_vm7, %v3624_v4 }
 0x638   :  { %v3615_v22 = vpop.permute.xlu1 %3614  ;;  %v3605_v47 = vpop.permute.xlu0 %3604 }
 0x639   :  { %3620 = vst.msk [vmem:[#allocation2 + $0x8] sm:$0xff] %vm3618_vm7, %v3615_v22 }
 0x63a   :  { %3609 = vst.msk [vmem:[#allocation3 + $0x8] sm:$0xff] %vm3597_vm6, %v3605_v47 }
 0x63c   :  { %v3626_v18 = vpop.permute.xlu0 %3625 }
 0x63d   :  { %3630 = vst.msk [vmem:[#allocation3 + $0x8] sm:$0xff] %vm3618_vm7, %v3626_v18 }
 0x63e   :  { %v3633_v40 = vld [vmem:[#allocation3] sm:$0xff] }
 0x63f   :  { %4482 = vmatprep.mubr.msk.f32.mxu1 %vm200_vm0, %v3633_v40 }
 0x640   :  { %v3632_v53 = vld [vmem:[#allocation2 + $0x8] sm:$0xff] }
 0x641   :  { %4472 = vmatmul.mubr.msk.f32.vlgmr.msra.gmra.mrb[38].mxu0 %vm200_vm0, %v3632_v53 }
 0x642   :  { %4213 = vmatprep.mubr.msk.f32.mxu0 %vm200_vm0, %v184_v63 }
 0x643   :  { %4224 = vmatprep.mubr.msk.f32.mxu0 %vm200_vm0, %v186_v42 }
 0x644   :  { %v3634_v58 = vld [vmem:[#allocation3 + $0x8] sm:$0xff] }
 0x645   :  { %4483 = vmatmul.mubr.msk.f32.vlgmr.msra.gmra.mrb[38].mxu1 %vm200_vm0, %v3634_v58 }
 0x714   :  { %v4473_v48 = vpop.f32.mrb[38].mxu0 }
 0x715   :  { %v3724_v49 = vpop.f32.mrb[39].mxu0  ;;  %v3730_v29 = vadd.f32 %v4756_v14, %v4473_v48 }
 0x716   :  { %v3725_v52 = vadd.f32 %v3724_v49, %v184_v63 }
 0x717   :  { %v3834_v55 = vsel %vm200_vm0, %v3730_v29, 0.0 }
 0x718   :  { %v4484_v54 = vpop.f32.mrb[38].mxu1  ;;  %v3831_v57 = vsel %vm200_vm0, %v3725_v52, 0.0 }
 0x719   :  { %v3828_v50 = vadd.f32 %v4755_v1, %v4484_v54  ;;  %v3822_v2 = vpop.f32.mrb[39].mxu1  ;;  %3832 = vadd.xlane.f32.xlu0 %v3831_v57 }
 0x71a   :  { %v3823_v8 = vadd.f32 %v3822_v2, %v186_v42 }
 0x71b   :  { %v3875_v46 = vsel %vm200_vm0, %v3828_v50, 0.0 }
 0x71c   :  { %3876 = vadd.xlane.f32.xlu1 %v3875_v46  ;;  %v3872_v43 = vsel %vm200_vm0, %v3823_v8, 0.0 }
 0x71d   :  { %3873 = vadd.xlane.f32.xlu0 %v3872_v43 }
 0x721   :  { %3835 = vadd.xlane.f32.xlu0 %v3834_v55 }
 0x7a6   :  { %v3833_v24 = vpop.xlane.xlu0 %3832 }
 0x7a7   :  { %v3838_v56 = vmul.f32 0.03125, %v3833_v24 }
 0x7a9   :  { %v3877_v31 = vpop.xlane.xlu1 %3876  ;;  %v6071_v6 = vsub.f32 %v3725_v52, %v3838_v56 }
 0x7aa   :  { %v3879_v32 = vmul.f32 0.03125, %v3877_v31  ;;  %v3874_v26 = vpop.xlane.xlu0 %3873 }
 0x7ab   :  { %v3878_v28 = vmul.f32 0.03125, %v3874_v26  ;;  %v3842_v19 = vmul.f32 %v6071_v6, %v6071_v6 }
 0x7ac   :  { %v3881_v3 = vsub.f32 %v3828_v50, %v3879_v32 }
 0x7ad   :  { %v3880_v7 = vsub.f32 %v3823_v8, %v3878_v28  ;;  %v3844_v33 = vsel %vm200_vm0, %v3842_v19, 0.0 }
 0x7ae   :  { %v3836_v5 = vpop.xlane.xlu0 %3835  ;;  %v3883_v12 = vmul.f32 %v3881_v3, %v3881_v3 }
 0x7af   :  { %v3839_v10 = vmul.f32 0.03125, %v3836_v5  ;;  %v3882_v36 = vmul.f32 %v3880_v7, %v3880_v7 }
 0x7b0   :  { %v3887_v13 = vsel %vm200_vm0, %v3883_v12, 0.0 }
 0x7b1   :  { %v6074_v61 = vsub.f32 %v3730_v29, %v3839_v10  ;;  %3888 = vadd.xlane.f32.xlu0 %v3887_v13  ;;  %v3884_v15 = vsel %vm200_vm0, %v3882_v36, 0.0 }
 0x7b2   :  { %3885 = vadd.xlane.f32.xlu1 %v3884_v15 }
 0x7b3   :  { %v3843_v20 = vmul.f32 %v6074_v61, %v6074_v61 }
 0x7b5   :  { %v3847_v9 = vsel %vm200_vm0, %v3843_v20, 0.0 }
 0x7b6   :  { %3845 = vadd.xlane.f32.xlu1 %v3844_v33  ;;  %3848 = vadd.xlane.f32.xlu0 %v3847_v9 }
 0x7b7   :  { %4988 = shalt.err (!%p4985_p0)
}
 0x7b8   :  { %s4989_s0 = scalar_lea.hbm %s6177_s15, 1024 }
 0x7b9   :  { %p4990_p1 = scmp.ne.s32.totalorder %s6177_s15, %s4989_s0  ;;  %p4993_p2 = scmp.lt.u32.totalorder %s4989_s0, %s6177_s15 }
 0x7bb   :  { %p4995_p3 = pnand %p4993_p2, %p4990_p1 }
 0x7bd   :  { %4998 = shalt.err (!%p4995_p3)
}
 0x7be   :  { %3959 = dma.vmem_to_hbm [thread:$0]  %s3954_s19, 1024, %s6177_s15, [#allocation26], %s5085_s30, %s5085_s30, %s5086_s16   ;;  %v3858_v27 = vlaneseq }
 0x7bf   :  { %v3635_v62 = vld [vmem:[%s6173_s11] sm:$0xf]  ;;  %s5104_s9 = smov [#allocation22]   ;;  %s5105_s10 = smov [#allocation24]  }
 0x7c0   :  { %v3859_v37 = vshrl.u32 %v3858_v27, 7  ;;  %s3929_s25 = sshll.u32 %s5104_s9, 4  ;;  %s3941_s26 = sshll.u32 %s5105_s10, 4  ;;  %s3930_s25 = int_to_ptr.vmem [resolvable:$true] %s3929_s25  ;;  %s6104_s26 = int_to_ptr.vmem [resolvable:$true] %s3941_s26 }
 0x7c1   :  { %s5106_s11 = smov [#allocation21]   ;;  %s4999_s17 = scalar_lea.vmem %s3930_s25, 256 }
 0x7c2   :  { %v3900_v39 = vsub.s32 2, %v3859_v37  ;;  %v3906_v11 = vsub.s32 3, %v3859_v37  ;;  %v3860_v4 = vsub.s32 0, %v3859_v37  ;;  %v3866_v18 = vsub.s32 1, %v3859_v37  ;;  %s6107_s6 = sshll.u32 %s5106_s11, 4  ;;  %p5000_p4 = scmp.ne.s32.totalorder %s3930_s25, %s4999_s17  ;;  %s3918_s6 = int_to_ptr.vmem [resolvable:$true] %s6107_s6 }
 0x7c3   :  { %p5004_p5 = scmp.lt.s32.totalorder %s3930_s25, %s3930_s25  ;;  %p5005_p6 = scmp.lt.s32.totalorder %s4999_s17, %s4999_s17 }
 0x7c4   :  { %v3901_v17 = vrot.slane %v3635_v62, %v3900_v39  ;;  %v3907_v22 = vrot.slane %v3635_v62, %v3906_v11  ;;  %v3861_v58 = vrot.slane %v3635_v62, %v3860_v4  ;;  %v3867_v54 = vrot.slane %v3635_v62, %v3866_v18 }
 0x7c5   :  { %p5006_p7 = por %p5005_p6, %p5004_p5 }
 0x7c7   :  { %p5007_p8 = pnand %p5006_p7, %p5000_p4 }
 0x83e   :  { %v3889_v16 = vpop.xlane.xlu0 %3888 }
 0x83f   :  { %v3891_v45 = vmul.f32 0.03125, %v3889_v16  ;;  %v3886_v25 = vpop.xlane.xlu1 %3885 }
 0x840   :  { %v3890_v21 = vmul.f32 0.03125, %v3886_v25 }
 0x841   :  { %v3893_v30 = vadd.f32 1e-06, %v3891_v45 }
 0x842   :  { %v3892_v51 = vadd.f32 1e-06, %v3890_v21 }
 0x843   :  { %4747 = vrsqrt.f32 %v3893_v30  ;;  %v3846_v59 = vpop.xlane.xlu1 %3845  ;;  %v3849_v23 = vpop.xlane.xlu0 %3848 }
 0x844   :  { %4749 = vrsqrt.f32 %v3892_v51  ;;  %v3850_v34 = vmul.f32 0.03125, %v3846_v59  ;;  %v3851_v35 = vmul.f32 0.03125, %v3849_v23 }
 0x846   :  { %v3852_v0 = vadd.f32 1e-06, %v3850_v34  ;;  %v3853_v38 = vadd.f32 1e-06, %v3851_v35 }
 0x848   :  { %4751 = vrsqrt.f32 %v3852_v0 }
 0x849   :  { %4753 = vrsqrt.f32 %v3853_v38 }
 0x84d   :  { %v4748_v41 = vpop.eup %4747 }
 0x84e   :  { %v4750_v60 = vpop.eup %4749  ;;  %v3897_v44 = vmul.f32 %v4748_v41, %v3881_v3 }
 0x84f   :  { %v3896_v47 = vmul.f32 %v4750_v60, %v3880_v7 }
 0x850   :  { %v3903_v40 = vmul.f32 %v3901_v17, %v3897_v44 }
 0x851   :  { %v3902_v53 = vmul.f32 %v3901_v17, %v3896_v47 }
 0x852   :  { %v4752_v63 = vpop.eup %4751  ;;  %v3909_v42 = vadd.f32 %v3907_v22, %v3903_v40 }
 0x853   :  { %v4754_v48 = vpop.eup %4753  ;;  %v3856_v49 = vmul.f32 %v4752_v63, %v6071_v6  ;;  %v3908_v52 = vadd.f32 %v3907_v22, %v3902_v53 }
 0x854   :  { %v3857_v57 = vmul.f32 %v4754_v48, %v6074_v61  ;;  %3911 = vst.msk [vmem:[#allocation22 + $0x8] sm:$0xff] %vm200_vm0, %v3909_v42 }
 0x855   :  { %3910 = vst.msk [vmem:[#allocation22] sm:$0xff] %vm200_vm0, %v3908_v52  ;;  %v3862_v1 = vmul.f32 %v3861_v58, %v3856_v49 }
 0x856   :  { %5010 = shalt.err (!%p5007_p8)
}
 0x857   :  { %s5011_s21 = scalar_lea.hbm %s6175_s13, 256 }
 0x858   :  { %p5012_p9 = scmp.ne.s32.totalorder %s6175_s13, %s5011_s21  ;;  %p5015_p10 = scmp.lt.u32.totalorder %s5011_s21, %s6175_s13 }
 0x85a   :  { %p5017_p11 = pnand %p5015_p10, %p5012_p9 }
 0x85c   :  { %5020 = shalt.err (!%p5017_p11)
}
 0x85d   :  { %3935 = dma.vmem_to_hbm [thread:$0]  %s3930_s25, 256, %s6175_s13, [#allocation23], %s5085_s30, %s5085_s30, %s5086_s16   ;;  %v3863_v50 = vmul.f32 %v3861_v58, %v3857_v57  ;;  %v3868_v2 = vadd.f32 %v3867_v54, %v3862_v1 }
 0x85e   :  { %s5021_s29 = scalar_lea.vmem %s6104_s26, 1024  ;;  %p5026_p13 = scmp.lt.s32.totalorder %s6104_s26, %s6104_s26 }
 0x85f   :  { %p5022_p12 = scmp.ne.s32.totalorder %s6104_s26, %s5021_s29  ;;  %p5027_p0 = scmp.lt.s32.totalorder %s5021_s29, %s5021_s29 }
 0x861   :  { %p5028_p1 = por %p5027_p0, %p5026_p13 }
 0x863   :  { %p5029_p2 = pnand %p5028_p1, %p5022_p12 }
 0x865   :  { %5032 = shalt.err (!%p5029_p2)
}
 0x866   :  { %s5033_s18 = scalar_lea.hbm %s6176_s14, 1024 }
 0x867   :  { %p5034_p3 = scmp.ne.s32.totalorder %s6176_s14, %s5033_s18  ;;  %p5037_p4 = scmp.lt.u32.totalorder %s5033_s18, %s6176_s14 }
 0x869   :  { %p5039_p5 = pnand %p5037_p4, %p5034_p3 }
 0x86b   :  { %5042 = shalt.err (!%p5039_p5)
}
 0x86c   :  { %3947 = dma.vmem_to_hbm [thread:$0]  %s6104_s26, 1024, %s6176_s14, [#allocation23], %s5085_s30, %s5085_s30, %s5086_s16   ;;  %v3869_v8 = vadd.f32 %v3867_v54, %v3863_v50  ;;  %3870 = vst.msk [vmem:[#allocation21] sm:$0xff] %vm200_vm0, %v3868_v2 }
 0x86d   :  { %s5043_s20 = scalar_lea.vmem %s3918_s6, 256  ;;  %p5048_p7 = scmp.lt.s32.totalorder %s3918_s6, %s3918_s6 }
 0x86e   :  { %3871 = vst.msk [vmem:[#allocation21 + $0x8] sm:$0xff] %vm200_vm0, %v3869_v8  ;;  %p5044_p6 = scmp.ne.s32.totalorder %s3918_s6, %s5043_s20  ;;  %p5049_p8 = scmp.lt.s32.totalorder %s5043_s20, %s5043_s20 }
 0x870   :  { %p5050_p9 = por %p5049_p8, %p5048_p7 }
 0x872   :  { %p5051_p10 = pnand %p5050_p9, %p5044_p6 }
 0x874   :  { %5054 = shalt.err (!%p5051_p10)
}
 0x875   :  { %s5055_s10 = scalar_lea.hbm %s6174_s12, 256 }
 0x876   :  { %p5056_p11 = scmp.ne.s32.totalorder %s6174_s12, %s5055_s10  ;;  %p5059_p12 = scmp.lt.u32.totalorder %s5055_s10, %s6174_s12 }
 0x878   :  { %p5061_p13 = pnand %p5059_p12, %p5056_p11 }
 0x87a   :  { %5064 = shalt.err (!%p5061_p13)
}
 0x87b   :  { %3923 = dma.vmem_to_hbm [thread:$0]  %s3918_s6, 256, %s6174_s12, [#allocation6], %s5085_s30, %s5085_s30, %s5086_s16  }
 0x87c   :  { %5077 = dma.done.wait [#allocation6], 256  }
 0x87d   :  { %5078 = vsyncadd [#allocation6], 4294967040 }
 0x87e   :  { %5079 = dma.done.wait [#allocation23], 1280  }
 0x87f   :  { %5080 = vsyncadd [#allocation23], 4294966016 }
 0x880   :  { %5081 = dma.done.wait [#allocation26], 1024  }
 0x881   :  { %5082 = vsyncadd [#allocation26], 4294966272 }
 0x882   :  { %3972 = vsyncpa [#allocation5], 1 }
 0x883   :  { %3973 = vsyncpa [#allocation8], 1 }
 0x884   :  { %3974 = vsyncpa [#allocation11], 1 }
 0x885   :  { %3975 = vsyncpa [#allocation14], 1 }
 0x886   :  { %3976 = vsyncpa [#allocation17], 1 }
 0x887   :  { %3977 = vsyncpa [#allocation20], 1 }
 0x888   :  { %3978 = vsyncpa [#allocation6], 1 }
 0x889   :  { %3979 = vsyncpa [#allocation23], 1 }
 0x88a   :  { %3980 = vsyncpa [#allocation26], 1 }

// kernel: tpu_custom_call.1
= control target key start
LH: loop header
LB: loop body
LE: loop exit
PB: predicated region body
PF: predicated region fallthrough
CT: control target
= control target key end

     0   :  { %21 = vsyncpa [#allocation5], 0  ;;  %s6162_s0 = inlined_call_operand.hbm [shape: f32[2,8,32], index: 0, kind: input, shape index: {}]   ;;  %s6163_s1 = inlined_call_operand.hbm [shape: f32[2,8,32], index: 1, kind: input, shape index: {}]   ;;  %s6164_s2 = inlined_call_operand.hbm [shape: f32[2,8,32], index: 2, kind: input, shape index: {}]   ;;  %s6165_s3 = inlined_call_operand.hbm [shape: f32[2,8,32], index: 3, kind: input, shape index: {}]   ;;  %s6166_s4 = inlined_call_operand.hbm [shape: f32[2,8,32], index: 4, kind: input, shape index: {}]   ;;  %s6167_s5 = inlined_call_operand.vmem [shape: f32[2,8,32], index: 5, kind: input, shape index: {}]   ;;  %s6168_s6 = inlined_call_operand.hbm [shape: f32[2,8,8], index: 6, kind: input, shape index: {}]   ;;  %s6169_s7 = inlined_call_operand.hbm [shape: f32[2,32,32], index: 7, kind: input, shape index: {}]   ;;  %s6170_s8 = inlined_call_operand.hbm [shape: f32[2,32,32], index: 8, kind: input, shape index: {}]   ;;  %s6171_s9 = inlined_call_operand.hbm [shape: f32[2,32,32], index: 9, kind: input, shape index: {}]   ;;  %s6172_s10 = inlined_call_operand.hbm [shape: f32[2,32,32], index: 10, kind: input, shape index: {}]   ;;  %s6173_s11 = inlined_call_operand.vmem [shape: f32[4,32], index: 11, kind: input, shape index: {}]   ;;  %s6174_s12 = inlined_call_operand.hbm [shape: f32[2,8,32], index: 12, kind: output, shape index: {0}]   ;;  %s6175_s13 = inlined_call_operand.hbm [shape: f32[2,8,32], index: 13, kind: output, shape index: {1}]   ;;  %s6176_s14 = inlined_call_operand.hbm [shape: f32[2,4,8,8], index: 14, kind: output, shape index: {2}]   ;;  %s6177_s15 = inlined_call_operand.hbm [shape: f32[2,4,8,8], index: 15, kind: output, shape index: {3}]  }
   0x1   :  { %22 = vsyncpa [#allocation8], 0 }
   0x2   :  { %23 = vsyncpa [#allocation11], 0 }
   0x3   :  { %24 = vsyncpa [#allocation14], 0 }
   0x4   :  { %25 = vsyncpa [#allocation17], 0 }
   0x5   :  { %26 = vsyncpa [#allocation20], 0 }
   0x6   :  { %27 = vsyncpa [#allocation6], 0 }
   0x7   :  { %28 = vsyncpa [#allocation23], 0 }
   0x8   :  { %29 = vsyncpa [#allocation26], 0  ;;  %s5083_s18 = smov [#allocation7]   ;;  %s5084_s20 = smov [#allocation10]  }
   0x9   :  { %s47_s19 = sshll.u32 %s5083_s18, 4  ;;  %s71_s21 = sshll.u32 %s5084_s20, 4  ;;  %s48_s19 = int_to_ptr.vmem [resolvable:$true] %s47_s19  ;;  %s5187_s21 = int_to_ptr.vmem [resolvable:$true] %s71_s21 }
   0xa   :  { %s4757_s24 = scalar_lea.hbm %s6163_s1, 256 }
   0xb   :  { %p4758_p0 = scmp.ne.s32.totalorder %s6163_s1, %s4757_s24  ;;  %p4761_p1 = scmp.lt.u32.totalorder %s4757_s24, %s6163_s1 }
   0xd   :  { %p4763_p2 = pnand %p4761_p1, %p4758_p0 }
   0xf   :  { %4766 = shalt.err (!%p4763_p2)
}
  0x10   :  { %s4767_s29 = scalar_lea.vmem %s48_s19, 256  ;;  %p4772_p4 = scmp.lt.s32.totalorder %s48_s19, %s48_s19 }
  0x11   :  { %p4768_p3 = scmp.ne.s32.totalorder %s48_s19, %s4767_s29  ;;  %p4773_p5 = scmp.lt.s32.totalorder %s4767_s29, %s4767_s29 }
  0x13   :  { %p4774_p6 = por %p4773_p5, %p4772_p4 }
  0x15   :  { %p4775_p7 = pnand %p4774_p6, %p4768_p3 }
  0x17   :  { %4778 = shalt.err (!%p4775_p7)
}
  0x18   :  { %s5085_s30 = smov 128   ;;  %s5086_s16 = smov 8  }
  0x19   :  { %53 = dma.hbm_to_vmem [thread:$0]  %s6163_s1, 256, %s48_s19, [#allocation8], %s5085_s30, %s5085_s30, %s5086_s16  }
  0x1a   :  { %s4779_s23 = scalar_lea.hbm %s6165_s3, 256 }
  0x1b   :  { %p4780_p8 = scmp.ne.s32.totalorder %s6165_s3, %s4779_s23  ;;  %p4783_p9 = scmp.lt.u32.totalorder %s4779_s23, %s6165_s3 }
  0x1d   :  { %p4785_p10 = pnand %p4783_p9, %p4780_p8 }
  0x1f   :  { %4788 = shalt.err (!%p4785_p10)
}
  0x20   :  { %s4789_s28 = scalar_lea.vmem %s5187_s21, 256  ;;  %p4794_p12 = scmp.lt.s32.totalorder %s5187_s21, %s5187_s21 }
  0x21   :  { %p4790_p11 = scmp.ne.s32.totalorder %s5187_s21, %s4789_s28  ;;  %p4795_p13 = scmp.lt.s32.totalorder %s4789_s28, %s4789_s28 }
  0x23   :  { %p4796_p0 = por %p4795_p13, %p4794_p12 }
  0x25   :  { %p4797_p1 = pnand %p4796_p0, %p4790_p11 }
  0x27   :  { %4800 = shalt.err (!%p4797_p1)
}
  0x28   :  { %77 = dma.hbm_to_vmem [thread:$0]  %s6165_s3, 256, %s5187_s21, [#allocation11], %s5085_s30, %s5085_s30, %s5086_s16  }
  0x29   :  { %s5087_s29 = smov [#allocation13]   ;;  %s5088_s18 = smov [#allocation16]  }
  0x2a   :  { %s97_s17 = sshll.u32 %s5087_s29, 4  ;;  %s121_s20 = sshll.u32 %s5088_s18, 4  ;;  %s98_s17 = int_to_ptr.vmem [resolvable:$true] %s97_s17  ;;  %s5224_s20 = int_to_ptr.vmem [resolvable:$true] %s121_s20 }
  0x2b   :  { %s4801_s24 = scalar_lea.hbm %s6168_s6, 256 }
  0x2c   :  { %p4802_p2 = scmp.ne.s32.totalorder %s6168_s6, %s4801_s24  ;;  %p4805_p3 = scmp.lt.u32.totalorder %s4801_s24, %s6168_s6 }
  0x2e   :  { %p4807_p4 = pnand %p4805_p3, %p4802_p2 }
  0x30   :  { %4810 = shalt.err (!%p4807_p4)
}
  0x31   :  { %s4811_s3 = scalar_lea.vmem %s98_s17, 256  ;;  %p4816_p6 = scmp.lt.s32.totalorder %s98_s17, %s98_s17 }
  0x32   :  { %p4812_p5 = scmp.ne.s32.totalorder %s98_s17, %s4811_s3  ;;  %p4817_p7 = scmp.lt.s32.totalorder %s4811_s3, %s4811_s3 }
  0x34   :  { %p4818_p8 = por %p4817_p7, %p4816_p6 }
  0x36   :  { %p4819_p9 = pnand %p4818_p8, %p4812_p5 }
  0x38   :  { %4822 = shalt.err (!%p4819_p9)
}
  0x39   :  { %103 = dma.hbm_to_vmem [thread:$0]  %s6168_s6, 256, %s98_s17, [#allocation14], %s5085_s30, %s5085_s30, %s5086_s16  }
  0x3a   :  { %s4823_s18 = scalar_lea.hbm %s6170_s8, 1024 }
  0x3b   :  { %p4824_p10 = scmp.ne.s32.totalorder %s6170_s8, %s4823_s18  ;;  %p4827_p11 = scmp.lt.u32.totalorder %s4823_s18, %s6170_s8 }
  0x3d   :  { %p4829_p12 = pnand %p4827_p11, %p4824_p10 }
  0x3f   :  { %4832 = shalt.err (!%p4829_p12)
}
  0x40   :  { %s4833_s26 = scalar_lea.vmem %s5224_s20, 1024  ;;  %p4838_p0 = scmp.lt.s32.totalorder %s5224_s20, %s5224_s20 }
  0x41   :  { %p4834_p13 = scmp.ne.s32.totalorder %s5224_s20, %s4833_s26  ;;  %p4839_p1 = scmp.lt.s32.totalorder %s4833_s26, %s4833_s26 }
  0x43   :  { %p4840_p2 = por %p4839_p1, %p4838_p0 }
  0x45   :  { %p4841_p3 = pnand %p4840_p2, %p4834_p13 }
  0x47   :  { %4844 = shalt.err (!%p4841_p3)
}
  0x48   :  { %127 = dma.hbm_to_vmem [thread:$0]  %s6170_s8, 1024, %s5224_s20, [#allocation17], %s5085_s30, %s5085_s30, %s5086_s16  }
  0x49   :  { %s5089_s27 = smov [#allocation4]   ;;  %s5090_s3 = smov [#allocation9]  }
  0x4a   :  { %s35_s28 = sshll.u32 %s5089_s27, 4  ;;  %s59_s21 = sshll.u32 %s5090_s3, 4  ;;  %s36_s28 = int_to_ptr.vmem [resolvable:$true] %s35_s28  ;;  %s5261_s21 = int_to_ptr.vmem [resolvable:$true] %s59_s21 }
  0x4b   :  { %s4845_s29 = scalar_lea.hbm %s6162_s0, 256 }
  0x4c   :  { %p4846_p4 = scmp.ne.s32.totalorder %s6162_s0, %s4845_s29  ;;  %p4849_p5 = scmp.lt.u32.totalorder %s4845_s29, %s6162_s0 }
  0x4e   :  { %p4851_p6 = pnand %p4849_p5, %p4846_p4 }
  0x50   :  { %4854 = shalt.err (!%p4851_p6)
}
  0x51   :  { %s4855_s8 = scalar_lea.vmem %s36_s28, 256  ;;  %p4860_p8 = scmp.lt.s32.totalorder %s36_s28, %s36_s28 }
  0x52   :  { %p4856_p7 = scmp.ne.s32.totalorder %s36_s28, %s4855_s8  ;;  %p4861_p9 = scmp.lt.s32.totalorder %s4855_s8, %s4855_s8 }
  0x54   :  { %p4862_p10 = por %p4861_p9, %p4860_p8 }
  0x56   :  { %p4863_p11 = pnand %p4862_p10, %p4856_p7 }
  0x58   :  { %4866 = shalt.err (!%p4863_p11)
}
  0x59   :  { %41 = dma.hbm_to_vmem [thread:$0]  %s6162_s0, 256, %s36_s28, [#allocation5], %s5085_s30, %s5085_s30, %s5086_s16  }
  0x5a   :  { %s4867_s17 = scalar_lea.hbm %s6164_s2, 256 }
  0x5b   :  { %p4868_p12 = scmp.ne.s32.totalorder %s6164_s2, %s4867_s17  ;;  %p4871_p13 = scmp.lt.u32.totalorder %s4867_s17, %s6164_s2 }
  0x5d   :  { %p4873_p0 = pnand %p4871_p13, %p4868_p12 }
  0x5f   :  { %4876 = shalt.err (!%p4873_p0)
}
  0x60   :  { %s4877_s29 = scalar_lea.vmem %s5261_s21, 256  ;;  %p4882_p2 = scmp.lt.s32.totalorder %s5261_s21, %s5261_s21 }
  0x61   :  { %p4878_p1 = scmp.ne.s32.totalorder %s5261_s21, %s4877_s29  ;;  %p4883_p3 = scmp.lt.s32.totalorder %s4877_s29, %s4877_s29 }
  0x63   :  { %p4884_p4 = por %p4883_p3, %p4882_p2 }
  0x65   :  { %p4885_p5 = pnand %p4884_p4, %p4878_p1 }
  0x67   :  { %4888 = shalt.err (!%p4885_p5)
}
  0x68   :  { %65 = dma.hbm_to_vmem [thread:$0]  %s6164_s2, 256, %s5261_s21, [#allocation8], %s5085_s30, %s5085_s30, %s5086_s16  }
  0x69   :  { %s5091_s18 = smov [#allocation12]   ;;  %s5092_s23 = smov [#allocation15]  }
  0x6a   :  { %s83_s22 = sshll.u32 %s5091_s18, 4  ;;  %s109_s24 = sshll.u32 %s5092_s23, 4  ;;  %s84_s22 = int_to_ptr.vmem [resolvable:$true] %s83_s22  ;;  %s5298_s24 = int_to_ptr.vmem [resolvable:$true] %s109_s24 }
  0x6b   :  { %s4889_s25 = scalar_lea.hbm %s6166_s4, 256 }
  0x6c   :  { %p4890_p6 = scmp.ne.s32.totalorder %s6166_s4, %s4889_s25  ;;  %p4893_p7 = scmp.lt.u32.totalorder %s4889_s25, %s6166_s4 }
  0x6e   :  { %p4895_p8 = pnand %p4893_p7, %p4890_p6 }
  0x70   :  { %4898 = shalt.err (!%p4895_p8)
}
  0x71   :  { %s4899_s2 = scalar_lea.vmem %s84_s22, 256  ;;  %p4904_p10 = scmp.lt.s32.totalorder %s84_s22, %s84_s22 }
  0x72   :  { %p4900_p9 = scmp.ne.s32.totalorder %s84_s22, %s4899_s2  ;;  %p4905_p11 = scmp.lt.s32.totalorder %s4899_s2, %s4899_s2 }
  0x74   :  { %p4906_p12 = por %p4905_p11, %p4904_p10 }
  0x76   :  { %p4907_p13 = pnand %p4906_p12, %p4900_p9 }
  0x78   :  { %4910 = shalt.err (!%p4907_p13)
}
  0x79   :  { %89 = dma.hbm_to_vmem [thread:$0]  %s6166_s4, 256, %s84_s22, [#allocation11], %s5085_s30, %s5085_s30, %s5086_s16  }
  0x7a   :  { %s4911_s29 = scalar_lea.hbm %s6169_s7, 1024 }
  0x7b   :  { %p4912_p0 = scmp.ne.s32.totalorder %s6169_s7, %s4911_s29  ;;  %p4915_p1 = scmp.lt.u32.totalorder %s4911_s29, %s6169_s7 }
  0x7d   :  { %p4917_p2 = pnand %p4915_p1, %p4912_p0 }
  0x7f   :  { %4920 = shalt.err (!%p4917_p2)
}
  0x80   :  { %s4921_s8 = scalar_lea.vmem %s5298_s24, 1024  ;;  %p4926_p4 = scmp.lt.s32.totalorder %s5298_s24, %s5298_s24 }
  0x81   :  { %p4922_p3 = scmp.ne.s32.totalorder %s5298_s24, %s4921_s8  ;;  %p4927_p5 = scmp.lt.s32.totalorder %s4921_s8, %s4921_s8 }
  0x83   :  { %p4928_p6 = por %p4927_p5, %p4926_p4 }
  0x85   :  { %p4929_p7 = pnand %p4928_p6, %p4922_p3 }
  0x87   :  { %4932 = shalt.err (!%p4929_p7)
}
  0x88   :  { %115 = dma.hbm_to_vmem [thread:$0]  %s6169_s7, 1024, %s5298_s24, [#allocation14], %s5085_s30, %s5085_s30, %s5086_s16  }
  0x89   :  { %s5093_s20 = smov [#allocation18]   ;;  %s5094_s26 = smov [#allocation19]  }
  0x8a   :  { %s133_s25 = sshll.u32 %s5093_s20, 4  ;;  %s145_s6 = sshll.u32 %s5094_s26, 4  ;;  %s134_s25 = int_to_ptr.vmem [resolvable:$true] %s133_s25  ;;  %s5335_s6 = int_to_ptr.vmem [resolvable:$true] %s145_s6 }
  0x8b   :  { %s4933_s2 = scalar_lea.hbm %s6171_s9, 1024 }
  0x8c   :  { %p4934_p8 = scmp.ne.s32.totalorder %s6171_s9, %s4933_s2  ;;  %p4937_p9 = scmp.lt.u32.totalorder %s4933_s2, %s6171_s9 }
  0x8e   :  { %p4939_p10 = pnand %p4937_p9, %p4934_p8 }
  0x90   :  { %4942 = shalt.err (!%p4939_p10)
}
  0x91   :  { %s4943_s7 = scalar_lea.vmem %s134_s25, 1024  ;;  %p4948_p12 = scmp.lt.s32.totalorder %s134_s25, %s134_s25 }
  0x92   :  { %p4944_p11 = scmp.ne.s32.totalorder %s134_s25, %s4943_s7  ;;  %p4949_p13 = scmp.lt.s32.totalorder %s4943_s7, %s4943_s7 }
  0x94   :  { %p4950_p0 = por %p4949_p13, %p4948_p12 }
  0x96   :  { %p4951_p1 = pnand %p4950_p0, %p4944_p11 }
  0x98   :  { %4954 = shalt.err (!%p4951_p1)
}
  0x99   :  { %139 = dma.hbm_to_vmem [thread:$0]  %s6171_s9, 1024, %s134_s25, [#allocation17], %s5085_s30, %s5085_s30, %s5086_s16  }
  0x9a   :  { %s4955_s18 = scalar_lea.hbm %s6172_s10, 1024 }
  0x9b   :  { %p4956_p2 = scmp.ne.s32.totalorder %s6172_s10, %s4955_s18  ;;  %p4959_p3 = scmp.lt.u32.totalorder %s4955_s18, %s6172_s10 }
  0x9d   :  { %p4961_p4 = pnand %p4959_p3, %p4956_p2 }
  0x9f   :  { %4964 = shalt.err (!%p4961_p4)
}
  0xa0   :  { %s4965_s20 = scalar_lea.vmem %s5335_s6, 1024  ;;  %p4970_p6 = scmp.lt.s32.totalorder %s5335_s6, %s5335_s6 }
  0xa1   :  { %p4966_p5 = scmp.ne.s32.totalorder %s5335_s6, %s4965_s20  ;;  %p4971_p7 = scmp.lt.s32.totalorder %s4965_s20, %s4965_s20 }
  0xa3   :  { %p4972_p8 = por %p4971_p7, %p4970_p6 }
  0xa5   :  { %p4973_p9 = pnand %p4972_p8, %p4966_p5 }
  0xa7   :  { %4976 = shalt.err (!%p4973_p9)
}
  0xa8   :  { %151 = dma.hbm_to_vmem [thread:$0]  %s6172_s10, 1024, %s5335_s6, [#allocation20], %s5085_s30, %s5085_s30, %s5086_s16  }
  0xa9   :  { %5065 = dma.done.wait [#allocation5], 256  }
  0xaa   :  { %5066 = vsyncadd [#allocation5], 4294967040 }
  0xab   :  { %5067 = dma.done.wait [#allocation8], 512  }
  0xac   :  { %5068 = vsyncadd [#allocation8], 4294966784 }
  0xad   :  { %5069 = dma.done.wait [#allocation11], 512  }
  0xae   :  { %5070 = vsyncadd [#allocation11], 4294966784 }
  0xaf   :  { %5071 = dma.done.wait [#allocation14], 1280  }
  0xb0   :  { %5072 = vsyncadd [#allocation14], 4294966016 }
  0xb1   :  { %5073 = dma.done.wait [#allocation17], 2048  }
  0xb2   :  { %5074 = vsyncadd [#allocation17], 4294965248 }
  0xb3   :  { %5075 = dma.done.wait [#allocation20], 1024  }
  0xb4   :  { %5076 = vsyncadd [#allocation20], 4294966272  ;;  %vm200_vm0 = vcmask 261120   ;;  %v196_v1 = vld [vmem:[#allocation15] sm:$0xff]  ;;  %v197_v2 = vld [vmem:[#allocation15 + $0x8] sm:$0xff]  ;;  %s5095_s10 = smov 120  }
  0xb5   :  { %vm5374_vm1 = vmpackc.low %vm200_vm0, %vm200_vm0  ;;  %v295_v3 = vld [vmem:[#allocation15 + $0x20] sm:$0xff]  ;;  %v4485_v4 = vpack.c.bf16 %v197_v2, %v196_v1  ;;  %v296_v5 = vld [vmem:[#allocation15 + $0x28] sm:$0xff]  ;;  %s5096_s17 = smov 112   ;;  %s5097_s21 = smov 104   ;;  %v5098_v46 = vmov 0.0   ;;  %vm5099_vm2 = vmmov 0  }
  0xb6   :  { %v198_v6 = vld [vmem:[#allocation15 + $0x10] sm:$0xff]  ;;  %v199_v7 = vld [vmem:[#allocation15 + $0x18] sm:$0xff]  ;;  %v4497_v8 = vpack.c.bf16 %v296_v5, %v295_v3  ;;  %v392_v13 = vld [vmem:[#allocation16] sm:$0xff]  ;;  %vm977_vm3 = vcmask 130048   ;;  %vm794_vm4 = vcmask 64512   ;;  %s5102_s3 = smov 16  }
  0xb7   :  { %v4491_v9 = vpack.c.bf16 %v199_v7, %v198_v6  ;;  %v297_v10 = vld [vmem:[#allocation15 + $0x30] sm:$0xff]  ;;  %v298_v11 = vld [vmem:[#allocation15 + $0x38] sm:$0xff]  ;;  %4487 = vmatprep.subr.msk.bf16.mxu0 %vm5374_vm1, %v4485_v4  ;;  %v393_v14 = vld [vmem:[#allocation16 + $0x8] sm:$0xff]  ;;  %vm3576_vm5 = vcmask 130112   ;;  %vm3597_vm6 = vcmask 195712   ;;  %vm3618_vm7 = vcmask 261312  }
  0xb8   :  { %v4503_v12 = vpack.c.bf16 %v298_v11, %v297_v10  ;;  %4499 = vmatprep.subr.msk.bf16.mxu1 %vm5374_vm1, %v4497_v8  ;;  %4490 = vmatpush3.bf16.xpose.msk.msra.mxu0 %vm5374_vm1, %v4485_v4  ;;  %v490_v15 = vld [vmem:[#allocation16 + $0x20] sm:$0xff]  ;;  %v491_v16 = vld [vmem:[#allocation16 + $0x28] sm:$0xff]  ;;  %v4509_v17 = vpack.c.bf16 %v393_v14, %v392_v13  ;;  %v394_v19 = vld [vmem:[#allocation16 + $0x10] sm:$0xff]  ;;  %s5103_s1 = smov [#allocation25]  }
  0xb9   :  { %4502 = vmatpush3.bf16.xpose.msk.msra.mxu1 %vm5374_vm1, %v4497_v8  ;;  %4493 = vmatprep.subr.msk.bf16.mxu0 %vm5374_vm1, %v4491_v9  ;;  %v4521_v18 = vpack.c.bf16 %v491_v16, %v490_v15  ;;  %v395_v20 = vld [vmem:[#allocation16 + $0x18] sm:$0xff]  ;;  %v492_v21 = vld [vmem:[#allocation16 + $0x30] sm:$0xff]  ;;  %v185_v23 = vld [vmem:[#allocation4 + $0x8] sm:$0xff]  ;;  %s3953_s19 = sshll.u32 %s5103_s1, 4  ;;  %s3954_s19 = int_to_ptr.vmem [resolvable:$true] %s3953_s19 }
  0xba   :  { %4505 = vmatprep.subr.msk.bf16.mxu1 %vm5374_vm1, %v4503_v12  ;;  %v493_v22 = vld [vmem:[#allocation16 + $0x38] sm:$0xff]  ;;  %v4515_v25 = vpack.c.bf16 %v395_v20, %v394_v19  ;;  %v188_v27 = vld [vmem:[#allocation9] sm:$0xff]  ;;  %v190_v28 = vld [vmem:[#allocation10] sm:$0xff]  ;;  %s4977_s7 = scalar_lea.vmem %s3954_s19, 1024  ;;  %p4982_p11 = scmp.lt.s32.totalorder %s3954_s19, %s3954_s19 }
  0xbb   :  { %v187_v24 = vld [vmem:[#allocation7 + $0x8] sm:$0xff]  ;;  %v4527_v26 = vpack.c.bf16 %v493_v22, %v492_v21  ;;  %v189_v29 = vld [vmem:[#allocation9 + $0x8] sm:$0xff]  ;;  %v685_v31 = vld [vmem:[#allocation18 + $0x20] sm:$0xff]  ;;  %p4978_p10 = scmp.ne.s32.totalorder %s3954_s19, %s4977_s7  ;;  %p4983_p12 = scmp.lt.s32.totalorder %s4977_s7, %s4977_s7 }
  0xbc   :  { %v191_v30 = vld [vmem:[#allocation10 + $0x8] sm:$0xff]  ;;  %v686_v32 = vld [vmem:[#allocation18 + $0x28] sm:$0xff]  ;;  %v687_v34 = vld [vmem:[#allocation18 + $0x30] sm:$0xff] }
  0xbd   :  { %v4545_v33 = vpack.c.bf16 %v686_v32, %v685_v31  ;;  %v688_v35 = vld [vmem:[#allocation18 + $0x38] sm:$0xff]  ;;  %v587_v41 = vld [vmem:[#allocation18] sm:$0xff]  ;;  %v588_v42 = vld [vmem:[#allocation18 + $0x8] sm:$0xff]  ;;  %p4984_p13 = por %p4983_p12, %p4982_p11 }
  0xbe   :  { %v4551_v36 = vpack.c.bf16 %v688_v35, %v687_v34  ;;  %v194_v43 = vld [vmem:[%s6167_s5] sm:$0xff]  ;;  %v4533_v44 = vpack.c.bf16 %v588_v42, %v587_v41  ;;  %v195_v45 = vld [vmem:[%s6167_s5 + $0x8] sm:$0xff]  ;;  %v589_v47 = vld [vmem:[#allocation18 + $0x10] sm:$0xff]  ;;  %s5101_s5 = smov 24  }
  0xbf   :  { %v590_v48 = vld [vmem:[#allocation18 + $0x18] sm:$0xff]  ;;  %v192_v54 = vld [vmem:[#allocation12] sm:$0xff]  ;;  %v193_v55 = vld [vmem:[#allocation12 + $0x8] sm:$0xff]  ;;  %p4985_p0 = pnand %p4984_p13, %p4978_p10 }
  0xc0   :  { %4496 = vmatpush3.bf16.xpose.msk.msra.mxu0 %vm5374_vm1, %v4491_v9  ;;  %v4539_v49 = vpack.c.bf16 %v590_v48, %v589_v47 }
  0xc1   :  { %4508 = vmatpush3.bf16.xpose.msk.msra.mxu1 %vm5374_vm1, %v4503_v12  ;;  %4511 = vmatprep.subr.msk.bf16.mxu0 %vm5374_vm1, %v4509_v17 }
  0xc2   :  { %4523 = vmatprep.subr.msk.bf16.mxu1 %vm5374_vm1, %v4521_v18 }
  0xc7   :  { %4214 = vmatmul.mubr.msk.f32.vlgmr.msra.gmra.mrb[0].mxu0 %vm200_vm0, %v185_v23 }
  0xc8   :  { %4225 = vmatmul.mubr.msk.f32.vlgmr.msra.gmra.mrb[0].mxu1 %vm200_vm0, %v187_v24  ;;  %4514 = vmatpush3.bf16.xpose.msk.msra.mxu0 %vm5374_vm1, %v4509_v17 }
  0xc9   :  { %4526 = vmatpush3.bf16.xpose.msk.msra.mxu1 %vm5374_vm1, %v4521_v18  ;;  %4517 = vmatprep.subr.msk.bf16.mxu0 %vm5374_vm1, %v4515_v25 }
  0xca   :  { %4529 = vmatprep.subr.msk.bf16.mxu1 %vm5374_vm1, %v4527_v26  ;;  %4235 = vmatprep.mubr.msk.f32.mxu0 %vm200_vm0, %v188_v27 }
  0xcb   :  { %4246 = vmatprep.mubr.msk.f32.mxu1 %vm200_vm0, %v190_v28 }
  0xd0   :  { %4520 = vmatpush3.bf16.xpose.msk.msra.mxu0 %vm5374_vm1, %v4515_v25 }
  0xd1   :  { %4532 = vmatpush3.bf16.xpose.msk.msra.mxu1 %vm5374_vm1, %v4527_v26  ;;  %4535 = vmatprep.subr.msk.bf16.mxu0 %vm5374_vm1, %v4533_v44 }
  0xd2   :  { %4547 = vmatprep.subr.msk.bf16.mxu1 %vm5374_vm1, %v4545_v33 }
  0xd7   :  { %4236 = vmatmul.mubr.msk.f32.vlgmr.msra.gmra.mrb[2].mxu0 %vm200_vm0, %v189_v29 }
  0xd8   :  { %4247 = vmatmul.mubr.msk.f32.vlgmr.msra.gmra.mrb[2].mxu1 %vm200_vm0, %v191_v30  ;;  %4538 = vmatpush3.bf16.xpose.msk.msra.mxu0 %vm5374_vm1, %v4533_v44 }
  0xd9   :  { %4550 = vmatpush3.bf16.xpose.msk.msra.mxu1 %vm5374_vm1, %v4545_v33  ;;  %4268 = vmatprep.mubr.msk.f32.mxu1 %vm200_vm0, %v194_v43 }
  0xda   :  { %4553 = vmatprep.subr.msk.bf16.mxu1 %vm5374_vm1, %v4551_v36  ;;  %4541 = vmatprep.subr.msk.bf16.mxu0 %vm5374_vm1, %v4539_v49 }
  0xdb   :  { %4257 = vmatprep.mubr.msk.f32.mxu0 %vm200_vm0, %v192_v54  ;;  %v5100_v54 = vmov 0.0|0.0  }
  0xe0   :  { %4544 = vmatpush3.bf16.xpose.msk.msra.mxu0 %vm5374_vm1, %v4539_v49 }
  0xe1   :  { %4556 = vmatpush3.bf16.xpose.msk.msra.mxu1 %vm5374_vm1, %v4551_v36  ;;  %4271 = vmatprep.subr.mxu0 %v5098_v46 }
  0xe2   :  { %4276 = vmatprep.subr.mxu1 %v5098_v46 }
  0xe7   :  { %4258 = vmatmul.mubr.msk.f32.vlgmr.msra.gmra.mrb[4].mxu0 %vm200_vm0, %v193_v55 }
  0xe8   :  { %4269 = vmatmul.mubr.msk.f32.vlgmr.msra.gmra.mrb[4].mxu1 %vm200_vm0, %v195_v45  ;;  %4273 = vmatprep.mubr.msk.f32.mxu0 %vm5099_vm2, %v5098_v46 }
  0xe9   :  { %4278 = vmatprep.mubr.msk.f32.mxu1 %vm5099_vm2, %v5098_v46 }
 0x19a   :  { %v5420_v37 = vpop.f32.mrb[0].mxu0 }
 0x19b   :  { %v5422_v38 = vpop.f32.mrb[0].mxu1  ;;  %801 = vrot.lane.b32.xlu1 %v5420_v37, %s5095_s10  ;;  %v5426_v39 = vpop.f32.mrb[1].mxu0 }
 0x19c   :  { %790 = vrot.lane.b32.xlu0 %v5422_v38, %s5086_s16  ;;  %v5432_v40 = vpop.f32.mrb[1].mxu1 }
 0x19f   :  { %788 = vrot.lane.b32.xlu1 %v5432_v40, %s5086_s16 }
 0x1a0   :  { %807 = vrot.lane.b32.xlu0 %v5426_v39, %s5096_s17 }
 0x1a3   :  { %799 = vrot.lane.b32.xlu1 %v5426_v39, %s5095_s10 }
 0x1a4   :  { %821 = vrot.lane.b32.xlu0 %v5426_v39, %s5097_s21 }
 0x1a7   :  { %813 = vrot.lane.b32.xlu1 %v5432_v40, %s5095_s10 }
 0x1aa   :  { %v5463_v50 = vpop.f32.mrb[2].mxu0 }
 0x1ab   :  { %827 = vrot.lane.b32.xlu1 %v5432_v40, %s5096_s17  ;;  %857 = vrot.lane.b32.xlu0 %v5463_v50, %s5096_s17  ;;  %v5471_v51 = vpop.f32.mrb[3].mxu0  ;;  %v5473_v52 = vpop.f32.mrb[2].mxu1 }
 0x1ac   :  { %v5475_v53 = vpop.f32.mrb[3].mxu1  ;;  %v5483_v56 = vsub.f32 0.0, %v5473_v52 }
 0x1ad   :  { %v782_v57 = vsub.f32 0.0, %v5475_v53 }
 0x1af   :  { %849 = vrot.lane.b32.xlu1 %v5463_v50, %s5095_s10  ;;  %847 = vrot.lane.b32.xlu0 %v5471_v51, %s5095_s10 }
 0x1b3   :  { %863 = vrot.lane.b32.xlu1 %v5483_v56, %s5095_s10  ;;  %855 = vrot.lane.b32.xlu0 %v5471_v51, %s5096_s17 }
 0x1b7   :  { %877 = vrot.lane.b32.xlu1 %v5483_v56, %s5096_s17  ;;  %869 = vrot.lane.b32.xlu0 %v5471_v51, %s5097_s21 }
 0x1bb   :  { %861 = vrot.lane.b32.xlu1 %v782_v57, %s5095_s10  ;;  %839 = vrot.lane.b32.xlu0 %v5483_v56, %s5086_s16 }
 0x1bf   :  { %875 = vrot.lane.b32.xlu1 %v782_v57, %s5096_s17  ;;  %837 = vrot.lane.b32.xlu0 %v782_v57, %s5086_s16 }
 0x1c3   :  { %815 = vrot.lane.b32.xlu1 %v5422_v38, %s5095_s10  ;;  %871 = vrot.lane.b32.xlu0 %v5463_v50, %s5097_s21 }
 0x1c7   :  { %829 = vrot.lane.b32.xlu1 %v5422_v38, %s5096_s17  ;;  %809 = vrot.lane.b32.xlu0 %v5420_v37, %s5096_s17 }
 0x1cb   :  { %893 = vrot.lane.b32.xlu1 %v5475_v53, %s5095_s10  ;;  %823 = vrot.lane.b32.xlu0 %v5420_v37, %s5097_s21 }
 0x1cf   :  { %909 = vrot.lane.b32.xlu1 %v5475_v53, %s5097_s21  ;;  %883 = vrot.lane.b32.xlu0 %v5471_v51, %s5086_s16 }
 0x1d3   :  { %895 = vrot.lane.b32.xlu1 %v5473_v52, %s5095_s10  ;;  %901 = vrot.lane.b32.xlu0 %v5475_v53, %s5096_s17 }
 0x1d7   :  { %911 = vrot.lane.b32.xlu1 %v5473_v52, %s5097_s21  ;;  %885 = vrot.lane.b32.xlu0 %v5463_v50, %s5086_s16 }
 0x1db   :  { %903 = vrot.lane.b32.xlu0 %v5473_v52, %s5096_s17 }
 0x20d   :  { %v802_v58 = vpop.permute.xlu1 %801 }
 0x20e   :  { %v791_v59 = vpop.permute.xlu0 %790  ;;  %v806_v24 = vsel %vm794_vm4, %v802_v58, %v5422_v38 }
 0x20f   :  { %v796_v30 = vsel %vm794_vm4, %v5420_v37, %v791_v59 }
 0x211   :  { %v789_v60 = vpop.permute.xlu1 %788 }
 0x212   :  { %v808_v61 = vpop.permute.xlu0 %807  ;;  %v795_v18 = vsel %vm794_vm4, %v5426_v39, %v789_v60 }
 0x215   :  { %v800_v62 = vpop.permute.xlu1 %799 }
 0x216   :  { %v822_v63 = vpop.permute.xlu0 %821  ;;  %v5541_v7 = vsel %vm794_vm4, %v800_v62, %v5432_v40 }
 0x219   :  { %v814_v1 = vpop.permute.xlu1 %813 }
 0x21a   :  { %v819_v25 = vsel %vm794_vm4, %v808_v61, %v814_v1 }
 0x21d   :  { %v828_v2 = vpop.permute.xlu1 %827  ;;  %v5529_v3 = vpop.permute.xlu0 %857 }
 0x21e   :  { %v833_v19 = vsel %vm794_vm4, %v822_v63, %v828_v2 }
 0x221   :  { %v5531_v4 = vpop.permute.xlu1 %849  ;;  %v5533_v5 = vpop.permute.xlu0 %847 }
 0x222   :  { %v853_v6 = vsel %vm794_vm4, %v5533_v5, %v782_v57  ;;  %v854_v22 = vsel %vm794_vm4, %v5531_v4, %v5483_v56  ;;  %v5666_v57 = vpop.f32.mrb[4].mxu0 }
 0x223   :  { %4277 = vmatpush3.xpose.msk.msra.mxu1 %vm977_vm3, %v853_v6  ;;  %v5668_v58 = vpop.f32.mrb[5].mxu0 }
 0x224   :  { %4286 = vmatprep.subr.mxu1 %v5098_v46 }
 0x225   :  { %v864_v8 = vpop.permute.xlu1 %863  ;;  %v856_v9 = vpop.permute.xlu0 %855 }
 0x226   :  { %4279 = vmatmul.mubr.msk.f32.vlgmr.msra.gmra.mrb[6].mxu1 %vm977_vm3, %v5541_v7  ;;  %v868_v33 = vsel %vm794_vm4, %v5529_v3, %v864_v8 }
 0x227   :  { %4288 = vmatprep.mubr.msk.f32.mxu1 %vm5099_vm2, %v5098_v46 }
 0x229   :  { %v878_v10 = vpop.permute.xlu1 %877  ;;  %v870_v11 = vpop.permute.xlu0 %869 }
 0x22d   :  { %v862_v12 = vpop.permute.xlu1 %861  ;;  %v840_v13 = vpop.permute.xlu0 %839 }
 0x22e   :  { %v867_v23 = vsel %vm794_vm4, %v856_v9, %v862_v12  ;;  %v844_v28 = vsel %vm794_vm4, %v5463_v50, %v840_v13 }
 0x231   :  { %v876_v14 = vpop.permute.xlu1 %875  ;;  %v838_v15 = vpop.permute.xlu0 %837 }
 0x232   :  { %v881_v16 = vsel %vm794_vm4, %v870_v11, %v876_v14  ;;  %v843_v17 = vsel %vm794_vm4, %v5471_v51, %v838_v15 }
 0x233   :  { %4272 = vmatpush3.xpose.msk.msra.mxu0 %vm977_vm3, %v843_v17  ;;  %4287 = vmatpush3.xpose.msk.msra.mxu1 %vm977_vm3, %v881_v16 }
 0x234   :  { %4281 = vmatprep.subr.mxu0 %v5098_v46  ;;  %4296 = vmatprep.subr.mxu1 %v5098_v46 }
 0x235   :  { %v816_v20 = vpop.permute.xlu1 %815  ;;  %v872_v21 = vpop.permute.xlu0 %871 }
 0x236   :  { %4274 = vmatmul.mubr.msk.f32.vlgmr.msra.gmra.mrb[6].mxu0 %vm977_vm3, %v795_v18  ;;  %4289 = vmatmul.mubr.msk.f32.vlgmr.msra.gmra.mrb[8].mxu1 %vm977_vm3, %v833_v19  ;;  %v882_v29 = vsel %vm794_vm4, %v872_v21, %v878_v10 }
 0x237   :  { %4282 = vmatpush3.xpose.msk.msra.mxu0 %vm977_vm3, %v867_v23  ;;  %4297 = vmatpush3.xpose.msk.msra.mxu1 %vm977_vm3, %v854_v22 }
 0x238   :  { %4283 = vmatprep.mubr.msk.f32.mxu0 %vm5099_vm2, %v5098_v46  ;;  %4298 = vmatprep.mubr.msk.f32.mxu1 %vm5099_vm2, %v5098_v46 }
 0x239   :  { %v830_v26 = vpop.permute.xlu1 %829  ;;  %v810_v27 = vpop.permute.xlu0 %809  ;;  %4291 = vmatprep.subr.mxu0 %v5098_v46  ;;  %4306 = vmatprep.subr.mxu1 %v5098_v46 }
 0x23a   :  { %4284 = vmatmul.mubr.msk.f32.vlgmr.msra.gmra.mrb[8].mxu0 %vm977_vm3, %v819_v25  ;;  %4299 = vmatmul.mubr.msk.f32.vlgmr.msra.gmra.mrb[10].mxu1 %vm977_vm3, %v806_v24  ;;  %v820_v36 = vsel %vm794_vm4, %v810_v27, %v816_v20 }
 0x23b   :  { %4292 = vmatpush3.xpose.msk.msra.mxu0 %vm977_vm3, %v844_v28  ;;  %4307 = vmatpush3.xpose.msk.msra.mxu1 %vm977_vm3, %v882_v29 }
 0x23c   :  { %4293 = vmatprep.mubr.msk.f32.mxu0 %vm5099_vm2, %v5098_v46  ;;  %4301 = vmatprep.subr.mxu0 %v5098_v46 }
 0x23d   :  { %v894_v31 = vpop.permute.xlu1 %893  ;;  %v824_v32 = vpop.permute.xlu0 %823  ;;  %4308 = vmatprep.mubr.msk.f32.mxu1 %vm5099_vm2, %v5098_v46  ;;  %4316 = vmatprep.subr.mxu1 %v5098_v46 }
 0x23e   :  { %v899_v34 = vsel %vm794_vm4, %v894_v31, %v5471_v51  ;;  %v834_v35 = vsel %vm794_vm4, %v824_v32, %v830_v26  ;;  %4294 = vmatmul.mubr.msk.f32.vlgmr.msra.gmra.mrb[10].mxu0 %vm977_vm3, %v796_v30 }
 0x23f   :  { %4302 = vmatpush3.xpose.msk.msra.mxu0 %vm977_vm3, %v868_v33  ;;  %4309 = vmatmul.mubr.msk.f32.vlgmr.msra.gmra.mrb[12].mxu1 %vm977_vm3, %v834_v35 }
 0x240   :  { %4317 = vmatpush3.xpose.msk.msra.mxu1 %vm977_vm3, %v899_v34  ;;  %4303 = vmatprep.mubr.msk.f32.mxu0 %vm5099_vm2, %v5098_v46 }
 0x241   :  { %v910_v37 = vpop.permute.xlu1 %909  ;;  %v884_v38 = vpop.permute.xlu0 %883  ;;  %4311 = vmatprep.subr.mxu0 %v5098_v46  ;;  %4318 = vmatprep.mubr.msk.f32.mxu1 %vm5099_vm2, %v5098_v46 }
 0x242   :  { %v915_v39 = vsel %vm794_vm4, %v910_v37, %v856_v9  ;;  %v889_v40 = vsel %vm794_vm4, %v5475_v53, %v884_v38  ;;  %4304 = vmatmul.mubr.msk.f32.vlgmr.msra.gmra.mrb[12].mxu0 %vm977_vm3, %v820_v36  ;;  %4326 = vmatprep.subr.mxu1 %v5098_v46 }
 0x243   :  { %4312 = vmatpush3.xpose.msk.msra.mxu0 %vm977_vm3, %v889_v40  ;;  %4319 = vmatmul.mubr.msk.f32.vlgmr.msra.gmra.mrb[14].mxu1 %vm977_vm3, %v5541_v7 }
 0x244   :  { %4327 = vmatpush3.xpose.msk.msra.mxu1 %vm977_vm3, %v915_v39  ;;  %4313 = vmatprep.mubr.msk.f32.mxu0 %vm5099_vm2, %v5098_v46 }
 0x245   :  { %v896_v41 = vpop.permute.xlu1 %895  ;;  %v902_v42 = vpop.permute.xlu0 %901  ;;  %4321 = vmatprep.subr.mxu0 %v5098_v46  ;;  %4328 = vmatprep.mubr.msk.f32.mxu1 %vm5099_vm2, %v5098_v46 }
 0x246   :  { %v900_v43 = vsel %vm794_vm4, %v896_v41, %v5463_v50  ;;  %v907_v44 = vsel %vm794_vm4, %v902_v42, %v5533_v5  ;;  %4314 = vmatmul.mubr.msk.f32.vlgmr.msra.gmra.mrb[14].mxu0 %vm977_vm3, %v795_v18  ;;  %4336 = vmatprep.subr.mxu1 %v5098_v46 }
 0x247   :  { %4322 = vmatpush3.xpose.msk.msra.mxu0 %vm977_vm3, %v907_v44  ;;  %4329 = vmatmul.mubr.msk.f32.vlgmr.msra.gmra.mrb[16].mxu1 %vm977_vm3, %v833_v19 }
 0x248   :  { %4337 = vmatpush3.xpose.msk.msra.mxu1 %vm977_vm3, %v900_v43  ;;  %4323 = vmatprep.mubr.msk.f32.mxu0 %vm5099_vm2, %v5098_v46 }
 0x249   :  { %v912_v45 = vpop.permute.xlu1 %911  ;;  %v886_v47 = vpop.permute.xlu0 %885  ;;  %4331 = vmatprep.subr.mxu0 %v5098_v46  ;;  %4338 = vmatprep.mubr.msk.f32.mxu1 %vm5099_vm2, %v5098_v46 }
 0x24a   :  { %v916_v48 = vsel %vm794_vm4, %v912_v45, %v5529_v3  ;;  %v890_v49 = vsel %vm794_vm4, %v5473_v52, %v886_v47  ;;  %4324 = vmatmul.mubr.msk.f32.vlgmr.msra.gmra.mrb[16].mxu0 %vm977_vm3, %v819_v25  ;;  %4346 = vmatprep.subr.mxu1 %v5098_v46  ;;  %v5658_v52 = vpop.f32.mrb[4].mxu1 }
 0x24b   :  { %4332 = vmatpush3.xpose.msk.msra.mxu0 %vm977_vm3, %v890_v49  ;;  %4339 = vmatmul.mubr.msk.f32.vlgmr.msra.gmra.mrb[18].mxu1 %vm977_vm3, %v806_v24  ;;  %v5660_v53 = vpop.f32.mrb[5].mxu1  ;;  %v785_v56 = vsub.f32 0.0, %v5658_v52  ;;  %v4594_v1 = vpack.c.bf16 %v5666_v57, %v5658_v52 }
 0x24c   :  { %4347 = vmatpush3.xpose.msk.msra.mxu1 %vm977_vm3, %v916_v48  ;;  %4333 = vmatprep.mubr.msk.f32.mxu0 %vm5099_vm2, %v5098_v46  ;;  %v784_v55 = vsub.f32 0.0, %v5660_v53  ;;  %v4582_v63 = vpack.c.bf16 %v5668_v58, %v5660_v53 }
 0x24d   :  { %v904_v50 = vpop.permute.xlu0 %903  ;;  %4341 = vmatprep.subr.mxu0 %v5098_v46  ;;  %4348 = vmatprep.mubr.msk.f32.mxu1 %vm5099_vm2, %v5098_v46  ;;  %v5675_v61 = vpack.i.bf16 %v785_v56, %v5666_v57  ;;  %v5678_v62 = vpack.c.bf16 %v785_v56, %v5666_v57 }
 0x24e   :  { %v908_v51 = vsel %vm794_vm4, %v904_v50, %v5531_v4  ;;  %4334 = vmatmul.mubr.msk.f32.vlgmr.msra.gmra.mrb[18].mxu0 %vm977_vm3, %v796_v30  ;;  %4560 = vmatprep.subr.bf16.mxu1 %v5100_v54  ;;  %v4558_v59 = vpack.c.bf16 %v784_v55, %v5668_v58  ;;  %v5672_v60 = vpack.i.bf16 %v784_v55, %v5668_v58 }
 0x24f   :  { %4342 = vmatpush3.xpose.msk.msra.mxu0 %vm977_vm3, %v908_v51  ;;  %4349 = vmatmul.mubr.msk.f32.vlgmr.msra.gmra.mrb[20].mxu1 %vm977_vm3, %v834_v35 }
 0x250   :  { %4343 = vmatprep.mubr.msk.f32.mxu0 %vm5099_vm2, %v5098_v46  ;;  %4362 = vmatprep.mubr.msk.f32.mxu1 %vm5099_vm2, %v5098_v46 }
 0x251   :  { %4557 = vmatprep.subr.bf16.mxu0 %v5100_v54 }
 0x252   :  { %4344 = vmatmul.mubr.msk.f32.vlgmr.msra.gmra.mrb[20].mxu0 %vm977_vm3, %v820_v36 }
 0x253   :  { %4355 = vmatprep.mubr.msk.f32.mxu0 %vm5099_vm2, %v5098_v46  ;;  %4559 = vmatpush3.bf16.msra.mxu0 %v4558_v59 }
 0x254   :  { %4563 = vmatprep.subr.bf16.mxu0 %v5100_v54 }
 0x2f9   :  { %v5685_v2 = vpop.f32.mrb[6].mxu1 }
 0x2fa   :  { %v4280_v3 = vpop.f32.mrb[7].mxu1  ;;  %v2175_v43 = vsel %vm794_vm4, %v5685_v2, -inf }
 0x309   :  { %v5687_v4 = vpop.f32.mrb[6].mxu0  ;;  %v5689_v5 = vpop.f32.mrb[8].mxu1 }
 0x30a   :  { %v4275_v6 = vpop.f32.mrb[7].mxu0  ;;  %v4290_v7 = vpop.f32.mrb[9].mxu1  ;;  %v2172_v42 = vsel %vm794_vm4, %v5687_v4, -inf  ;;  %v2181_v45 = vsel %vm794_vm4, %v5689_v5, -inf }
 0x30d   :  { %v5691_v8 = vpop.f32.mrb[8].mxu0  ;;  %v5693_v9 = vpop.f32.mrb[10].mxu1 }
 0x30e   :  { %v4285_v10 = vpop.f32.mrb[9].mxu0  ;;  %v4300_v11 = vpop.f32.mrb[11].mxu1  ;;  %v2178_v44 = vsel %vm794_vm4, %v5691_v8, -inf  ;;  %v2187_v48 = vsel %vm794_vm4, %v5693_v9, -inf }
 0x311   :  { %v5695_v12 = vpop.f32.mrb[10].mxu0 }
 0x312   :  { %v4295_v13 = vpop.f32.mrb[11].mxu0  ;;  %v5697_v14 = vpop.f32.mrb[12].mxu1  ;;  %v2184_v47 = vsel %vm794_vm4, %v5695_v12, -inf }
 0x313   :  { %v4310_v15 = vpop.f32.mrb[13].mxu1  ;;  %v2193_v50 = vsel %vm794_vm4, %v5697_v14, -inf }
 0x315   :  { %v5699_v16 = vpop.f32.mrb[12].mxu0 }
 0x316   :  { %v4305_v17 = vpop.f32.mrb[13].mxu0  ;;  %v1728_v18 = vpop.f32.mrb[14].mxu1  ;;  %v2190_v49 = vsel %vm794_vm4, %v5699_v16, -inf }
 0x317   :  { %v4320_v19 = vpop.f32.mrb[15].mxu1  ;;  %v2271_v20 = vsel %vm794_vm4, %v1728_v18, -inf }
 0x318   :  { %2272 = vmax.xlane.f32.xlu1 %v2271_v20 }
 0x319   :  { %v1655_v21 = vpop.f32.mrb[14].mxu0 }
 0x31a   :  { %v4315_v22 = vpop.f32.mrb[15].mxu0  ;;  %v1874_v23 = vpop.f32.mrb[16].mxu1  ;;  %v2268_v24 = vsel %vm794_vm4, %v1655_v21, -inf }
 0x31b   :  { %v4330_v25 = vpop.f32.mrb[17].mxu1  ;;  %2269 = vmax.xlane.f32.xlu0 %v2268_v24  ;;  %v2277_v34 = vsel %vm794_vm4, %v1874_v23, -inf }
 0x31d   :  { %v1801_v26 = vpop.f32.mrb[16].mxu0 }
 0x31e   :  { %v4325_v27 = vpop.f32.mrb[17].mxu0  ;;  %v5703_v28 = vpop.f32.mrb[18].mxu1  ;;  %v2274_v29 = vsel %vm794_vm4, %v1801_v26, -inf }
 0x31f   :  { %v4340_v30 = vpop.f32.mrb[19].mxu1  ;;  %2275 = vmax.xlane.f32.xlu0 %v2274_v29  ;;  %v2283_v39 = vsel %vm794_vm4, %v5703_v28, -inf }
 0x321   :  { %v1947_v31 = vpop.f32.mrb[18].mxu0 }
 0x322   :  { %v4335_v32 = vpop.f32.mrb[19].mxu0  ;;  %v5706_v33 = vpop.f32.mrb[20].mxu1  ;;  %v2280_v35 = vsel %vm794_vm4, %v1947_v31, -inf }
 0x323   :  { %v4350_v36 = vpop.f32.mrb[21].mxu1  ;;  %2278 = vmax.xlane.f32.xlu0 %v2277_v34  ;;  %2281 = vmax.xlane.f32.xlu1 %v2280_v35  ;;  %v2289_v41 = vsel %vm794_vm4, %v5706_v33, -inf }
 0x325   :  { %v2093_v37 = vpop.f32.mrb[20].mxu0 }
 0x326   :  { %v4345_v38 = vpop.f32.mrb[21].mxu0  ;;  %v2286_v40 = vsel %vm794_vm4, %v2093_v37, -inf }
 0x327   :  { %2284 = vmax.xlane.f32.xlu0 %v2283_v39  ;;  %2287 = vmax.xlane.f32.xlu1 %v2286_v40 }
 0x32b   :  { %2290 = vmax.xlane.f32.xlu0 %v2289_v41  ;;  %2173 = vmax.xlane.f32.xlu1 %v2172_v42 }
 0x32f   :  { %2176 = vmax.xlane.f32.xlu0 %v2175_v43  ;;  %2179 = vmax.xlane.f32.xlu1 %v2178_v44 }
 0x333   :  { %2182 = vmax.xlane.f32.xlu0 %v2181_v45  ;;  %2185 = vmax.xlane.f32.xlu1 %v2184_v47 }
 0x337   :  { %2188 = vmax.xlane.f32.xlu0 %v2187_v48  ;;  %2191 = vmax.xlane.f32.xlu1 %v2190_v49 }
 0x33b   :  { %2194 = vmax.xlane.f32.xlu0 %v2193_v50 }
 0x3a5   :  { %v2273_v51 = vpop.xlane.xlu1 %2272 }
 0x3a6   :  { %v2293_v55 = vsub.f32 %v1728_v18, %v2273_v51 }
 0x3a8   :  { %v2302_v56 = vmul.f32 1.442695, %v2293_v55  ;;  %v2270_v59 = vpop.xlane.xlu0 %2269 }
 0x3a9   :  { %v2292_v3 = vsub.f32 %v1655_v21, %v2270_v59 }
 0x3aa   :  { %4683 = vpow2.f32 %v2302_v56 }
 0x3ab   :  { %v2300_v6 = vmul.f32 1.442695, %v2292_v3 }
 0x3ac   :  { %v2276_v7 = vpop.xlane.xlu0 %2275 }
 0x3ad   :  { %4685 = vpow2.f32 %v2300_v6  ;;  %v2294_v10 = vsub.f32 %v1801_v26, %v2276_v7 }
 0x3af   :  { %v2304_v11 = vmul.f32 1.442695, %v2294_v10 }
 0x3b0   :  { %v2279_v13 = vpop.xlane.xlu0 %2278  ;;  %v2282_v15 = vpop.xlane.xlu1 %2281 }
 0x3b1   :  { %4687 = vpow2.f32 %v2304_v11  ;;  %v2295_v17 = vsub.f32 %v1874_v23, %v2279_v13  ;;  %v2296_v19 = vsub.f32 %v1947_v31, %v2282_v15 }
 0x3b3   :  { %v2306_v20 = vmul.f32 1.442695, %v2295_v17  ;;  %v2308_v22 = vmul.f32 1.442695, %v2296_v19 }
 0x3b4   :  { %v5731_v24 = vpop.eup %4683  ;;  %v2285_v25 = vpop.xlane.xlu0 %2284 }
 0x3b5   :  { %v2288_v18 = vpop.xlane.xlu1 %2287  ;;  %4689 = vpow2.f32 %v2306_v20  ;;  %v2297_v21 = vsub.f32 %v5703_v28, %v2285_v25  ;;  %v2319_v29 = vsel %vm794_vm4, %v5731_v24, 0.0 }
 0x3b6   :  { %v2298_v27 = vsub.f32 %v2093_v37, %v2288_v18  ;;  %4691 = vpow2.f32 %v2308_v22  ;;  %2320 = vadd.xlane.f32.xlu0 %v2319_v29 }
 0x3b7   :  { %v5736_v26 = vpop.eup %4685  ;;  %v2310_v30 = vmul.f32 1.442695, %v2297_v21 }
 0x3b8   :  { %v2312_v23 = vmul.f32 1.442695, %v2298_v27  ;;  %v2291_v31 = vpop.xlane.xlu0 %2290  ;;  %v2316_v34 = vsel %vm794_vm4, %v5736_v26, 0.0 }
 0x3b9   :  { %v2174_v32 = vpop.xlane.xlu1 %2173  ;;  %4693 = vpow2.f32 %v2310_v30  ;;  %v2299_v35 = vsub.f32 %v5706_v33, %v2291_v31  ;;  %2317 = vadd.xlane.f32.xlu1 %v2316_v34 }
 0x3ba   :  { %v2196_v28 = vsub.f32 %v5687_v4, %v2174_v32  ;;  %4695 = vpow2.f32 %v2312_v23 }
 0x3bb   :  { %v5742_v36 = vpop.eup %4687  ;;  %v2314_v37 = vmul.f32 1.442695, %v2299_v35 }
 0x3bc   :  { %v2204_v38 = vmul.f32 1.442695, %v2196_v28  ;;  %v2177_v39 = vpop.xlane.xlu0 %2176  ;;  %v2322_v41 = vsel %vm794_vm4, %v5742_v36, 0.0 }
 0x3bd   :  { %v2180_v40 = vpop.xlane.xlu1 %2179  ;;  %4697 = vpow2.f32 %v2314_v37  ;;  %v2197_v42 = vsub.f32 %v5685_v2, %v2177_v39  ;;  %2323 = vadd.xlane.f32.xlu1 %v2322_v41 }
 0x3be   :  { %v2198_v43 = vsub.f32 %v5691_v8, %v2180_v40  ;;  %4699 = vpow2.f32 %v2204_v38 }
 0x3bf   :  { %v5748_v33 = vpop.eup %4689  ;;  %v2206_v4 = vmul.f32 1.442695, %v2197_v42 }
 0x3c0   :  { %v2208_v44 = vmul.f32 1.442695, %v2198_v43  ;;  %v5750_v45 = vpop.eup %4691  ;;  %v2183_v47 = vpop.xlane.xlu0 %2182  ;;  %v2325_v49 = vsel %vm794_vm4, %v5748_v33, 0.0  ;;  %v5815_v43 = vld [vmem:[#allocation13] sm:$0xff] }
 0x3c1   :  { %v2186_v48 = vpop.xlane.xlu1 %2185  ;;  %4701 = vpow2.f32 %v2206_v4  ;;  %v2199_v50 = vsub.f32 %v5689_v5, %v2183_v47  ;;  %2326 = vadd.xlane.f32.xlu0 %v2325_v49  ;;  %v2328_v8 = vsel %vm794_vm4, %v5750_v45, 0.0 }
 0x3c2   :  { %v2200_v2 = vsub.f32 %v5695_v12, %v2186_v48  ;;  %4703 = vpow2.f32 %v2208_v44  ;;  %2329 = vadd.xlane.f32.xlu1 %v2328_v8 }
 0x3c3   :  { %v5758_v51 = vpop.eup %4693  ;;  %v2210_v55 = vmul.f32 1.442695, %v2199_v50 }
 0x3c4   :  { %v2212_v56 = vmul.f32 1.442695, %v2200_v2  ;;  %v5760_v59 = vpop.eup %4695  ;;  %v2189_v3 = vpop.xlane.xlu0 %2188  ;;  %v2331_v7 = vsel %vm794_vm4, %v5758_v51, 0.0 }
 0x3c5   :  { %v2192_v6 = vpop.xlane.xlu1 %2191  ;;  %4705 = vpow2.f32 %v2210_v55  ;;  %v2201_v5 = vsub.f32 %v5693_v9, %v2189_v3  ;;  %2332 = vadd.xlane.f32.xlu0 %v2331_v7  ;;  %v2334_v10 = vsel %vm794_vm4, %v5760_v59, 0.0 }
 0x3c6   :  { %v2202_v12 = vsub.f32 %v5699_v16, %v2192_v6  ;;  %4707 = vpow2.f32 %v2212_v56  ;;  %2335 = vadd.xlane.f32.xlu1 %v2334_v10 }
 0x3c7   :  { %v5768_v11 = vpop.eup %4697  ;;  %v2214_v13 = vmul.f32 1.442695, %v2201_v5 }
 0x3c8   :  { %v2216_v15 = vmul.f32 1.442695, %v2202_v12  ;;  %v5770_v17 = vpop.eup %4699  ;;  %v2195_v19 = vpop.xlane.xlu0 %2194  ;;  %v2337_v20 = vsel %vm794_vm4, %v5768_v11, 0.0  ;;  %v5831_v12 = vld [vmem:[#allocation13 + $0x8] sm:$0xff] }
 0x3c9   :  { %4709 = vpow2.f32 %v2214_v13  ;;  %v2203_v9 = vsub.f32 %v5697_v14, %v2195_v19  ;;  %2338 = vadd.xlane.f32.xlu0 %v2337_v20  ;;  %v2220_v16 = vsel %vm794_vm4, %v5770_v17, 0.0 }
 0x3ca   :  { %4711 = vpow2.f32 %v2216_v15  ;;  %2221 = vadd.xlane.f32.xlu1 %v2220_v16 }
 0x3cb   :  { %v5777_v22 = vpop.eup %4701  ;;  %v2218_v25 = vmul.f32 1.442695, %v2203_v9 }
 0x3cc   :  { %v5779_v18 = vpop.eup %4703  ;;  %v2223_v21 = vsel %vm794_vm4, %v5777_v22, 0.0 }
 0x3cd   :  { %4713 = vpow2.f32 %v2218_v25  ;;  %2224 = vadd.xlane.f32.xlu0 %v2223_v21  ;;  %v2226_v27 = vsel %vm794_vm4, %v5779_v18, 0.0 }
 0x3ce   :  { %2227 = vadd.xlane.f32.xlu1 %v2226_v27 }
 0x3cf   :  { %v5785_v14 = vpop.eup %4705 }
 0x3d0   :  { %v5787_v29 = vpop.eup %4707  ;;  %v2229_v30 = vsel %vm794_vm4, %v5785_v14, 0.0 }
 0x3d1   :  { %2230 = vadd.xlane.f32.xlu0 %v2229_v30  ;;  %v2232_v23 = vsel %vm794_vm4, %v5787_v29, 0.0 }
 0x3d2   :  { %2233 = vadd.xlane.f32.xlu1 %v2232_v23 }
 0x3d3   :  { %v5793_v31 = vpop.eup %4709 }
 0x3d4   :  { %v5795_v32 = vpop.eup %4711  ;;  %v2235_v34 = vsel %vm794_vm4, %v5793_v31, 0.0 }
 0x3d5   :  { %2236 = vadd.xlane.f32.xlu0 %v2235_v34  ;;  %v2238_v35 = vsel %vm794_vm4, %v5795_v32, 0.0 }
 0x3d6   :  { %2239 = vadd.xlane.f32.xlu1 %v2238_v35 }
 0x3d7   :  { %v5801_v28 = vpop.eup %4713 }
 0x3d8   :  { %v2241_v37 = vsel %vm794_vm4, %v5801_v28, 0.0 }
 0x3d9   :  { %2242 = vadd.xlane.f32.xlu0 %v2241_v37 }
 0x3e7   :  { %4654 = vrot.lane.b32.xlu1 %v5672_v60, %s5095_s10 }
 0x3eb   :  { %4664 = vrot.lane.b32.xlu1 %v5672_v60, %s5097_s21 }
 0x3ef   :  { %4659 = vrot.lane.b32.xlu0 %v5672_v60, %s5096_s17 }
 0x3f3   :  { %4669 = vrot.lane.b32.xlu0 %v5675_v61, %s5095_s10 }
 0x3f7   :  { %4674 = vrot.lane.b32.xlu0 %v5675_v61, %s5096_s17 }
 0x443   :  { %v2321_v38 = vpop.xlane.xlu0 %2320 }
 0x444   :  { %4715 = vrcp.f32 %v2321_v38 }
 0x446   :  { %v2318_v39 = vpop.xlane.xlu1 %2317 }
 0x447   :  { %4717 = vrcp.f32 %v2318_v39 }
 0x44a   :  { %v2324_v40 = vpop.xlane.xlu1 %2323 }
 0x44b   :  { %4719 = vrcp.f32 %v2324_v40 }
 0x44e   :  { %v4716_v41 = vpop.eup %4715  ;;  %v2327_v42 = vpop.xlane.xlu0 %2326 }
 0x44f   :  { %4721 = vrcp.f32 %v2327_v42  ;;  %v2330_v4 = vpop.xlane.xlu1 %2329  ;;  %v2349_v60 = vmul.f32 %v4716_v41, %v5731_v24 }
 0x450   :  { %4723 = vrcp.f32 %v2330_v4 }
 0x451   :  { %v4718_v44 = vpop.eup %4717  ;;  %v2357_v47 = vmul.f32 %v2349_v60, %v5815_v43 }
 0x452   :  { %v2333_v48 = vpop.xlane.xlu0 %2332  ;;  %v2348_v49 = vmul.f32 %v4718_v44, %v5736_v26 }
 0x453   :  { %4725 = vrcp.f32 %v2333_v48  ;;  %v2336_v50 = vpop.xlane.xlu1 %2335  ;;  %2390 = vrot.lane.b32.xlu0 %v2357_v47, %s5086_s16  ;;  %2373 = vst.msk [vmem:[#allocation25 + $0x8] sm:$0xff] %vm794_vm4, %v2357_v47 }
 0x454   :  { %4727 = vrcp.f32 %v2336_v50  ;;  %v2356_v2 = vmul.f32 %v2348_v49, %v5815_v43 }
 0x455   :  { %v4720_v8 = vpop.eup %4719 }
 0x456   :  { %v2339_v55 = vpop.xlane.xlu0 %2338  ;;  %2388 = vrot.lane.b32.xlu1 %v2356_v2, %s5086_s16  ;;  %2372 = vst.msk [vmem:[#allocation25] sm:$0xff] %vm794_vm4, %v2356_v2  ;;  %v2350_v24 = vmul.f32 %v4720_v8, %v5742_v36 }
 0x457   :  { %4729 = vrcp.f32 %v2339_v55  ;;  %v2222_v56 = vpop.xlane.xlu1 %2221  ;;  %4679 = vrot.lane.b32.xlu0 %v5675_v61, %s5097_s21 }
 0x458   :  { %4731 = vrcp.f32 %v2222_v56  ;;  %v2358_v26 = vmul.f32 %v2350_v24, %v5815_v43 }
 0x459   :  { %v4722_v3 = vpop.eup %4721 }
 0x45a   :  { %v4724_v6 = vpop.eup %4723  ;;  %v2225_v7 = vpop.xlane.xlu0 %2224  ;;  %v2351_v5 = vmul.f32 %v4722_v3, %v5748_v33  ;;  %2374 = vst.msk [vmem:[#allocation25 + $0x10] sm:$0xff] %vm794_vm4, %v2358_v26 }
 0x45b   :  { %4733 = vrcp.f32 %v2225_v7  ;;  %v2228_v10 = vpop.xlane.xlu1 %2227  ;;  %v2352_v36 = vmul.f32 %v4724_v6, %v5750_v45 }
 0x45c   :  { %4735 = vrcp.f32 %v2228_v10  ;;  %v2359_v13 = vmul.f32 %v2351_v5, %v5815_v43 }
 0x45d   :  { %v4726_v61 = vpop.eup %4725  ;;  %v2360_v15 = vmul.f32 %v2352_v36, %v5831_v12 }
 0x45e   :  { %v4728_v19 = vpop.eup %4727  ;;  %v2231_v20 = vpop.xlane.xlu0 %2230  ;;  %2375 = vst.msk [vmem:[#allocation25 + $0x18] sm:$0xff] %vm794_vm4, %v2359_v13  ;;  %2394 = vrot.lane.b32.xlu1 %v2359_v13, %s5086_s16  ;;  %v2353_v33 = vmul.f32 %v4726_v61, %v5758_v51 }
 0x45f   :  { %4737 = vrcp.f32 %v2231_v20  ;;  %v2234_v9 = vpop.xlane.xlu1 %2233  ;;  %v2354_v16 = vmul.f32 %v4728_v19, %v5760_v59  ;;  %2376 = vst.msk [vmem:[#allocation25 + $0x20] sm:$0xff] %vm794_vm4, %v2360_v15 }
 0x460   :  { %4739 = vrcp.f32 %v2234_v9  ;;  %v2361_v45 = vmul.f32 %v2353_v33, %v5831_v12 }
 0x461   :  { %v4730_v25 = vpop.eup %4729  ;;  %v2362_v21 = vmul.f32 %v2354_v16, %v5831_v12 }
 0x462   :  { %v4732_v27 = vpop.eup %4731  ;;  %v2237_v30 = vpop.xlane.xlu0 %2236  ;;  %2392 = vrot.lane.b32.xlu1 %v2358_v26, %s5086_s16  ;;  %2377 = vst.msk [vmem:[#allocation25 + $0x28] sm:$0xff] %vm794_vm4, %v2361_v45  ;;  %v2355_v51 = vmul.f32 %v4730_v25, %v5768_v11 }
 0x463   :  { %4741 = vrcp.f32 %v2237_v30  ;;  %2400 = vrot.lane.b32.xlu0 %v2362_v21, %s5086_s16  ;;  %2378 = vst.msk [vmem:[#allocation25 + $0x30] sm:$0xff] %vm794_vm4, %v2362_v21  ;;  %v2240_v59 = vpop.xlane.xlu1 %2239  ;;  %v2252_v23 = vmul.f32 %v4732_v27, %v5770_v17 }
 0x464   :  { %4743 = vrcp.f32 %v2240_v59  ;;  %v2363_v34 = vmul.f32 %v2355_v51, %v5831_v12 }
 0x465   :  { %v4734_v35 = vpop.eup %4733  ;;  %v5851_v37 = vmul.f32 %v2252_v23, %v5815_v43 }
 0x466   :  { %v4736_v38 = vpop.eup %4735  ;;  %v2243_v39 = vpop.xlane.xlu0 %2242  ;;  %2398 = vrot.lane.b32.xlu1 %v2361_v45, %s5086_s16  ;;  %2379 = vst.msk [vmem:[#allocation25 + $0x38] sm:$0xff] %vm794_vm4, %v2363_v34  ;;  %v2253_v11 = vmul.f32 %v4734_v35, %v5777_v22 }
 0x467   :  { %4745 = vrcp.f32 %v2243_v39  ;;  %2402 = vrot.lane.b32.xlu0 %v2363_v34, %s5086_s16  ;;  %v5857_v40 = vpop.permute.xlu1 %4654  ;;  %2364 = vst.msk [vmem:[#allocation24] sm:$0xff] %vm794_vm4, %v5851_v37  ;;  %v2254_v17 = vmul.f32 %v4736_v38, %v5779_v18 }
 0x468   :  { %v4657_v41 = vunpack.i.h.bf16 %v5857_v40  ;;  %v4656_v42 = vunpack.i.l.bf16 %v5857_v40  ;;  %v2261_v4 = vmul.f32 %v2253_v11, %v5815_v43 }
 0x469   :  { %v4738_v60 = vpop.eup %4737  ;;  %v5866_v44 = vmul.f32 %v2254_v17, %v5815_v43 }
 0x46a   :  { %v4740_v22 = vpop.eup %4739  ;;  %v4561_v47 = vpack.c.bf16 %v4657_v41, %v4656_v42  ;;  %2396 = vrot.lane.b32.xlu1 %v2360_v15, %s5086_s16  ;;  %2365 = vst.msk [vmem:[#allocation24 + $0x8] sm:$0xff] %vm794_vm4, %v2261_v4  ;;  %v2255_v18 = vmul.f32 %v4738_v60, %v5785_v14 }
 0x46b   :  { %971 = vrot.lane.b32.xlu0 %v5660_v53, %s5097_s21  ;;  %2366 = vst.msk [vmem:[#allocation24 + $0x10] sm:$0xff] %vm794_vm4, %v5866_v44  ;;  %v2256_v48 = vmul.f32 %v4740_v22, %v5787_v29 }
 0x46c   :  { %4562 = vmatpush3.bf16.msra.mxu1 %v4561_v47  ;;  %v2263_v49 = vmul.f32 %v2255_v18, %v5815_v43 }
 0x46d   :  { %v4742_v50 = vpop.eup %4741  ;;  %4566 = vmatprep.subr.bf16.mxu1 %v5100_v54  ;;  %v5881_v2 = vmul.f32 %v2256_v48, %v5831_v12 }
 0x46e   :  { %v4744_v8 = vpop.eup %4743  ;;  %959 = vrot.lane.b32.xlu1 %v5660_v53, %s5095_s10  ;;  %2367 = vst.msk [vmem:[#allocation24 + $0x18] sm:$0xff] %vm794_vm4, %v2263_v49  ;;  %v2257_v14 = vmul.f32 %v4742_v50, %v5793_v31 }
 0x46f   :  { %967 = vrot.lane.b32.xlu0 %v5658_v52, %s5096_s17  ;;  %v2258_v29 = vmul.f32 %v4744_v8, %v5795_v32  ;;  %2368 = vst.msk [vmem:[#allocation24 + $0x20] sm:$0xff] %vm794_vm4, %v5881_v2  ;;  %v5908_v32 = vpop.permute.xlu0 %4659 }
 0x470   :  { %v2265_v43 = vmul.f32 %v2257_v14, %v5831_v12  ;;  %v4662_v5 = vunpack.i.h.bf16 %v5908_v32 }
 0x471   :  { %v4746_v55 = vpop.eup %4745  ;;  %v5894_v24 = vmul.f32 %v2258_v29, %v5831_v12 }
 0x472   :  { %965 = vrot.lane.b32.xlu1 %v5660_v53, %s5096_s17  ;;  %v2259_v56 = vmul.f32 %v4746_v55, %v5801_v28  ;;  %2369 = vst.msk [vmem:[#allocation24 + $0x28] sm:$0xff] %vm794_vm4, %v2265_v43  ;;  %v5912_v28 = vpop.permute.xlu1 %4664  ;;  %v3637_v55 = vld [vmem:[#allocation19 + $0x8] sm:$0xff] }
 0x473   :  { %2370 = vst.msk [vmem:[#allocation24 + $0x30] sm:$0xff] %vm794_vm4, %v5894_v24  ;;  %v5910_v26 = vpop.permute.xlu0 %4669  ;;  %v4667_v6 = vunpack.i.h.bf16 %v5912_v28  ;;  %v4666_v7 = vunpack.i.l.bf16 %v5912_v28  ;;  %v3734_v28 = vld [vmem:[#allocation19 + $0x20] sm:$0xff] }
 0x474   :  { %v2267_v31 = vmul.f32 %v2259_v56, %v5831_v12  ;;  %v4661_v12 = vunpack.i.l.bf16 %v5908_v32  ;;  %v4672_v20 = vunpack.i.h.bf16 %v5910_v26  ;;  %v4671_v33 = vunpack.i.l.bf16 %v5910_v26 }
 0x475   :  { %v4567_v36 = vpack.c.bf16 %v4667_v6, %v4666_v7 }
 0x476   :  { %961 = vrot.lane.b32.xlu1 %v5658_v52, %s5095_s10  ;;  %2371 = vst.msk [vmem:[#allocation24 + $0x38] sm:$0xff] %vm794_vm4, %v2267_v31  ;;  %v4564_v15 = vpack.c.bf16 %v4662_v5, %v4661_v12  ;;  %v4573_v16 = vpack.c.bf16 %v4672_v20, %v4671_v33  ;;  %v3736_v20 = vld [vmem:[#allocation19 + $0x30] sm:$0xff] }
 0x477   :  { %v5914_v3 = vpop.permute.xlu0 %4674 }
 0x478   :  { %v4677_v34 = vunpack.i.h.bf16 %v5914_v3  ;;  %v4676_v35 = vunpack.i.l.bf16 %v5914_v3  ;;  %v3735_v3 = vld [vmem:[#allocation19 + $0x28] sm:$0xff] }
 0x479   :  { %v4617_v6 = vpack.c.bf16 %v3735_v3, %v3734_v28 }
 0x47a   :  { %973 = vrot.lane.b32.xlu1 %v5658_v52, %s5097_s21  ;;  %v4576_v11 = vpack.c.bf16 %v4677_v34, %v4676_v35 }
 0x4c5   :  { %v2391_v10 = vpop.permute.xlu0 %2390 }
 0x4c6   :  { %v5923_v13 = vsel %vm794_vm4, %v2261_v4, %v2391_v10  ;;  %v3639_v10 = vld [vmem:[#allocation19 + $0x18] sm:$0xff] }
 0x4c7   :  { %4363 = vmatmul.mubr.msk.f32.vlgmr.msra.gmra.mrb[22].mxu1 %vm977_vm3, %v5923_v13 }
 0x4c8   :  { %4568 = vmatpush3.bf16.msra.mxu1 %v4567_v36  ;;  %v2389_v61 = vpop.permute.xlu1 %2388  ;;  %4376 = vmatprep.mubr.msk.f32.mxu1 %vm5099_vm2, %v5098_v46 }
 0x4c9   :  { %v2412_v19 = vsel %vm794_vm4, %v5851_v37, %v2389_v61  ;;  %4572 = vmatprep.subr.bf16.mxu1 %v5100_v54  ;;  %v5940_v45 = vpop.permute.xlu0 %4679 }
 0x4ca   :  { %4356 = vmatmul.mubr.msk.f32.vlgmr.msra.gmra.mrb[22].mxu0 %vm977_vm3, %v2412_v19  ;;  %v4682_v27 = vunpack.i.h.bf16 %v5940_v45  ;;  %v4681_v30 = vunpack.i.l.bf16 %v5940_v45 }
 0x4cb   :  { %4565 = vmatpush3.bf16.msra.mxu0 %v4564_v15  ;;  %4369 = vmatprep.mubr.msk.f32.mxu0 %vm5099_vm2, %v5098_v46 }
 0x4cc   :  { %4569 = vmatprep.subr.bf16.mxu0 %v5100_v54  ;;  %v4579_v37 = vpack.c.bf16 %v4682_v27, %v4681_v30 }
 0x4d0   :  { %v2395_v9 = vpop.permute.xlu1 %2394 }
 0x4d1   :  { %v2415_v25 = vsel %vm794_vm4, %v2263_v49, %v2395_v9 }
 0x4d2   :  { %4377 = vmatmul.mubr.msk.f32.vlgmr.msra.gmra.mrb[24].mxu1 %vm977_vm3, %v2415_v25 }
 0x4d3   :  { %4574 = vmatpush3.bf16.msra.mxu1 %v4573_v16  ;;  %4390 = vmatprep.mubr.msk.f32.mxu1 %vm5099_vm2, %v5098_v46 }
 0x4d4   :  { %v2393_v21 = vpop.permute.xlu1 %2392  ;;  %4578 = vmatprep.subr.bf16.mxu1 %v5100_v54 }
 0x4d5   :  { %v2401_v51 = vpop.permute.xlu0 %2400  ;;  %v2414_v59 = vsel %vm794_vm4, %v5866_v44, %v2393_v21 }
 0x4d6   :  { %4370 = vmatmul.mubr.msk.f32.vlgmr.msra.gmra.mrb[24].mxu0 %vm977_vm3, %v2414_v59  ;;  %v2418_v60 = vsel %vm794_vm4, %v5894_v24, %v2401_v51 }
 0x4d7   :  { %4571 = vmatpush3.bf16.msra.mxu0 %v5678_v62  ;;  %4383 = vmatprep.mubr.msk.f32.mxu0 %vm5099_vm2, %v5098_v46 }
 0x4d8   :  { %v2399_v23 = vpop.permute.xlu1 %2398  ;;  %4575 = vmatprep.subr.bf16.mxu0 %v5100_v54 }
 0x4d9   :  { %v2417_v38 = vsel %vm794_vm4, %v2265_v43, %v2399_v23  ;;  %v2403_v39 = vpop.permute.xlu0 %2402  ;;  %v3636_v43 = vld [vmem:[#allocation19] sm:$0xff] }
 0x4da   :  { %4391 = vmatmul.mubr.msk.f32.vlgmr.msra.gmra.mrb[26].mxu1 %vm977_vm3, %v2417_v38  ;;  %v2419_v17 = vsel %vm794_vm4, %v2267_v31, %v2403_v39  ;;  %v4605_v24 = vpack.c.bf16 %v3637_v55, %v3636_v43 }
 0x4db   :  { %4580 = vmatpush3.bf16.msra.mxu1 %v4579_v37  ;;  %4404 = vmatprep.mubr.msk.f32.mxu1 %vm5099_vm2, %v5098_v46 }
 0x4dc   :  { %v2397_v62 = vpop.permute.xlu1 %2396  ;;  %4584 = vmatprep.subr.bf16.mxu1 %v5100_v54 }
 0x4dd   :  { %v2416_v41 = vsel %vm794_vm4, %v5881_v2, %v2397_v62  ;;  %v972_v22 = vpop.permute.xlu0 %971 }
 0x4de   :  { %4384 = vmatmul.mubr.msk.f32.vlgmr.msra.gmra.mrb[26].mxu0 %vm977_vm3, %v2416_v41  ;;  %4405 = vmatmul.mubr.msk.f32.vlgmr.msra.gmra.mrb[28].mxu1 %vm977_vm3, %v2419_v17  ;;  %v4591_v18 = vpack.c.bf16 %v4666_v7, %v972_v22 }
 0x4df   :  { %4577 = vmatpush3.bf16.msra.mxu0 %v4576_v11  ;;  %4397 = vmatprep.mubr.msk.f32.mxu0 %vm5099_vm2, %v5098_v46 }
 0x4e0   :  { %v960_v4 = vpop.permute.xlu1 %959  ;;  %4581 = vmatprep.subr.bf16.mxu0 %v5100_v54  ;;  %4418 = vmatprep.mubr.msk.f32.mxu1 %vm5099_vm2, %v5098_v46 }
 0x4e1   :  { %v4585_v44 = vpack.c.bf16 %v4656_v42, %v960_v4 }
 0x4e2   :  { %4398 = vmatmul.mubr.msk.f32.vlgmr.msra.gmra.mrb[28].mxu0 %vm977_vm3, %v2418_v60 }
 0x4e3   :  { %4583 = vmatpush3.bf16.msra.mxu0 %v4582_v63  ;;  %4586 = vmatpush3.bf16.msra.mxu1 %v4585_v44  ;;  %v968_v63 = vpop.permute.xlu0 %967 }
 0x4e4   :  { %v966_v47 = vpop.permute.xlu1 %965  ;;  %4411 = vmatprep.mubr.msk.f32.mxu0 %vm5099_vm2, %v5098_v46  ;;  %4587 = vmatprep.subr.bf16.mxu0 %v5100_v54  ;;  %v4600_v48 = vpack.c.bf16 %v4676_v35, %v968_v63  ;;  %v184_v63 = vld [vmem:[#allocation4] sm:$0xff] }
 0x4e5   :  { %v4588_v40 = vpack.c.bf16 %v4661_v12, %v966_v47  ;;  %4590 = vmatprep.subr.bf16.mxu1 %v5100_v54  ;;  %v3638_v12 = vld [vmem:[#allocation19 + $0x10] sm:$0xff] }
 0x4e6   :  { %4412 = vmatmul.mubr.msk.f32.vlgmr.msra.gmra.mrb[30].mxu0 %vm977_vm3, %v2412_v19  ;;  %4419 = vmatmul.mubr.msk.f32.vlgmr.msra.gmra.mrb[30].mxu1 %vm977_vm3, %v5923_v13  ;;  %v4611_v36 = vpack.c.bf16 %v3639_v10, %v3638_v12 }
 0x4e7   :  { %4589 = vmatpush3.bf16.msra.mxu0 %v4588_v40  ;;  %4592 = vmatpush3.bf16.msra.mxu1 %v4591_v18 }
 0x4e8   :  { %v962_v53 = vpop.permute.xlu1 %961  ;;  %4425 = vmatprep.mubr.msk.f32.mxu0 %vm5099_vm2, %v5098_v46  ;;  %4432 = vmatprep.mubr.msk.f32.mxu1 %vm5099_vm2, %v5098_v46 }
 0x4e9   :  { %v4597_v58 = vpack.c.bf16 %v4671_v33, %v962_v53  ;;  %4593 = vmatprep.subr.bf16.mxu0 %v5100_v54  ;;  %4596 = vmatprep.subr.bf16.mxu1 %v5100_v54  ;;  %v3737_v33 = vld [vmem:[#allocation19 + $0x38] sm:$0xff] }
 0x4ea   :  { %4426 = vmatmul.mubr.msk.f32.vlgmr.msra.gmra.mrb[32].mxu0 %vm977_vm3, %v2414_v59  ;;  %4433 = vmatmul.mubr.msk.f32.vlgmr.msra.gmra.mrb[32].mxu1 %vm977_vm3, %v2415_v25  ;;  %v4623_v9 = vpack.c.bf16 %v3737_v33, %v3736_v20 }
 0x4eb   :  { %4595 = vmatpush3.bf16.msra.mxu0 %v4594_v1  ;;  %4598 = vmatpush3.bf16.msra.mxu1 %v4597_v58 }
 0x4ec   :  { %v974_v42 = vpop.permute.xlu1 %973  ;;  %4439 = vmatprep.mubr.msk.f32.mxu0 %vm5099_vm2, %v5098_v46  ;;  %4446 = vmatprep.mubr.msk.f32.mxu1 %vm5099_vm2, %v5098_v46 }
 0x4ed   :  { %v4603_v49 = vpack.c.bf16 %v4681_v30, %v974_v42  ;;  %4599 = vmatprep.subr.bf16.mxu0 %v5100_v54  ;;  %4602 = vmatprep.subr.bf16.mxu1 %v5100_v54  ;;  %v186_v42 = vld [vmem:[#allocation7] sm:$0xff] }
 0x4ee   :  { %4440 = vmatmul.mubr.msk.f32.vlgmr.msra.gmra.mrb[34].mxu0 %vm977_vm3, %v2416_v41  ;;  %4447 = vmatmul.mubr.msk.f32.vlgmr.msra.gmra.mrb[34].mxu1 %vm977_vm3, %v2417_v38 }
 0x4ef   :  { %4601 = vmatpush3.bf16.msra.mxu0 %v4600_v48  ;;  %4604 = vmatpush3.bf16.msra.mxu1 %v4603_v49 }
 0x4f0   :  { %4453 = vmatprep.mubr.msk.f32.mxu0 %vm5099_vm2, %v5098_v46  ;;  %4460 = vmatprep.mubr.msk.f32.mxu1 %vm5099_vm2, %v5098_v46 }
 0x4f1   :  { %4607 = vmatprep.subr.msk.bf16.mxu0 %vm5374_vm1, %v4605_v24  ;;  %4619 = vmatprep.subr.msk.bf16.mxu1 %vm5374_vm1, %v4617_v6 }
 0x4f2   :  { %4454 = vmatmul.mubr.msk.f32.vlgmr.msra.gmra.mrb[36].mxu0 %vm977_vm3, %v2418_v60  ;;  %4461 = vmatmul.mubr.msk.f32.vlgmr.msra.gmra.mrb[36].mxu1 %vm977_vm3, %v2419_v17 }
 0x4f8   :  { %4610 = vmatpush3.bf16.xpose.msk.msra.mxu0 %vm5374_vm1, %v4605_v24  ;;  %4622 = vmatpush3.bf16.xpose.msk.msra.mxu1 %vm5374_vm1, %v4617_v6 }
 0x4f9   :  { %4613 = vmatprep.subr.msk.bf16.mxu0 %vm5374_vm1, %v4611_v36  ;;  %4625 = vmatprep.subr.msk.bf16.mxu1 %vm5374_vm1, %v4623_v9 }
 0x500   :  { %4616 = vmatpush3.bf16.xpose.msk.msra.mxu0 %vm5374_vm1, %v4611_v36  ;;  %4628 = vmatpush3.bf16.xpose.msk.msra.mxu1 %vm5374_vm1, %v4623_v9 }
 0x59a   :  { %v2562_v52 = vpop.f32.mrb[22].mxu1 }
 0x59b   :  { %3570 = vrot.lane.b32.xlu1 %v2562_v52, %s5086_s16  ;;  %v4364_v54 = vpop.f32.mrb[23].mxu1 }
 0x59d   :  { %v2489_v57 = vpop.f32.mrb[22].mxu0 }
 0x59e   :  { %3564 = vst.msk [vmem:[#allocation2] sm:$0xff] %vm794_vm4, %v2489_v57  ;;  %v4357_v1 = vpop.f32.mrb[23].mxu0 }
 0x59f   :  { %v4755_v1 = vld [vmem:[#allocation7 + $0x8] sm:$0xff] }
 0x5a5   :  { %v2708_v50 = vpop.f32.mrb[24].mxu1 }
 0x5a6   :  { %3612 = vrot.lane.b32.xlu1 %v2708_v50, %s5101_s5  ;;  %v4378_v2 = vpop.f32.mrb[25].mxu1 }
 0x5a9   :  { %v2635_v8 = vpop.f32.mrb[24].mxu0 }
 0x5aa   :  { %3591 = vrot.lane.b32.xlu1 %v2635_v8, %s5102_s3  ;;  %v4371_v46 = vpop.f32.mrb[25].mxu0 }
 0x5ad   :  { %v2854_v14 = vpop.f32.mrb[26].mxu1 }
 0x5ae   :  { %3572 = vrot.lane.b32.xlu0 %v2854_v14, %s5086_s16  ;;  %v4392_v29 = vpop.f32.mrb[27].mxu1  ;;  %v4756_v14 = vld [vmem:[#allocation4 + $0x8] sm:$0xff] }
 0x5b1   :  { %v2781_v56 = vpop.f32.mrb[26].mxu0  ;;  %v3000_v31 = vpop.f32.mrb[28].mxu1 }
 0x5b2   :  { %3565 = vst.msk [vmem:[#allocation2 + $0x8] sm:$0xff] %vm794_vm4, %v2781_v56  ;;  %v4385_v32 = vpop.f32.mrb[27].mxu0  ;;  %v4406_v26 = vpop.f32.mrb[29].mxu1 }
 0x5b5   :  { %v2927_v7 = vpop.f32.mrb[28].mxu0 }
 0x5b6   :  { %3593 = vrot.lane.b32.xlu0 %v2927_v7, %s5102_s3  ;;  %v4399_v5 = vpop.f32.mrb[29].mxu0 }
 0x5b9   :  { %v3070_v13 = vpop.f32.mrb[30].mxu0  ;;  %v3140_v61 = vpop.f32.mrb[30].mxu1 }
 0x5ba   :  { %3566 = vst.msk [vmem:[#allocation3] sm:$0xff] %vm794_vm4, %v3070_v13  ;;  %v4420_v15 = vpop.f32.mrb[31].mxu1  ;;  %3581 = vrot.lane.b32.xlu0 %v3140_v61, %s5086_s16  ;;  %v4413_v19 = vpop.f32.mrb[31].mxu0 }
 0x5bd   :  { %v3210_v16 = vpop.f32.mrb[32].mxu0  ;;  %v3280_v45 = vpop.f32.mrb[32].mxu1 }
 0x5be   :  { %v4434_v25 = vpop.f32.mrb[33].mxu1  ;;  %3623 = vrot.lane.b32.xlu1 %v3280_v45, %s5101_s5  ;;  %v4427_v21 = vpop.f32.mrb[33].mxu0 }
 0x5c1   :  { %v3350_v27 = vpop.f32.mrb[34].mxu0  ;;  %v3420_v30 = vpop.f32.mrb[34].mxu1 }
 0x5c2   :  { %3567 = vst.msk [vmem:[#allocation3 + $0x8] sm:$0xff] %vm794_vm4, %v3350_v27  ;;  %v4448_v51 = vpop.f32.mrb[35].mxu1  ;;  %3583 = vrot.lane.b32.xlu0 %v3420_v30, %s5086_s16  ;;  %3602 = vrot.lane.b32.xlu1 %v3210_v16, %s5102_s3  ;;  %v4441_v59 = vpop.f32.mrb[35].mxu0 }
 0x5c5   :  { %v3490_v23 = vpop.f32.mrb[36].mxu0  ;;  %v3560_v34 = vpop.f32.mrb[36].mxu1 }
 0x5c6   :  { %v4462_v35 = vpop.f32.mrb[37].mxu1  ;;  %3614 = vrot.lane.b32.xlu1 %v3000_v31, %s5101_s5  ;;  %3604 = vrot.lane.b32.xlu0 %v3490_v23, %s5102_s3  ;;  %v4455_v37 = vpop.f32.mrb[37].mxu0 }
 0x5ca   :  { %3625 = vrot.lane.b32.xlu0 %v3560_v34, %s5101_s5 }
 0x60d   :  { %v3571_v0 = vpop.permute.xlu1 %3570 }
 0x60e   :  { %3577 = vst.msk [vmem:[#allocation2] sm:$0xff] %vm3576_vm5, %v3571_v0 }
 0x618   :  { %v3613_v38 = vpop.permute.xlu1 %3612 }
 0x61c   :  { %v3592_v39 = vpop.permute.xlu1 %3591 }
 0x61d   :  { %3598 = vst.msk [vmem:[#allocation2] sm:$0xff] %vm3597_vm6, %v3592_v39 }
 0x61e   :  { %3619 = vst.msk [vmem:[#allocation2] sm:$0xff] %vm3618_vm7, %v3613_v38 }
 0x620   :  { %v3573_v62 = vpop.permute.xlu0 %3572 }
 0x621   :  { %3578 = vst.msk [vmem:[#allocation2 + $0x8] sm:$0xff] %vm3576_vm5, %v3573_v62 }
 0x625   :  { %v3631_v11 = vld [vmem:[#allocation2] sm:$0xff] }
 0x626   :  { %4471 = vmatprep.mubr.msk.f32.mxu0 %vm200_vm0, %v3631_v11 }
 0x628   :  { %v3594_v17 = vpop.permute.xlu0 %3593 }
 0x629   :  { %3599 = vst.msk [vmem:[#allocation2 + $0x8] sm:$0xff] %vm3597_vm6, %v3594_v17 }
 0x62c   :  { %v3582_v41 = vpop.permute.xlu0 %3581 }
 0x62d   :  { %3587 = vst.msk [vmem:[#allocation3] sm:$0xff] %vm3576_vm5, %v3582_v41 }
 0x630   :  { %v3624_v4 = vpop.permute.xlu1 %3623 }
 0x634   :  { %v3584_v60 = vpop.permute.xlu0 %3583  ;;  %v3603_v44 = vpop.permute.xlu1 %3602 }
 0x635   :  { %3588 = vst.msk [vmem:[#allocation3 + $0x8] sm:$0xff] %vm3576_vm5, %v3584_v60 }
 0x636   :  { %3608 = vst.msk [vmem:[#allocation3] sm:$0xff] %vm3597_vm6, %v3603_v44 }
 0x637   :  { %3629 = vst.msk [vmem:[#allocation3] sm:$0xff] %vm3618_vm7, %v3624_v4 }
 0x638   :  { %v3615_v22 = vpop.permute.xlu1 %3614  ;;  %v3605_v47 = vpop.permute.xlu0 %3604 }
 0x639   :  { %3620 = vst.msk [vmem:[#allocation2 + $0x8] sm:$0xff] %vm3618_vm7, %v3615_v22 }
 0x63a   :  { %3609 = vst.msk [vmem:[#allocation3 + $0x8] sm:$0xff] %vm3597_vm6, %v3605_v47 }
 0x63c   :  { %v3626_v18 = vpop.permute.xlu0 %3625 }
 0x63d   :  { %3630 = vst.msk [vmem:[#allocation3 + $0x8] sm:$0xff] %vm3618_vm7, %v3626_v18 }
 0x63e   :  { %v3633_v40 = vld [vmem:[#allocation3] sm:$0xff] }
 0x63f   :  { %4482 = vmatprep.mubr.msk.f32.mxu1 %vm200_vm0, %v3633_v40 }
 0x640   :  { %v3632_v53 = vld [vmem:[#allocation2 + $0x8] sm:$0xff] }
 0x641   :  { %4472 = vmatmul.mubr.msk.f32.vlgmr.msra.gmra.mrb[38].mxu0 %vm200_vm0, %v3632_v53 }
 0x642   :  { %4213 = vmatprep.mubr.msk.f32.mxu0 %vm200_vm0, %v184_v63 }
 0x643   :  { %4224 = vmatprep.mubr.msk.f32.mxu0 %vm200_vm0, %v186_v42 }
 0x644   :  { %v3634_v58 = vld [vmem:[#allocation3 + $0x8] sm:$0xff] }
 0x645   :  { %4483 = vmatmul.mubr.msk.f32.vlgmr.msra.gmra.mrb[38].mxu1 %vm200_vm0, %v3634_v58 }
 0x714   :  { %v4473_v48 = vpop.f32.mrb[38].mxu0 }
 0x715   :  { %v3724_v49 = vpop.f32.mrb[39].mxu0  ;;  %v3730_v29 = vadd.f32 %v4756_v14, %v4473_v48 }
 0x716   :  { %v3725_v52 = vadd.f32 %v3724_v49, %v184_v63 }
 0x717   :  { %v3834_v55 = vsel %vm200_vm0, %v3730_v29, 0.0 }
 0x718   :  { %v4484_v54 = vpop.f32.mrb[38].mxu1  ;;  %v3831_v57 = vsel %vm200_vm0, %v3725_v52, 0.0 }
 0x719   :  { %v3828_v50 = vadd.f32 %v4755_v1, %v4484_v54  ;;  %v3822_v2 = vpop.f32.mrb[39].mxu1  ;;  %3832 = vadd.xlane.f32.xlu0 %v3831_v57 }
 0x71a   :  { %v3823_v8 = vadd.f32 %v3822_v2, %v186_v42 }
 0x71b   :  { %v3875_v46 = vsel %vm200_vm0, %v3828_v50, 0.0 }
 0x71c   :  { %3876 = vadd.xlane.f32.xlu1 %v3875_v46  ;;  %v3872_v43 = vsel %vm200_vm0, %v3823_v8, 0.0 }
 0x71d   :  { %3873 = vadd.xlane.f32.xlu0 %v3872_v43 }
 0x721   :  { %3835 = vadd.xlane.f32.xlu0 %v3834_v55 }
 0x7a6   :  { %v3833_v24 = vpop.xlane.xlu0 %3832 }
 0x7a7   :  { %v3838_v56 = vmul.f32 0.03125, %v3833_v24 }
 0x7a9   :  { %v3877_v31 = vpop.xlane.xlu1 %3876  ;;  %v6071_v6 = vsub.f32 %v3725_v52, %v3838_v56 }
 0x7aa   :  { %v3879_v32 = vmul.f32 0.03125, %v3877_v31  ;;  %v3874_v26 = vpop.xlane.xlu0 %3873 }
 0x7ab   :  { %v3878_v28 = vmul.f32 0.03125, %v3874_v26  ;;  %v3842_v19 = vmul.f32 %v6071_v6, %v6071_v6 }
 0x7ac   :  { %v3881_v3 = vsub.f32 %v3828_v50, %v3879_v32 }
 0x7ad   :  { %v3880_v7 = vsub.f32 %v3823_v8, %v3878_v28  ;;  %v3844_v33 = vsel %vm200_vm0, %v3842_v19, 0.0 }
 0x7ae   :  { %v3836_v5 = vpop.xlane.xlu0 %3835  ;;  %v3883_v12 = vmul.f32 %v3881_v3, %v3881_v3 }
 0x7af   :  { %v3839_v10 = vmul.f32 0.03125, %v3836_v5  ;;  %v3882_v36 = vmul.f32 %v3880_v7, %v3880_v7 }
 0x7b0   :  { %v3887_v13 = vsel %vm200_vm0, %v3883_v12, 0.0 }
 0x7b1   :  { %v6074_v61 = vsub.f32 %v3730_v29, %v3839_v10  ;;  %3888 = vadd.xlane.f32.xlu0 %v3887_v13  ;;  %v3884_v15 = vsel %vm200_vm0, %v3882_v36, 0.0 }
 0x7b2   :  { %3885 = vadd.xlane.f32.xlu1 %v3884_v15 }
 0x7b3   :  { %v3843_v20 = vmul.f32 %v6074_v61, %v6074_v61 }
 0x7b5   :  { %v3847_v9 = vsel %vm200_vm0, %v3843_v20, 0.0 }
 0x7b6   :  { %3845 = vadd.xlane.f32.xlu1 %v3844_v33  ;;  %3848 = vadd.xlane.f32.xlu0 %v3847_v9 }
 0x7b7   :  { %4988 = shalt.err (!%p4985_p0)
}
 0x7b8   :  { %s4989_s0 = scalar_lea.hbm %s6177_s15, 1024 }
 0x7b9   :  { %p4990_p1 = scmp.ne.s32.totalorder %s6177_s15, %s4989_s0  ;;  %p4993_p2 = scmp.lt.u32.totalorder %s4989_s0, %s6177_s15 }
 0x7bb   :  { %p4995_p3 = pnand %p4993_p2, %p4990_p1 }
 0x7bd   :  { %4998 = shalt.err (!%p4995_p3)
}
 0x7be   :  { %3959 = dma.vmem_to_hbm [thread:$0]  %s3954_s19, 1024, %s6177_s15, [#allocation26], %s5085_s30, %s5085_s30, %s5086_s16   ;;  %v3858_v27 = vlaneseq }
 0x7bf   :  { %v3635_v62 = vld [vmem:[%s6173_s11] sm:$0xf]  ;;  %s5104_s9 = smov [#allocation22]   ;;  %s5105_s10 = smov [#allocation24]  }
 0x7c0   :  { %v3859_v37 = vshrl.u32 %v3858_v27, 7  ;;  %s3929_s25 = sshll.u32 %s5104_s9, 4  ;;  %s3941_s26 = sshll.u32 %s5105_s10, 4  ;;  %s3930_s25 = int_to_ptr.vmem [resolvable:$true] %s3929_s25  ;;  %s6104_s26 = int_to_ptr.vmem [resolvable:$true] %s3941_s26 }
 0x7c1   :  { %s5106_s11 = smov [#allocation21]   ;;  %s4999_s17 = scalar_lea.vmem %s3930_s25, 256 }
 0x7c2   :  { %v3900_v39 = vsub.s32 2, %v3859_v37  ;;  %v3906_v11 = vsub.s32 3, %v3859_v37  ;;  %v3860_v4 = vsub.s32 0, %v3859_v37  ;;  %v3866_v18 = vsub.s32 1, %v3859_v37  ;;  %s6107_s6 = sshll.u32 %s5106_s11, 4  ;;  %p5000_p4 = scmp.ne.s32.totalorder %s3930_s25, %s4999_s17  ;;  %s3918_s6 = int_to_ptr.vmem [resolvable:$true] %s6107_s6 }
 0x7c3   :  { %p5004_p5 = scmp.lt.s32.totalorder %s3930_s25, %s3930_s25  ;;  %p5005_p6 = scmp.lt.s32.totalorder %s4999_s17, %s4999_s17 }
 0x7c4   :  { %v3901_v17 = vrot.slane %v3635_v62, %v3900_v39  ;;  %v3907_v22 = vrot.slane %v3635_v62, %v3906_v11  ;;  %v3861_v58 = vrot.slane %v3635_v62, %v3860_v4  ;;  %v3867_v54 = vrot.slane %v3635_v62, %v3866_v18 }
 0x7c5   :  { %p5006_p7 = por %p5005_p6, %p5004_p5 }
 0x7c7   :  { %p5007_p8 = pnand %p5006_p7, %p5000_p4 }
 0x83e   :  { %v3889_v16 = vpop.xlane.xlu0 %3888 }
 0x83f   :  { %v3891_v45 = vmul.f32 0.03125, %v3889_v16  ;;  %v3886_v25 = vpop.xlane.xlu1 %3885 }
 0x840   :  { %v3890_v21 = vmul.f32 0.03125, %v3886_v25 }
 0x841   :  { %v3893_v30 = vadd.f32 1e-06, %v3891_v45 }
 0x842   :  { %v3892_v51 = vadd.f32 1e-06, %v3890_v21 }
 0x843   :  { %4747 = vrsqrt.f32 %v3893_v30  ;;  %v3846_v59 = vpop.xlane.xlu1 %3845  ;;  %v3849_v23 = vpop.xlane.xlu0 %3848 }
 0x844   :  { %4749 = vrsqrt.f32 %v3892_v51  ;;  %v3850_v34 = vmul.f32 0.03125, %v3846_v59  ;;  %v3851_v35 = vmul.f32 0.03125, %v3849_v23 }
 0x846   :  { %v3852_v0 = vadd.f32 1e-06, %v3850_v34  ;;  %v3853_v38 = vadd.f32 1e-06, %v3851_v35 }
 0x848   :  { %4751 = vrsqrt.f32 %v3852_v0 }
 0x849   :  { %4753 = vrsqrt.f32 %v3853_v38 }
 0x84d   :  { %v4748_v41 = vpop.eup %4747 }
 0x84e   :  { %v4750_v60 = vpop.eup %4749  ;;  %v3897_v44 = vmul.f32 %v4748_v41, %v3881_v3 }
 0x84f   :  { %v3896_v47 = vmul.f32 %v4750_v60, %v3880_v7 }
 0x850   :  { %v3903_v40 = vmul.f32 %v3901_v17, %v3897_v44 }
 0x851   :  { %v3902_v53 = vmul.f32 %v3901_v17, %v3896_v47 }
 0x852   :  { %v4752_v63 = vpop.eup %4751  ;;  %v3909_v42 = vadd.f32 %v3907_v22, %v3903_v40 }
 0x853   :  { %v4754_v48 = vpop.eup %4753  ;;  %v3856_v49 = vmul.f32 %v4752_v63, %v6071_v6  ;;  %v3908_v52 = vadd.f32 %v3907_v22, %v3902_v53 }
 0x854   :  { %v3857_v57 = vmul.f32 %v4754_v48, %v6074_v61  ;;  %3911 = vst.msk [vmem:[#allocation22 + $0x8] sm:$0xff] %vm200_vm0, %v3909_v42 }
 0x855   :  { %3910 = vst.msk [vmem:[#allocation22] sm:$0xff] %vm200_vm0, %v3908_v52  ;;  %v3862_v1 = vmul.f32 %v3861_v58, %v3856_v49 }
 0x856   :  { %5010 = shalt.err (!%p5007_p8)
}
 0x857   :  { %s5011_s21 = scalar_lea.hbm %s6175_s13, 256 }
 0x858   :  { %p5012_p9 = scmp.ne.s32.totalorder %s6175_s13, %s5011_s21  ;;  %p5015_p10 = scmp.lt.u32.totalorder %s5011_s21, %s6175_s13 }
 0x85a   :  { %p5017_p11 = pnand %p5015_p10, %p5012_p9 }
 0x85c   :  { %5020 = shalt.err (!%p5017_p11)
}
 0x85d   :  { %3935 = dma.vmem_to_hbm [thread:$0]  %s3930_s25, 256, %s6175_s13, [#allocation23], %s5085_s30, %s5085_s30, %s5086_s16   ;;  %v3863_v50 = vmul.f32 %v3861_v58, %v3857_v57  ;;  %v3868_v2 = vadd.f32 %v3867_v54, %v3862_v1 }
 0x85e   :  { %s5021_s29 = scalar_lea.vmem %s6104_s26, 1024  ;;  %p5026_p13 = scmp.lt.s32.totalorder %s6104_s26, %s6104_s26 }
 0x85f   :  { %p5022_p12 = scmp.ne.s32.totalorder %s6104_s26, %s5021_s29  ;;  %p5027_p0 = scmp.lt.s32.totalorder %s5021_s29, %s5021_s29 }
 0x861   :  { %p5028_p1 = por %p5027_p0, %p5026_p13 }
 0x863   :  { %p5029_p2 = pnand %p5028_p1, %p5022_p12 }
 0x865   :  { %5032 = shalt.err (!%p5029_p2)
}
 0x866   :  { %s5033_s18 = scalar_lea.hbm %s6176_s14, 1024 }
 0x867   :  { %p5034_p3 = scmp.ne.s32.totalorder %s6176_s14, %s5033_s18  ;;  %p5037_p4 = scmp.lt.u32.totalorder %s5033_s18, %s6176_s14 }
 0x869   :  { %p5039_p5 = pnand %p5037_p4, %p5034_p3 }
 0x86b   :  { %5042 = shalt.err (!%p5039_p5)
}
 0x86c   :  { %3947 = dma.vmem_to_hbm [thread:$0]  %s6104_s26, 1024, %s6176_s14, [#allocation23], %s5085_s30, %s5085_s30, %s5086_s16   ;;  %v3869_v8 = vadd.f32 %v3867_v54, %v3863_v50  ;;  %3870 = vst.msk [vmem:[#allocation21] sm:$0xff] %vm200_vm0, %v3868_v2 }
 0x86d   :  { %s5043_s20 = scalar_lea.vmem %s3918_s6, 256  ;;  %p5048_p7 = scmp.lt.s32.totalorder %s3918_s6, %s3918_s6 }
 0x86e   :  { %3871 = vst.msk [vmem:[#allocation21 + $0x8] sm:$0xff] %vm200_vm0, %v3869_v8  ;;  %p5044_p6 = scmp.ne.s32.totalorder %s3918_s6, %s5043_s20  ;;  %p5049_p8 = scmp.lt.s32.totalorder %s5043_s20, %s5043_s20 }
 0x870   :  { %p5050_p9 = por %p5049_p8, %p5048_p7 }
 0x872   :  { %p5051_p10 = pnand %p5050_p9, %p5044_p6 }
 0x874   :  { %5054 = shalt.err (!%p5051_p10)
}
 0x875   :  { %s5055_s10 = scalar_lea.hbm %s6174_s12, 256 }
 0x876   :  { %p5056_p11 = scmp.ne.s32.totalorder %s6174_s12, %s5055_s10  ;;  %p5059_p12 = scmp.lt.u32.totalorder %s5055_s10, %s6174_s12 }
 0x878   :  { %p5061_p13 = pnand %p5059_p12, %p5056_p11 }
 0x87a   :  { %5064 = shalt.err (!%p5061_p13)
}
 0x87b   :  { %3923 = dma.vmem_to_hbm [thread:$0]  %s3918_s6, 256, %s6174_s12, [#allocation6], %s5085_s30, %s5085_s30, %s5086_s16  }
 0x87c   :  { %5077 = dma.done.wait [#allocation6], 256  }
 0x87d   :  { %5078 = vsyncadd [#allocation6], 4294967040 }
 0x87e   :  { %5079 = dma.done.wait [#allocation23], 1280  }
 0x87f   :  { %5080 = vsyncadd [#allocation23], 4294966016 }
 0x880   :  { %5081 = dma.done.wait [#allocation26], 1024  }
 0x881   :  { %5082 = vsyncadd [#allocation26], 4294966272 }
 0x882   :  { %3972 = vsyncpa [#allocation5], 1 }
 0x883   :  { %3973 = vsyncpa [#allocation8], 1 }
 0x884   :  { %3974 = vsyncpa [#allocation11], 1 }
 0x885   :  { %3975 = vsyncpa [#allocation14], 1 }
 0x886   :  { %3976 = vsyncpa [#allocation17], 1 }
 0x887   :  { %3977 = vsyncpa [#allocation20], 1 }
 0x888   :  { %3978 = vsyncpa [#allocation6], 1 }
 0x889   :  { %3979 = vsyncpa [#allocation23], 1 }
 0x88a   :  { %3980 = vsyncpa [#allocation26], 1 }

</bundles_post_ra>
